<compile_context>
chip_gen: v7x
topology: tpu7x:2x2x1
jax: 0.10.0
libtpu: 0.0.40
codegen_flags: <defaults>
</compile_context>

<pallas_src>
import functools
import math

import numpy as np
import jax
import jax.numpy as jnp
from jax import lax
from jax.experimental import pallas as pl
from jax.experimental.pallas import tpu as pltpu

# --------------------- config (mirrors ConvEP.__init__ size bookkeeping) ----------------------
BATCH = 2
INPUT_SIZE = 16
C_LIST = [8, 4, 1]            # Conv[0]: 4->8, Conv[1]: 1->4 ; data has 1 channel
CONV_F = 3
F_POOL = 2
PAD = [1, 1]
DT = 0.2
T_STEPS = 4

_size_conv = [INPUT_SIZE]
_size_pool = [INPUT_SIZE]
for _i in range(len(C_LIST) - 1):
    _c = _size_pool[_i] - CONV_F + 1 + 2 * PAD[-_i - 1]
    _size_conv.append(_c)
    _size_pool.append((_c - F_POOL) // F_POOL + 1)
SIZE_CONV = list(reversed(_size_conv))            # [8, 16, 16]
SIZE_POOL = list(reversed(_size_pool))            # [4, 8, 16]
FC_LAYERS = [10, C_LIST[0] * SIZE_POOL[0] ** 2]   # [10, 128]

_VMEM = pl.BlockSpec(memory_space=pltpu.MemorySpace.VMEM)


# ------------------------- host-side (loop-invariant) constant builders -----------------------
def _conv_blocks(w_oihw, W):
    """Block-diagonal conv weights for layout L: blk[k, x*Cin+ci, z*Cout+co] = (x==z)*w[co,ci,dy,dx]."""
    w = np.asarray(w_oihw, np.float32)
    Cout, Cin, F, _ = w.shape
    wk = np.ascontiguousarray(w.transpose(2, 3, 1, 0)).reshape(F * F, Cin, Cout)  # [k, ci, co]
    eye = np.eye(W, dtype=np.float32)
    blk = np.einsum('xz,kio->kxizo', eye, wk)                                      # (k,x,ci,z,co)
    return np.ascontiguousarray(blk.reshape(F * F, W * Cin, W * Cout))


def _row_sel(B, H):
    """prow[dy2][b*Hp+i, b*H+2i+dy2] = 1 (2x2 pool row selection)."""
    Hp = H // 2
    m = np.zeros((2, B * Hp, B * H), np.float32)
    for d in range(2):
        for b in range(B):
            for i in range(Hp):
                m[d, b * Hp + i, b * H + 2 * i + d] = 1.0
    return m


def _col_sel(W, C):
    """pcol[dx2][(2j+dx2)*C+c, j*C+c] = 1 (2x2 pool column selection, channels-inside-x)."""
    Wp = W // 2
    m = np.zeros((2, W * C, Wp * C), np.float32)
    for d in range(2):
        for j in range(Wp):
            for c in range(C):
                m[d, (2 * j + d) * C + c, j * C + c] = 1.0
    return m


def _flat_idx(B, H, W, C):
    """PyTorch MaxPool2d(return_indices) flat indices per window corner, in layout L."""
    Hp, Wp = H // 2, W // 2
    f = np.zeros((4, B * Hp, Wp * C), np.int32)
    for dy in range(2):
        for dx in range(2):
            k = dy * 2 + dx
            for b in range(B):
                for i in range(Hp):
                    for j in range(Wp):
                        f[k, b * Hp + i, j * C:(j + 1) * C] = (2 * i + dy) * W + (2 * j + dx)
    return f


# --------------------------------------- fused kernel -----------------------------------------
def _convep_fused_kernel(
        # inputs
        s0_ref, s1_ref, s2_ref, data_ref,
        wblk0_ref, b0_ref, wblkT_ref, wblk1_ref, b1_ref,
        prow0_ref, pcol0_ref, prow0T_ref, pcol0T_ref,
        prow1_ref, pcol1_ref, fidx0_ref, fidx1_ref,
        sel_ref, selT_ref, wbig_ref, w0b_ref, wfb_ref,
        # outputs
        s0_out, s1_out, s2_out, idx0_out, idx1_out,
        # scratch (zero-padded conv inputs)
        pad0_ref, padT_ref, pad1_ref,
        *, T, dt, B, C0, C1, C2, H0, H1, NFC):
    f32 = jnp.float32
    P0 = H0 // 2

    def conv_L(pad_ref, x3d, wblk_ref, H, W, Cin, Cout, bias_row):
        """3x3 stride-1 pad-1 conv in layout L: 9 shifted matmuls from a padded scratch ref."""
        pad_ref[:, 1:H + 1, Cin:(W + 1) * Cin] = x3d         # interior; border stays zero
        acc = jnp.zeros((B * H, W * Cout), f32)
        for k in range(9):
            dy, dx = k // 3, k % 3
            sl = pad_ref[:, dy:dy + H, dx * Cin:(dx + W) * Cin]       # (B, H, W*Cin)
            acc = acc + jnp.dot(sl.reshape(B * H, W * Cin), wblk_ref[k],
                                preferred_element_type=f32)
        if bias_row is not None:
            acc = acc + bias_row
        return acc                                            # (B*H, W*Cout)

    def pool(x, prow_ref, pcol_ref):
        """2x2 max pool (values + per-corner argmax masks, PyTorch first-max tie-break)."""
        r0 = jnp.dot(prow_ref[0], x, preferred_element_type=f32)
        r1 = jnp.dot(prow_ref[1], x, preferred_element_type=f32)
        c = [jnp.dot(r0, pcol_ref[0], preferred_element_type=f32),
             jnp.dot(r0, pcol_ref[1], preferred_element_type=f32),
             jnp.dot(r1, pcol_ref[0], preferred_element_type=f32),
             jnp.dot(r1, pcol_ref[1], preferred_element_type=f32)]
        m = jnp.maximum(jnp.maximum(c[0], c[1]), jnp.maximum(c[2], c[3]))
        is0 = c[0] == m
        is1 = jnp.logical_and(jnp.logical_not(is0), c[1] == m)
        is01 = jnp.logical_or(is0, is1)
        is2 = jnp.logical_and(jnp.logical_not(is01), c[2] == m)
        is3 = jnp.logical_not(jnp.logical_or(is01, is2))
        return m, (is0, is1, is2, is3)

    def pool_index(masks, fidx_ref):
        zi = jnp.zeros(fidx_ref.shape[1:], jnp.int32)
        out = zi
        for k in range(4):
            out = out + jnp.where(masks[k], fidx_ref[k], zi)
        return out

    # zero the padded-input scratch buffers once (their borders are never written again)
    pad0_ref[...] = jnp.zeros_like(pad0_ref)
    padT_ref[...] = jnp.zeros_like(padT_ref)
    pad1_ref[...] = jnp.zeros_like(pad1_ref)

    # ---- loop-invariant: pool(Conv[-1](data)) -> m1, P_ind[-1] (hoisted out of the T loop) ----
    conv1 = conv_L(pad1_ref, data_ref[...], wblk1_ref, H1, H1, C2, C1, b1_ref[...])  # (B*16,64)
    m1, masks1 = pool(conv1, prow1_ref, pcol1_ref)                                   # (B*8, 32)
    idx1_out[...] = pool_index(masks1, fidx1_ref)

    # state lives in the output refs across the loop iterations
    s0_out[...] = s0_ref[...]
    s1_out[...] = s1_ref[...]
    s2_out[...] = s2_ref[...]
    idx0_out[...] = jnp.zeros(idx0_out.shape, jnp.int32)

    def step(t, carry):
        s0 = s0_out[...]                                   # (B, 10)
        s1 = s1_out[...]                                   # (B*4, 32)   layout L
        s2 = s2_out[...]                                   # (B*8, 32)   layout L

        # ---- dsdt[0]: FC layer   pre = W0(s1.flatten_nchw) ----
        pre = jnp.zeros((B, NFC), f32) + w0b_ref[...]
        for i in range(P0):
            rows_i = jnp.dot(sel_ref[i], s1, preferred_element_type=f32)         # (B, 32)
            pre = pre + jnp.dot(rows_i, wbig_ref[i], preferred_element_type=f32)  # (B, 10)
        s0_new = s0 + dt * (-s0 + jnp.clip(pre, 0.0, 1.0))

        # ---- feedback mm(s0, W0.weight) in layout L ----
        fb = jnp.zeros((B * P0, P0 * C0), f32)
        for i in range(P0):
            contrib = jnp.dot(s0, wfb_ref[i], preferred_element_type=f32)         # (B, 32)
            fb = fb + jnp.dot(selT_ref[i], contrib, preferred_element_type=f32)   # (B*4, 32)

        # ---- pool(Conv[0](s2)), P_ind[0] ----
        c0 = conv_L(pad0_ref, s2.reshape(B, H0, H0 * C1), wblk0_ref,
                    H0, H0, C1, C0, b0_ref[...])                                  # (B*8, 64)
        m0, masks0 = pool(c0, prow0_ref, pcol0_ref)                               # (B*4, 32)
        idx0 = pool_index(masks0, fidx0_ref)

        s1_new = s1 + dt * (-s1 + jnp.clip(m0 + fb, 0.0, 1.0))

        # ---- conv_transpose2d(unpool(s1_old, P_ind[0]), Conv[0].weight, padding=P[0]) ----
        unp = jnp.zeros_like(c0)                                                  # (B*8, 64)
        for k in range(4):
            dy2, dx2 = k // 2, k % 2
            masked = jnp.where(masks0[k], s1, 0.0)                                # (B*4, 32)
            t1 = jnp.dot(prow0T_ref[dy2], masked, preferred_element_type=f32)     # (B*8, 32)
            unp = unp + jnp.dot(t1, pcol0T_ref[dx2], preferred_element_type=f32)  # (B*8, 64)
        s_un = conv_L(padT_ref, unp.reshape(B, H0, H0 * C0), wblkT_ref,
                      H0, H0, C0, C1, None)                                       # (B*8, 32)

        s2_new = s2 + dt * (-s2 + jnp.clip(m1 + s_un, 0.0, 1.0))

        s0_out[...] = s0_new
        s1_out[...] = s1_new
        s2_out[...] = s2_new
        idx0_out[...] = idx0
        return carry

    lax.fori_loop(0, T, step, 0)


# ------------------------------------------ wrapper -------------------------------------------
def convep_forward(s0, s1, s2, data, params, *, T, dt):
    """ConvEP.forward with beta=0, p_distribut=None, tracking=False: T free-phase steps."""
    W0w, W0b, C0w, C0b, C1w, C1b = params
    B = s0.shape[0]
    C0, C1, C2 = C_LIST                    # 8, 4, 1
    H0, H1 = SIZE_CONV[0], SIZE_CONV[1]    # 8, 16  (conv output spatial sizes)
    P0, P1 = H0 // 2, H1 // 2              # 4, 8   (pooled spatial sizes)
    NFC = FC_LAYERS[0]                     # 10

    W0w_np = np.asarray(W0w, np.float32)
    C0w_np = np.asarray(C0w, np.float32)
    C1w_np = np.asarray(C1w, np.float32)

    # conv weights as block matrices for layout L (and conv_transpose == flipped/swapped conv)
    wblk0 = _conv_blocks(C0w_np, H0)                                          # (9, 32, 64)
    wt_np = np.flip(C0w_np, axis=(2, 3)).transpose(1, 0, 2, 3)                # (4, 8, 3, 3)
    wblkT = _conv_blocks(wt_np, H0)                                           # (9, 64, 32)
    wblk1 = _conv_blocks(C1w_np, H1)                                          # (9, 16, 64)
    b0row = np.tile(np.asarray(C0b, np.float32), H0).reshape(1, H0 * C0)
    b1row = np.tile(np.asarray(C1b, np.float32), H1).reshape(1, H1 * C1)

    # pooling selection matrices (+ transposes for the MaxUnpool of layer 1) and flat indices
    prow0, pcol0 = _row_sel(B, H0), _col_sel(H0, C0)
    prow1, pcol1 = _row_sel(B, H1), _col_sel(H1, C1)
    prow0T = np.ascontiguousarray(prow0.transpose(0, 2, 1))
    pcol0T = np.ascontiguousarray(pcol0.transpose(0, 2, 1))
    fidx0 = _flat_idx(B, H0, H0, C0)
    fidx1 = _flat_idx(B, H1, H1, C1)

    # FC weights rearranged for the layout-L state (row i of the 4x4 pooled grid per block)
    W0r = W0w_np.reshape(NFC, C0, P0, P0)                                     # [o, c, i, j]
    wbig = np.ascontiguousarray(W0r.transpose(2, 3, 1, 0)).reshape(P0, P0 * C0, NFC)
    wfb = np.ascontiguousarray(W0r.transpose(2, 0, 3, 1)).reshape(P0, NFC, P0 * C0)
    sel = np.zeros((P0, B, B * P0), np.float32)
    selT = np.zeros((P0, B * P0, B), np.float32)
    for i in range(P0):
        for b in range(B):
            sel[i, b, b * P0 + i] = 1.0
            selT[i, b * P0 + i, b] = 1.0
    w0b2 = np.asarray(W0b, np.float32).reshape(1, NFC)

    # NCHW -> layout L (rows = (b, y), cols = (x, c))
    s1_L = jnp.transpose(s1, (0, 2, 3, 1)).reshape(B * P0, P0 * C0)
    s2_L = jnp.transpose(s2, (0, 2, 3, 1)).reshape(B * P1, P1 * C1)
    data3 = data.reshape(B, H1, H1 * C2)

    kernel = functools.partial(_convep_fused_kernel, T=T, dt=dt, B=B,
                               C0=C0, C1=C1, C2=C2, H0=H0, H1=H1, NFC=NFC)

    out_shape = (jax.ShapeDtypeStruct((B, NFC), jnp.float32),
                 jax.ShapeDtypeStruct((B * P0, P0 * C0), jnp.float32),
                 jax.ShapeDtypeStruct((B * P1, P1 * C1), jnp.float32),
                 jax.ShapeDtypeStruct((B * P0, P0 * C0), jnp.int32),
                 jax.ShapeDtypeStruct((B * P1, P1 * C1), jnp.int32))
    scratch = [pltpu.VMEM((B, H0 + 2, (H0 + 2) * C1), jnp.float32),   # padded s2
               pltpu.VMEM((B, H0 + 2, (H0 + 2) * C0), jnp.float32),   # padded unpool
               pltpu.VMEM((B, H1 + 2, (H1 + 2) * C2), jnp.float32)]   # padded data

    args = (s0, s1_L, s2_L, data3,
            jnp.asarray(wblk0), jnp.asarray(b0row), jnp.asarray(wblkT),
            jnp.asarray(wblk1), jnp.asarray(b1row),
            jnp.asarray(prow0), jnp.asarray(pcol0), jnp.asarray(prow0T), jnp.asarray(pcol0T),
            jnp.asarray(prow1), jnp.asarray(pcol1),
            jnp.asarray(fidx0), jnp.asarray(fidx1),
            jnp.asarray(sel), jnp.asarray(selT), jnp.asarray(wbig),
            jnp.asarray(w0b2), jnp.asarray(wfb))

    s0o, s1o_L, s2o_L, idx0_L, idx1_L = pl.pallas_call(
        kernel,
        out_shape=out_shape,
        in_specs=[_VMEM] * len(args),
        out_specs=(_VMEM,) * 5,
        scratch_shapes=scratch,
    )(*args)

    # layout L -> NCHW
    s1o = s1o_L.reshape(B, P0, P0, C0).transpose(0, 3, 1, 2)
    s2o = s2o_L.reshape(B, P1, P1, C1).transpose(0, 3, 1, 2)
    idx0 = idx0_L.reshape(B, P0, P0, C0).transpose(0, 3, 1, 2)
    idx1 = idx1_L.reshape(B, P1, P1, C1).transpose(0, 3, 1, 2)
    return (s0o, s1o, s2o), (idx0, idx1)


# ------------------------------- pure-JAX reference (for checking) ----------------------------
def _ref_conv(x, w, b, pad):
    out = lax.conv_general_dilated(x, w, (1, 1), [(pad, pad), (pad, pad)],
                                   dimension_numbers=('NCHW', 'OIHW', 'NCHW'))
    return out + b[None, :, None, None]


def _ref_pool(x):
    B, C, H, W = x.shape
    Hp, Wp = H // 2, W // 2
    xw = x.reshape(B, C, Hp, 2, Wp, 2).transpose(0, 1, 2, 4, 3, 5).reshape(B, C, Hp, Wp, 4)
    m = xw.max(-1)
    eq = xw == m[..., None]
    first = jnp.logical_and(eq, jnp.cumsum(eq, axis=-1) == 1)
    dy = jnp.array([0, 0, 1, 1])
    dx = jnp.array([0, 1, 0, 1])
    ii = jnp.arange(Hp).reshape(1, 1, Hp, 1, 1)
    jj = jnp.arange(Wp).reshape(1, 1, 1, Wp, 1)
    fidx = (2 * ii + dy.reshape(1, 1, 1, 1, 4)) * W + (2 * jj + dx.reshape(1, 1, 1, 1, 4))
    idx = jnp.sum(jnp.where(first, fidx, 0), axis=-1).astype(jnp.int32)
    return m, first, idx


def _ref_unpool(v, mask, H, W):
    B, C, Hp, Wp, _ = mask.shape
    u = mask.astype(v.dtype) * v[..., None]
    return u.reshape(B, C, Hp, Wp, 2, 2).transpose(0, 1, 2, 4, 3, 5).reshape(B, C, H, W)


def ref_step(s0, s1, s2, data, params, dt):
    W0w, W0b, C0w, C0b, C1w, C1b = params
    rho = lambda x: jnp.clip(x, 0.0, 1.0)
    B = s0.shape[0]
    s0_new = s0 + dt * (-s0 + rho(s1.reshape(B, -1) @ W0w.T + W0b))
    fb = (s0 @ W0w).reshape(s1.shape)
    c0 = _ref_conv(s2, C0w, C0b, PAD[0])
    m0, mask0, idx0 = _ref_pool(c0)
    s1_new = s1 + dt * (-s1 + rho(m0 + fb))
    up = _ref_unpool(s1, mask0, c0.shape[2], c0.shape[3])
    wt = jnp.flip(C0w, axis=(2, 3)).transpose(1, 0, 2, 3)
    su = _ref_conv(up, wt, jnp.zeros((wt.shape[0],), jnp.float32), CONV_F - 1 - PAD[0])
    c1 = _ref_conv(data, C1w, C1b, PAD[1])
    m1, _, idx1 = _ref_pool(c1)
    s2_new = s2 + dt * (-s2 + rho(m1 + su))
    return (s0_new, s1_new, s2_new), (idx0, idx1)


# --------------------------------------------- main -------------------------------------------
if __name__ == "__main__":
    key = jax.random.PRNGKey(0)
    k = jax.random.split(key, 8)

    def _uniform(kk, shape, fan_in):
        lim = 1.0 / math.sqrt(fan_in)
        return jax.random.uniform(kk, shape, jnp.float32, -lim, lim)

    # parameters (PyTorch default init shapes: W[0]=Linear(128,10), Conv[0]=Conv2d(4,8,3),
    # Conv[1]=Conv2d(1,4,3)), initialized deterministically in-script.
    W0w = _uniform(k[0], (FC_LAYERS[0], FC_LAYERS[1]), FC_LAYERS[1])
    W0b = _uniform(k[1], (FC_LAYERS[0],), FC_LAYERS[1])
    C0w = _uniform(k[2], (C_LIST[0], C_LIST[1], CONV_F, CONV_F), C_LIST[1] * CONV_F * CONV_F)
    C0b = _uniform(k[3], (C_LIST[0],), C_LIST[1] * CONV_F * CONV_F)
    C1w = _uniform(k[4], (C_LIST[1], C_LIST[2], CONV_F, CONV_F), C_LIST[2] * CONV_F * CONV_F)
    C1b = _uniform(k[5], (C_LIST[1],), C_LIST[2] * CONV_F * CONV_F)
    params = (W0w, W0b, C0w, C0b, C1w, C1b)

    data = jax.random.normal(k[6], (BATCH, C_LIST[-1], INPUT_SIZE, INPUT_SIZE), jnp.float32)

    # initHidden: zero states, P_ind = [None, None]
    s0 = jnp.zeros((BATCH, FC_LAYERS[0]), jnp.float32)
    s1 = jnp.zeros((BATCH, C_LIST[0], SIZE_POOL[0], SIZE_POOL[0]), jnp.float32)
    s2 = jnp.zeros((BATCH, C_LIST[1], SIZE_POOL[1], SIZE_POOL[1]), jnp.float32)

    (s0o, s1o, s2o), (idx0, idx1) = convep_forward(s0, s1, s2, data, params,
                                                   T=T_STEPS, dt=DT)
    jax.block_until_ready((s0o, s1o, s2o, idx0, idx1))

    # correctness check against a pure-JAX reference of the same dynamics (incl. pool indices)
    r0, r1, r2 = s0, s1, s2
    ridx0 = ridx1 = None
    for _ in range(T_STEPS):
        (r0, r1, r2), (ridx0, ridx1) = ref_step(r0, r1, r2, data, params, DT)

    assert jnp.allclose(s0o, r0, atol=2e-3, rtol=2e-3)
    assert jnp.allclose(s1o, r1, atol=2e-3, rtol=2e-3)
    assert jnp.allclose(s2o, r2, atol=2e-3, rtol=2e-3)
    assert jnp.array_equal(idx0, ridx0)
    assert jnp.array_equal(idx1, ridx1)

    print("KERNEL_OK")
</pallas_src>

<mosaic_0001>
module attributes {stable_mosaic.version = 11 : i64} {
  func.func @_convep_fused_kernel(%arg0: memref<2x10xf32, #tpu.memory_space<vmem>>, %arg1: memref<8x32xf32, #tpu.memory_space<vmem>>, %arg2: memref<16x32xf32, #tpu.memory_space<vmem>>, %arg3: memref<2x16x16xf32, #tpu.memory_space<vmem>>, %arg4: memref<9x32x64xf32, #tpu.memory_space<vmem>>, %arg5: memref<1x64xf32, #tpu.memory_space<vmem>>, %arg6: memref<9x64x32xf32, #tpu.memory_space<vmem>>, %arg7: memref<9x16x64xf32, #tpu.memory_space<vmem>>, %arg8: memref<1x64xf32, #tpu.memory_space<vmem>>, %arg9: memref<2x8x16xf32, #tpu.memory_space<vmem>>, %arg10: memref<2x64x32xf32, #tpu.memory_space<vmem>>, %arg11: memref<2x16x8xf32, #tpu.memory_space<vmem>>, %arg12: memref<2x32x64xf32, #tpu.memory_space<vmem>>, %arg13: memref<2x16x32xf32, #tpu.memory_space<vmem>>, %arg14: memref<2x64x32xf32, #tpu.memory_space<vmem>>, %arg15: memref<4x8x32xi32, #tpu.memory_space<vmem>>, %arg16: memref<4x16x32xi32, #tpu.memory_space<vmem>>, %arg17: memref<4x2x8xf32, #tpu.memory_space<vmem>>, %arg18: memref<4x8x2xf32, #tpu.memory_space<vmem>>, %arg19: memref<4x32x10xf32, #tpu.memory_space<vmem>>, %arg20: memref<1x10xf32, #tpu.memory_space<vmem>>, %arg21: memref<4x10x32xf32, #tpu.memory_space<vmem>>, %arg22: memref<2x10xf32, #tpu.memory_space<vmem>>, %arg23: memref<8x32xf32, #tpu.memory_space<vmem>>, %arg24: memref<16x32xf32, #tpu.memory_space<vmem>>, %arg25: memref<8x32xi32, #tpu.memory_space<vmem>>, %arg26: memref<16x32xi32, #tpu.memory_space<vmem>>, %arg27: memref<2x10x40xf32, #tpu.memory_space<vmem>>, %arg28: memref<2x10x80xf32, #tpu.memory_space<vmem>>, %arg29: memref<2x18x18xf32, #tpu.memory_space<vmem>>) attributes {dimension_semantics = [], scalar_prefetch = 0 : i64, scratch_operands = 3 : i64, tpu.core_type = #tpu.core_type<tc>} {
    %cst = arith.constant 0.000000e+00 : f32
    %0 = vector.broadcast %cst : f32 to vector<2x10x40xf32>
    %c0 = arith.constant 0 : index
    %c0_0 = arith.constant 0 : index
    %c0_1 = arith.constant 0 : index
    %1 = vector.load %arg27[%c0, %c0_0, %c0_1] : memref<2x10x40xf32, #tpu.memory_space<vmem>>, vector<2x10x40xf32>
    tpu.vector_store %arg27[%c0, %c0_0, %c0_1], %0 {strides = array<i32>} : memref<2x10x40xf32, #tpu.memory_space<vmem>>, vector<2x10x40xf32>,
    %cst_2 = arith.constant 0.000000e+00 : f32
    %2 = vector.broadcast %cst_2 : f32 to vector<2x10x80xf32>
    %c0_3 = arith.constant 0 : index
    %c0_4 = arith.constant 0 : index
    %c0_5 = arith.constant 0 : index
    %3 = vector.load %arg28[%c0_3, %c0_4, %c0_5] : memref<2x10x80xf32, #tpu.memory_space<vmem>>, vector<2x10x80xf32>
    tpu.vector_store %arg28[%c0_3, %c0_4, %c0_5], %2 {strides = array<i32>} : memref<2x10x80xf32, #tpu.memory_space<vmem>>, vector<2x10x80xf32>,
    %cst_6 = arith.constant 0.000000e+00 : f32
    %4 = vector.broadcast %cst_6 : f32 to vector<2x18x18xf32>
    %c0_7 = arith.constant 0 : index
    %c0_8 = arith.constant 0 : index
    %c0_9 = arith.constant 0 : index
    %5 = vector.load %arg29[%c0_7, %c0_8, %c0_9] : memref<2x18x18xf32, #tpu.memory_space<vmem>>, vector<2x18x18xf32>
    tpu.vector_store %arg29[%c0_7, %c0_8, %c0_9], %4 {strides = array<i32>} : memref<2x18x18xf32, #tpu.memory_space<vmem>>, vector<2x18x18xf32>,
    %c0_10 = arith.constant 0 : index
    %c0_11 = arith.constant 0 : index
    %c0_12 = arith.constant 0 : index
    %6 = vector.load %arg3[%c0_10, %c0_11, %c0_12] : memref<2x16x16xf32, #tpu.memory_space<vmem>>, vector<2x16x16xf32>
    %c0_13 = arith.constant 0 : index
    %c0_14 = arith.constant 0 : index
    %7 = vector.load %arg8[%c0_13, %c0_14] : memref<1x64xf32, #tpu.memory_space<vmem>>, vector<1x64xf32>
    %c0_15 = arith.constant 0 : index
    %c1 = arith.constant 1 : index
    %c1_16 = arith.constant 1 : index
    %8 = vector.load %arg29[%c0_15, %c1, %c1_16] : memref<2x18x18xf32, #tpu.memory_space<vmem>>, vector<2x16x16xf32>
    tpu.vector_store %arg29[%c0_15, %c1, %c1_16], %6 {strides = array<i32>} : memref<2x18x18xf32, #tpu.memory_space<vmem>>, vector<2x16x16xf32>,
    %cst_17 = arith.constant 0.000000e+00 : f32
    %9 = vector.broadcast %cst_17 : f32 to vector<32x64xf32>
    %c0_18 = arith.constant 0 : index
    %c0_19 = arith.constant 0 : index
    %c0_20 = arith.constant 0 : index
    %10 = vector.load %arg29[%c0_18, %c0_19, %c0_20] : memref<2x18x18xf32, #tpu.memory_space<vmem>>, vector<2x16x16xf32>
    %11 = vector.shape_cast %10 : vector<2x16x16xf32> to vector<32x16xf32>
    %c0_21 = arith.constant 0 : index
    %c0_22 = arith.constant 0 : index
    %c0_23 = arith.constant 0 : index
    %12 = vector.load %arg7[%c0_21, %c0_22, %c0_23] : memref<9x16x64xf32, #tpu.memory_space<vmem>>, vector<1x16x64xf32>
    %13 = vector.shape_cast %12 : vector<1x16x64xf32> to vector<16x64xf32>
    %cst_24 = arith.constant dense<0.000000e+00> : vector<32x64xf32>
    %14 = tpu.matmul %11, %13, %cst_24 {dimension_numbers = #tpu.dot_dimension_numbers<[1], [0], [0], [1], [0, 0, 1, 1], [], []>} : vector<32x16xf32>, vector<16x64xf32>, vector<32x64xf32> -> vector<32x64xf32>
    %15 = arith.addf %9, %14 : vector<32x64xf32>
    %c0_25 = arith.constant 0 : index
    %c0_26 = arith.constant 0 : index
    %c1_27 = arith.constant 1 : index
    %16 = vector.load %arg29[%c0_25, %c0_26, %c1_27] : memref<2x18x18xf32, #tpu.memory_space<vmem>>, vector<2x16x16xf32>
    %17 = vector.shape_cast %16 : vector<2x16x16xf32> to vector<32x16xf32>
    %c1_28 = arith.constant 1 : index
    %c0_29 = arith.constant 0 : index
    %c0_30 = arith.constant 0 : index
    %18 = vector.load %arg7[%c1_28, %c0_29, %c0_30] : memref<9x16x64xf32, #tpu.memory_space<vmem>>, vector<1x16x64xf32>
    %19 = vector.shape_cast %18 : vector<1x16x64xf32> to vector<16x64xf32>
    %cst_31 = arith.constant dense<0.000000e+00> : vector<32x64xf32>
    %20 = tpu.matmul %17, %19, %cst_31 {dimension_numbers = #tpu.dot_dimension_numbers<[1], [0], [0], [1], [0, 0, 1, 1], [], []>} : vector<32x16xf32>, vector<16x64xf32>, vector<32x64xf32> -> vector<32x64xf32>
    %21 = arith.addf %15, %20 : vector<32x64xf32>
    %c0_32 = arith.constant 0 : index
    %c0_33 = arith.constant 0 : index
    %c2 = arith.constant 2 : index
    %22 = vector.load %arg29[%c0_32, %c0_33, %c2] : memref<2x18x18xf32, #tpu.memory_space<vmem>>, vector<2x16x16xf32>
    %23 = vector.shape_cast %22 : vector<2x16x16xf32> to vector<32x16xf32>
    %c2_34 = arith.constant 2 : index
    %c0_35 = arith.constant 0 : index
    %c0_36 = arith.constant 0 : index
    %24 = vector.load %arg7[%c2_34, %c0_35, %c0_36] : memref<9x16x64xf32, #tpu.memory_space<vmem>>, vector<1x16x64xf32>
    %25 = vector.shape_cast %24 : vector<1x16x64xf32> to vector<16x64xf32>
    %cst_37 = arith.constant dense<0.000000e+00> : vector<32x64xf32>
    %26 = tpu.matmul %23, %25, %cst_37 {dimension_numbers = #tpu.dot_dimension_numbers<[1], [0], [0], [1], [0, 0, 1, 1], [], []>} : vector<32x16xf32>, vector<16x64xf32>, vector<32x64xf32> -> vector<32x64xf32>
    %27 = arith.addf %21, %26 : vector<32x64xf32>
    %c0_38 = arith.constant 0 : index
    %c1_39 = arith.constant 1 : index
    %c0_40 = arith.constant 0 : index
    %28 = vector.load %arg29[%c0_38, %c1_39, %c0_40] : memref<2x18x18xf32, #tpu.memory_space<vmem>>, vector<2x16x16xf32>
    %29 = vector.shape_cast %28 : vector<2x16x16xf32> to vector<32x16xf32>
    %c3 = arith.constant 3 : index
    %c0_41 = arith.constant 0 : index
    %c0_42 = arith.constant 0 : index
    %30 = vector.load %arg7[%c3, %c0_41, %c0_42] : memref<9x16x64xf32, #tpu.memory_space<vmem>>, vector<1x16x64xf32>
    %31 = vector.shape_cast %30 : vector<1x16x64xf32> to vector<16x64xf32>
    %cst_43 = arith.constant dense<0.000000e+00> : vector<32x64xf32>
    %32 = tpu.matmul %29, %31, %cst_43 {dimension_numbers = #tpu.dot_dimension_numbers<[1], [0], [0], [1], [0, 0, 1, 1], [], []>} : vector<32x16xf32>, vector<16x64xf32>, vector<32x64xf32> -> vector<32x64xf32>
    %33 = arith.addf %27, %32 : vector<32x64xf32>
    %c0_44 = arith.constant 0 : index
    %c1_45 = arith.constant 1 : index
    %c1_46 = arith.constant 1 : index
    %34 = vector.load %arg29[%c0_44, %c1_45, %c1_46] : memref<2x18x18xf32, #tpu.memory_space<vmem>>, vector<2x16x16xf32>
    %35 = vector.shape_cast %34 : vector<2x16x16xf32> to vector<32x16xf32>
    %c4 = arith.constant 4 : index
    %c0_47 = arith.constant 0 : index
    %c0_48 = arith.constant 0 : index
    %36 = vector.load %arg7[%c4, %c0_47, %c0_48] : memref<9x16x64xf32, #tpu.memory_space<vmem>>, vector<1x16x64xf32>
    %37 = vector.shape_cast %36 : vector<1x16x64xf32> to vector<16x64xf32>
    %cst_49 = arith.constant dense<0.000000e+00> : vector<32x64xf32>
    %38 = tpu.matmul %35, %37, %cst_49 {dimension_numbers = #tpu.dot_dimension_numbers<[1], [0], [0], [1], [0, 0, 1, 1], [], []>} : vector<32x16xf32>, vector<16x64xf32>, vector<32x64xf32> -> vector<32x64xf32>
    %39 = arith.addf %33, %38 : vector<32x64xf32>
    %c0_50 = arith.constant 0 : index
    %c1_51 = arith.constant 1 : index
    %c2_52 = arith.constant 2 : index
    %40 = vector.load %arg29[%c0_50, %c1_51, %c2_52] : memref<2x18x18xf32, #tpu.memory_space<vmem>>, vector<2x16x16xf32>
    %41 = vector.shape_cast %40 : vector<2x16x16xf32> to vector<32x16xf32>
    %c5 = arith.constant 5 : index
    %c0_53 = arith.constant 0 : index
    %c0_54 = arith.constant 0 : index
    %42 = vector.load %arg7[%c5, %c0_53, %c0_54] : memref<9x16x64xf32, #tpu.memory_space<vmem>>, vector<1x16x64xf32>
    %43 = vector.shape_cast %42 : vector<1x16x64xf32> to vector<16x64xf32>
    %cst_55 = arith.constant dense<0.000000e+00> : vector<32x64xf32>
    %44 = tpu.matmul %41, %43, %cst_55 {dimension_numbers = #tpu.dot_dimension_numbers<[1], [0], [0], [1], [0, 0, 1, 1], [], []>} : vector<32x16xf32>, vector<16x64xf32>, vector<32x64xf32> -> vector<32x64xf32>
    %45 = arith.addf %39, %44 : vector<32x64xf32>
    %c0_56 = arith.constant 0 : index
    %c2_57 = arith.constant 2 : index
    %c0_58 = arith.constant 0 : index
    %46 = vector.load %arg29[%c0_56, %c2_57, %c0_58] : memref<2x18x18xf32, #tpu.memory_space<vmem>>, vector<2x16x16xf32>
    %47 = vector.shape_cast %46 : vector<2x16x16xf32> to vector<32x16xf32>
    %c6 = arith.constant 6 : index
    %c0_59 = arith.constant 0 : index
    %c0_60 = arith.constant 0 : index
    %48 = vector.load %arg7[%c6, %c0_59, %c0_60] : memref<9x16x64xf32, #tpu.memory_space<vmem>>, vector<1x16x64xf32>
    %49 = vector.shape_cast %48 : vector<1x16x64xf32> to vector<16x64xf32>
    %cst_61 = arith.constant dense<0.000000e+00> : vector<32x64xf32>
    %50 = tpu.matmul %47, %49, %cst_61 {dimension_numbers = #tpu.dot_dimension_numbers<[1], [0], [0], [1], [0, 0, 1, 1], [], []>} : vector<32x16xf32>, vector<16x64xf32>, vector<32x64xf32> -> vector<32x64xf32>
    %51 = arith.addf %45, %50 : vector<32x64xf32>
    %c0_62 = arith.constant 0 : index
    %c2_63 = arith.constant 2 : index
    %c1_64 = arith.constant 1 : index
    %52 = vector.load %arg29[%c0_62, %c2_63, %c1_64] : memref<2x18x18xf32, #tpu.memory_space<vmem>>, vector<2x16x16xf32>
    %53 = vector.shape_cast %52 : vector<2x16x16xf32> to vector<32x16xf32>
    %c7 = arith.constant 7 : index
    %c0_65 = arith.constant 0 : index
    %c0_66 = arith.constant 0 : index
    %54 = vector.load %arg7[%c7, %c0_65, %c0_66] : memref<9x16x64xf32, #tpu.memory_space<vmem>>, vector<1x16x64xf32>
    %55 = vector.shape_cast %54 : vector<1x16x64xf32> to vector<16x64xf32>
    %cst_67 = arith.constant dense<0.000000e+00> : vector<32x64xf32>
    %56 = tpu.matmul %53, %55, %cst_67 {dimension_numbers = #tpu.dot_dimension_numbers<[1], [0], [0], [1], [0, 0, 1, 1], [], []>} : vector<32x16xf32>, vector<16x64xf32>, vector<32x64xf32> -> vector<32x64xf32>
    %57 = arith.addf %51, %56 : vector<32x64xf32>
    %c0_68 = arith.constant 0 : index
    %c2_69 = arith.constant 2 : index
    %c2_70 = arith.constant 2 : index
    %58 = vector.load %arg29[%c0_68, %c2_69, %c2_70] : memref<2x18x18xf32, #tpu.memory_space<vmem>>, vector<2x16x16xf32>
    %59 = vector.shape_cast %58 : vector<2x16x16xf32> to vector<32x16xf32>
    %c8 = arith.constant 8 : index
    %c0_71 = arith.constant 0 : index
    %c0_72 = arith.constant 0 : index
    %60 = vector.load %arg7[%c8, %c0_71, %c0_72] : memref<9x16x64xf32, #tpu.memory_space<vmem>>, vector<1x16x64xf32>
    %61 = vector.shape_cast %60 : vector<1x16x64xf32> to vector<16x64xf32>
    %cst_73 = arith.constant dense<0.000000e+00> : vector<32x64xf32>
    %62 = tpu.matmul %59, %61, %cst_73 {dimension_numbers = #tpu.dot_dimension_numbers<[1], [0], [0], [1], [0, 0, 1, 1], [], []>} : vector<32x16xf32>, vector<16x64xf32>, vector<32x64xf32> -> vector<32x64xf32>
    %63 = arith.addf %57, %62 : vector<32x64xf32>
    %64 = vector.broadcast %7 : vector<1x64xf32> to vector<32x64xf32>
    %65 = arith.addf %63, %64 : vector<32x64xf32>
    %c0_74 = arith.constant 0 : index
    %c0_75 = arith.constant 0 : index
    %c0_76 = arith.constant 0 : index
    %66 = vector.load %arg13[%c0_74, %c0_75, %c0_76] : memref<2x16x32xf32, #tpu.memory_space<vmem>>, vector<1x16x32xf32>
    %67 = vector.shape_cast %66 : vector<1x16x32xf32> to vector<16x32xf32>
    %cst_77 = arith.constant dense<0.000000e+00> : vector<16x64xf32>
    %68 = tpu.matmul %67, %65, %cst_77 {dimension_numbers = #tpu.dot_dimension_numbers<[1], [0], [0], [1], [0, 0, 1, 1], [], []>} : vector<16x32xf32>, vector<32x64xf32>, vector<16x64xf32> -> vector<16x64xf32>
    %c1_78 = arith.constant 1 : index
    %c0_79 = arith.constant 0 : index
    %c0_80 = arith.constant 0 : index
    %69 = vector.load %arg13[%c1_78, %c0_79, %c0_80] : memref<2x16x32xf32, #tpu.memory_space<vmem>>, vector<1x16x32xf32>
    %70 = vector.shape_cast %69 : vector<1x16x32xf32> to vector<16x32xf32>
    %cst_81 = arith.constant dense<0.000000e+00> : vector<16x64xf32>
    %71 = tpu.matmul %70, %65, %cst_81 {dimension_numbers = #tpu.dot_dimension_numbers<[1], [0], [0], [1], [0, 0, 1, 1], [], []>} : vector<16x32xf32>, vector<32x64xf32>, vector<16x64xf32> -> vector<16x64xf32>
    %c0_82 = arith.constant 0 : index
    %c0_83 = arith.constant 0 : index
    %c0_84 = arith.constant 0 : index
    %72 = vector.load %arg14[%c0_82, %c0_83, %c0_84] : memref<2x64x32xf32, #tpu.memory_space<vmem>>, vector<1x64x32xf32>
    %73 = vector.shape_cast %72 : vector<1x64x32xf32> to vector<64x32xf32>
    %cst_85 = arith.constant dense<0.000000e+00> : vector<16x32xf32>
    %74 = tpu.matmul %68, %73, %cst_85 {dimension_numbers = #tpu.dot_dimension_numbers<[1], [0], [0], [1], [0, 0, 1, 1], [], []>} : vector<16x64xf32>, vector<64x32xf32>, vector<16x32xf32> -> vector<16x32xf32>
    %c1_86 = arith.constant 1 : index
    %c0_87 = arith.constant 0 : index
    %c0_88 = arith.constant 0 : index
    %75 = vector.load %arg14[%c1_86, %c0_87, %c0_88] : memref<2x64x32xf32, #tpu.memory_space<vmem>>, vector<1x64x32xf32>
    %76 = vector.shape_cast %75 : vector<1x64x32xf32> to vector<64x32xf32>
    %cst_89 = arith.constant dense<0.000000e+00> : vector<16x32xf32>
    %77 = tpu.matmul %68, %76, %cst_89 {dimension_numbers = #tpu.dot_dimension_numbers<[1], [0], [0], [1], [0, 0, 1, 1], [], []>} : vector<16x64xf32>, vector<64x32xf32>, vector<16x32xf32> -> vector<16x32xf32>
    %c0_90 = arith.constant 0 : index
    %c0_91 = arith.constant 0 : index
    %c0_92 = arith.constant 0 : index
    %78 = vector.load %arg14[%c0_90, %c0_91, %c0_92] : memref<2x64x32xf32, #tpu.memory_space<vmem>>, vector<1x64x32xf32>
    %79 = vector.shape_cast %78 : vector<1x64x32xf32> to vector<64x32xf32>
    %cst_93 = arith.constant dense<0.000000e+00> : vector<16x32xf32>
    %80 = tpu.matmul %71, %79, %cst_93 {dimension_numbers = #tpu.dot_dimension_numbers<[1], [0], [0], [1], [0, 0, 1, 1], [], []>} : vector<16x64xf32>, vector<64x32xf32>, vector<16x32xf32> -> vector<16x32xf32>
    %c1_94 = arith.constant 1 : index
    %c0_95 = arith.constant 0 : index
    %c0_96 = arith.constant 0 : index
    %81 = vector.load %arg14[%c1_94, %c0_95, %c0_96] : memref<2x64x32xf32, #tpu.memory_space<vmem>>, vector<1x64x32xf32>
    %82 = vector.shape_cast %81 : vector<1x64x32xf32> to vector<64x32xf32>
    %cst_97 = arith.constant dense<0.000000e+00> : vector<16x32xf32>
    %83 = tpu.matmul %71, %82, %cst_97 {dimension_numbers = #tpu.dot_dimension_numbers<[1], [0], [0], [1], [0, 0, 1, 1], [], []>} : vector<16x64xf32>, vector<64x32xf32>, vector<16x32xf32> -> vector<16x32xf32>
    %84 = arith.maximumf %74, %77 : vector<16x32xf32>
    %85 = arith.maximumf %80, %83 : vector<16x32xf32>
    %86 = arith.maximumf %84, %85 : vector<16x32xf32>
    %87 = arith.cmpf oeq, %74, %86 : vector<16x32xf32>
    %cst_98 = arith.constant dense<true> : vector<16x32xi1>
    %88 = arith.xori %87, %cst_98 : vector<16x32xi1>
    %89 = arith.cmpf oeq, %77, %86 : vector<16x32xf32>
    %90 = arith.andi %88, %89 : vector<16x32xi1>
    %91 = arith.ori %87, %90 : vector<16x32xi1>
    %cst_99 = arith.constant dense<true> : vector<16x32xi1>
    %92 = arith.xori %91, %cst_99 : vector<16x32xi1>
    %93 = arith.cmpf oeq, %80, %86 : vector<16x32xf32>
    %94 = arith.andi %92, %93 : vector<16x32xi1>
    %95 = arith.ori %91, %94 : vector<16x32xi1>
    %cst_100 = arith.constant dense<true> : vector<16x32xi1>
    %96 = arith.xori %95, %cst_100 : vector<16x32xi1>
    %c0_i32 = arith.constant 0 : i32
    %97 = vector.broadcast %c0_i32 : i32 to vector<16x32xi32>
    %c0_101 = arith.constant 0 : index
    %c0_102 = arith.constant 0 : index
    %c0_103 = arith.constant 0 : index
    %98 = vector.load %arg16[%c0_101, %c0_102, %c0_103] : memref<4x16x32xi32, #tpu.memory_space<vmem>>, vector<1x16x32xi32>
    %99 = vector.shape_cast %98 : vector<1x16x32xi32> to vector<16x32xi32>
    %100 = arith.select %87, %99, %97 : vector<16x32xi1>, vector<16x32xi32>
    %101 = arith.addi %97, %100 : vector<16x32xi32>
    %c1_104 = arith.constant 1 : index
    %c0_105 = arith.constant 0 : index
    %c0_106 = arith.constant 0 : index
    %102 = vector.load %arg16[%c1_104, %c0_105, %c0_106] : memref<4x16x32xi32, #tpu.memory_space<vmem>>, vector<1x16x32xi32>
    %103 = vector.shape_cast %102 : vector<1x16x32xi32> to vector<16x32xi32>
    %104 = arith.select %90, %103, %97 : vector<16x32xi1>, vector<16x32xi32>
    %105 = arith.addi %101, %104 : vector<16x32xi32>
    %c2_107 = arith.constant 2 : index
    %c0_108 = arith.constant 0 : index
    %c0_109 = arith.constant 0 : index
    %106 = vector.load %arg16[%c2_107, %c0_108, %c0_109] : memref<4x16x32xi32, #tpu.memory_space<vmem>>, vector<1x16x32xi32>
    %107 = vector.shape_cast %106 : vector<1x16x32xi32> to vector<16x32xi32>
    %108 = arith.select %94, %107, %97 : vector<16x32xi1>, vector<16x32xi32>
    %109 = arith.addi %105, %108 : vector<16x32xi32>
    %c3_110 = arith.constant 3 : index
    %c0_111 = arith.constant 0 : index
    %c0_112 = arith.constant 0 : index
    %110 = vector.load %arg16[%c3_110, %c0_111, %c0_112] : memref<4x16x32xi32, #tpu.memory_space<vmem>>, vector<1x16x32xi32>
    %111 = vector.shape_cast %110 : vector<1x16x32xi32> to vector<16x32xi32>
    %112 = arith.select %96, %111, %97 : vector<16x32xi1>, vector<16x32xi32>
    %113 = arith.addi %109, %112 : vector<16x32xi32>
    %c0_113 = arith.constant 0 : index
    %c0_114 = arith.constant 0 : index
    %114 = vector.load %arg26[%c0_113, %c0_114] : memref<16x32xi32, #tpu.memory_space<vmem>>, vector<16x32xi32>
    tpu.vector_store %arg26[%c0_113, %c0_114], %113 {strides = array<i32>} : memref<16x32xi32, #tpu.memory_space<vmem>>, vector<16x32xi32>,
    %c0_115 = arith.constant 0 : index
    %c0_116 = arith.constant 0 : index
    %115 = vector.load %arg0[%c0_115, %c0_116] : memref<2x10xf32, #tpu.memory_space<vmem>>, vector<2x10xf32>
    %c0_117 = arith.constant 0 : index
    %c0_118 = arith.constant 0 : index
    %116 = vector.load %arg22[%c0_117, %c0_118] : memref<2x10xf32, #tpu.memory_space<vmem>>, vector<2x10xf32>
    tpu.vector_store %arg22[%c0_117, %c0_118], %115 {strides = array<i32>} : memref<2x10xf32, #tpu.memory_space<vmem>>, vector<2x10xf32>,
    %c0_119 = arith.constant 0 : index
    %c0_120 = arith.constant 0 : index
    %117 = vector.load %arg1[%c0_119, %c0_120] : memref<8x32xf32, #tpu.memory_space<vmem>>, vector<8x32xf32>
    %c0_121 = arith.constant 0 : index
    %c0_122 = arith.constant 0 : index
    %118 = vector.load %arg23[%c0_121, %c0_122] : memref<8x32xf32, #tpu.memory_space<vmem>>, vector<8x32xf32>
    tpu.vector_store %arg23[%c0_121, %c0_122], %117 {strides = array<i32>} : memref<8x32xf32, #tpu.memory_space<vmem>>, vector<8x32xf32>,
    %c0_123 = arith.constant 0 : index
    %c0_124 = arith.constant 0 : index
    %119 = vector.load %arg2[%c0_123, %c0_124] : memref<16x32xf32, #tpu.memory_space<vmem>>, vector<16x32xf32>
    %c0_125 = arith.constant 0 : index
    %c0_126 = arith.constant 0 : index
    %120 = vector.load %arg24[%c0_125, %c0_126] : memref<16x32xf32, #tpu.memory_space<vmem>>, vector<16x32xf32>
    tpu.vector_store %arg24[%c0_125, %c0_126], %119 {strides = array<i32>} : memref<16x32xf32, #tpu.memory_space<vmem>>, vector<16x32xf32>,
    %c0_i32_127 = arith.constant 0 : i32
    %121 = vector.broadcast %c0_i32_127 : i32 to vector<8x32xi32>
    %c0_128 = arith.constant 0 : index
    %c0_129 = arith.constant 0 : index
    %122 = vector.load %arg25[%c0_128, %c0_129] : memref<8x32xi32, #tpu.memory_space<vmem>>, vector<8x32xi32>
    tpu.vector_store %arg25[%c0_128, %c0_129], %121 {strides = array<i32>} : memref<8x32xi32, #tpu.memory_space<vmem>>, vector<8x32xi32>,
    %c0_i32_130 = arith.constant 0 : i32
    %c4_i32 = arith.constant 4 : i32
    %123 = arith.addi %c0_i32_130, %c4_i32 : i32
    %c1_i32 = arith.constant 1 : i32
    scf.for %arg30 = %c0_i32_130 to %123 step %c1_i32  : i32 {
      %c0_131 = arith.constant 0 : index
      %c0_132 = arith.constant 0 : index
      %124 = vector.load %arg22[%c0_131, %c0_132] : memref<2x10xf32, #tpu.memory_space<vmem>>, vector<2x10xf32>
      %c0_133 = arith.constant 0 : index
      %c0_134 = arith.constant 0 : index
      %125 = vector.load %arg23[%c0_133, %c0_134] : memref<8x32xf32, #tpu.memory_space<vmem>>, vector<8x32xf32>
      %c0_135 = arith.constant 0 : index
      %c0_136 = arith.constant 0 : index
      %126 = vector.load %arg24[%c0_135, %c0_136] : memref<16x32xf32, #tpu.memory_space<vmem>>, vector<16x32xf32>
      %cst_137 = arith.constant 0.000000e+00 : f32
      %127 = vector.broadcast %cst_137 : f32 to vector<2x10xf32>
      %c0_138 = arith.constant 0 : index
      %c0_139 = arith.constant 0 : index
      %128 = vector.load %arg20[%c0_138, %c0_139] : memref<1x10xf32, #tpu.memory_space<vmem>>, vector<1x10xf32>
      %129 = vector.broadcast %128 : vector<1x10xf32> to vector<2x10xf32>
      %130 = arith.addf %127, %129 : vector<2x10xf32>
      %c0_140 = arith.constant 0 : index
      %c0_141 = arith.constant 0 : index
      %c0_142 = arith.constant 0 : index
      %131 = vector.load %arg17[%c0_140, %c0_141, %c0_142] : memref<4x2x8xf32, #tpu.memory_space<vmem>>, vector<1x2x8xf32>
      %132 = vector.shape_cast %131 : vector<1x2x8xf32> to vector<2x8xf32>
      %cst_143 = arith.constant dense<0.000000e+00> : vector<2x32xf32>
      %133 = tpu.matmul %132, %125, %cst_143 {dimension_numbers = #tpu.dot_dimension_numbers<[1], [0], [0], [1], [0, 0, 1, 1], [], []>} : vector<2x8xf32>, vector<8x32xf32>, vector<2x32xf32> -> vector<2x32xf32>
      %c0_144 = arith.constant 0 : index
      %c0_145 = arith.constant 0 : index
      %c0_146 = arith.constant 0 : index
      %134 = vector.load %arg19[%c0_144, %c0_145, %c0_146] : memref<4x32x10xf32, #tpu.memory_space<vmem>>, vector<1x32x10xf32>
      %135 = vector.shape_cast %134 : vector<1x32x10xf32> to vector<32x10xf32>
      %cst_147 = arith.constant dense<0.000000e+00> : vector<2x10xf32>
      %136 = tpu.matmul %133, %135, %cst_147 {dimension_numbers = #tpu.dot_dimension_numbers<[1], [0], [0], [1], [0, 0, 1, 1], [], []>} : vector<2x32xf32>, vector<32x10xf32>, vector<2x10xf32> -> vector<2x10xf32>
      %137 = arith.addf %130, %136 : vector<2x10xf32>
      %c1_148 = arith.constant 1 : index
      %c0_149 = arith.constant 0 : index
      %c0_150 = arith.constant 0 : index
      %138 = vector.load %arg17[%c1_148, %c0_149, %c0_150] : memref<4x2x8xf32, #tpu.memory_space<vmem>>, vector<1x2x8xf32>
      %139 = vector.shape_cast %138 : vector<1x2x8xf32> to vector<2x8xf32>
      %cst_151 = arith.constant dense<0.000000e+00> : vector<2x32xf32>
      %140 = tpu.matmul %139, %125, %cst_151 {dimension_numbers = #tpu.dot_dimension_numbers<[1], [0], [0], [1], [0, 0, 1, 1], [], []>} : vector<2x8xf32>, vector<8x32xf32>, vector<2x32xf32> -> vector<2x32xf32>
      %c1_152 = arith.constant 1 : index
      %c0_153 = arith.constant 0 : index
      %c0_154 = arith.constant 0 : index
      %141 = vector.load %arg19[%c1_152, %c0_153, %c0_154] : memref<4x32x10xf32, #tpu.memory_space<vmem>>, vector<1x32x10xf32>
      %142 = vector.shape_cast %141 : vector<1x32x10xf32> to vector<32x10xf32>
      %cst_155 = arith.constant dense<0.000000e+00> : vector<2x10xf32>
      %143 = tpu.matmul %140, %142, %cst_155 {dimension_numbers = #tpu.dot_dimension_numbers<[1], [0], [0], [1], [0, 0, 1, 1], [], []>} : vector<2x32xf32>, vector<32x10xf32>, vector<2x10xf32> -> vector<2x10xf32>
      %144 = arith.addf %137, %143 : vector<2x10xf32>
      %c2_156 = arith.constant 2 : index
      %c0_157 = arith.constant 0 : index
      %c0_158 = arith.constant 0 : index
      %145 = vector.load %arg17[%c2_156, %c0_157, %c0_158] : memref<4x2x8xf32, #tpu.memory_space<vmem>>, vector<1x2x8xf32>
      %146 = vector.shape_cast %145 : vector<1x2x8xf32> to vector<2x8xf32>
      %cst_159 = arith.constant dense<0.000000e+00> : vector<2x32xf32>
      %147 = tpu.matmul %146, %125, %cst_159 {dimension_numbers = #tpu.dot_dimension_numbers<[1], [0], [0], [1], [0, 0, 1, 1], [], []>} : vector<2x8xf32>, vector<8x32xf32>, vector<2x32xf32> -> vector<2x32xf32>
      %c2_160 = arith.constant 2 : index
      %c0_161 = arith.constant 0 : index
      %c0_162 = arith.constant 0 : index
      %148 = vector.load %arg19[%c2_160, %c0_161, %c0_162] : memref<4x32x10xf32, #tpu.memory_space<vmem>>, vector<1x32x10xf32>
      %149 = vector.shape_cast %148 : vector<1x32x10xf32> to vector<32x10xf32>
      %cst_163 = arith.constant dense<0.000000e+00> : vector<2x10xf32>
      %150 = tpu.matmul %147, %149, %cst_163 {dimension_numbers = #tpu.dot_dimension_numbers<[1], [0], [0], [1], [0, 0, 1, 1], [], []>} : vector<2x32xf32>, vector<32x10xf32>, vector<2x10xf32> -> vector<2x10xf32>
      %151 = arith.addf %144, %150 : vector<2x10xf32>
      %c3_164 = arith.constant 3 : index
      %c0_165 = arith.constant 0 : index
      %c0_166 = arith.constant 0 : index
      %152 = vector.load %arg17[%c3_164, %c0_165, %c0_166] : memref<4x2x8xf32, #tpu.memory_space<vmem>>, vector<1x2x8xf32>
      %153 = vector.shape_cast %152 : vector<1x2x8xf32> to vector<2x8xf32>
      %cst_167 = arith.constant dense<0.000000e+00> : vector<2x32xf32>
      %154 = tpu.matmul %153, %125, %cst_167 {dimension_numbers = #tpu.dot_dimension_numbers<[1], [0], [0], [1], [0, 0, 1, 1], [], []>} : vector<2x8xf32>, vector<8x32xf32>, vector<2x32xf32> -> vector<2x32xf32>
      %c3_168 = arith.constant 3 : index
      %c0_169 = arith.constant 0 : index
      %c0_170 = arith.constant 0 : index
      %155 = vector.load %arg19[%c3_168, %c0_169, %c0_170] : memref<4x32x10xf32, #tpu.memory_space<vmem>>, vector<1x32x10xf32>
      %156 = vector.shape_cast %155 : vector<1x32x10xf32> to vector<32x10xf32>
      %cst_171 = arith.constant dense<0.000000e+00> : vector<2x10xf32>
      %157 = tpu.matmul %154, %156, %cst_171 {dimension_numbers = #tpu.dot_dimension_numbers<[1], [0], [0], [1], [0, 0, 1, 1], [], []>} : vector<2x32xf32>, vector<32x10xf32>, vector<2x10xf32> -> vector<2x10xf32>
      %158 = arith.addf %151, %157 : vector<2x10xf32>
      %cst_172 = arith.constant 0.000000e+00 : f32
      %159 = vector.broadcast %cst_172 : f32 to vector<2x10xf32>
      %160 = arith.subf %159, %124 : vector<2x10xf32>
      %cst_173 = arith.constant 0.000000e+00 : f32
      %cst_174 = arith.constant 1.000000e+00 : f32
      %161 = vector.broadcast %cst_173 : f32 to vector<2x10xf32>
      %162 = arith.maximumf %161, %158 : vector<2x10xf32>
      %163 = vector.broadcast %cst_174 : f32 to vector<2x10xf32>
      %164 = arith.minimumf %163, %162 : vector<2x10xf32>
      %165 = arith.addf %160, %164 : vector<2x10xf32>
      %cst_175 = arith.constant 2.000000e-01 : f32
      %166 = vector.broadcast %cst_175 : f32 to vector<2x10xf32>
      %167 = arith.mulf %166, %165 : vector<2x10xf32>
      %168 = arith.addf %124, %167 : vector<2x10xf32>
      %cst_176 = arith.constant 0.000000e+00 : f32
      %169 = vector.broadcast %cst_176 : f32 to vector<8x32xf32>
      %c0_177 = arith.constant 0 : index
      %c0_178 = arith.constant 0 : index
      %c0_179 = arith.constant 0 : index
      %170 = vector.load %arg21[%c0_177, %c0_178, %c0_179] : memref<4x10x32xf32, #tpu.memory_space<vmem>>, vector<1x10x32xf32>
      %171 = vector.shape_cast %170 : vector<1x10x32xf32> to vector<10x32xf32>
      %cst_180 = arith.constant dense<0.000000e+00> : vector<2x32xf32>
      %172 = tpu.matmul %124, %171, %cst_180 {dimension_numbers = #tpu.dot_dimension_numbers<[1], [0], [0], [1], [0, 0, 1, 1], [], []>} : vector<2x10xf32>, vector<10x32xf32>, vector<2x32xf32> -> vector<2x32xf32>
      %c0_181 = arith.constant 0 : index
      %c0_182 = arith.constant 0 : index
      %c0_183 = arith.constant 0 : index
      %173 = vector.load %arg18[%c0_181, %c0_182, %c0_183] : memref<4x8x2xf32, #tpu.memory_space<vmem>>, vector<1x8x2xf32>
      %174 = vector.shape_cast %173 : vector<1x8x2xf32> to vector<8x2xf32>
      %cst_184 = arith.constant dense<0.000000e+00> : vector<8x32xf32>
      %175 = tpu.matmul %174, %172, %cst_184 {dimension_numbers = #tpu.dot_dimension_numbers<[1], [0], [0], [1], [0, 0, 1, 1], [], []>} : vector<8x2xf32>, vector<2x32xf32>, vector<8x32xf32> -> vector<8x32xf32>
      %176 = arith.addf %169, %175 : vector<8x32xf32>
      %c1_185 = arith.constant 1 : index
      %c0_186 = arith.constant 0 : index
      %c0_187 = arith.constant 0 : index
      %177 = vector.load %arg21[%c1_185, %c0_186, %c0_187] : memref<4x10x32xf32, #tpu.memory_space<vmem>>, vector<1x10x32xf32>
      %178 = vector.shape_cast %177 : vector<1x10x32xf32> to vector<10x32xf32>
      %cst_188 = arith.constant dense<0.000000e+00> : vector<2x32xf32>
      %179 = tpu.matmul %124, %178, %cst_188 {dimension_numbers = #tpu.dot_dimension_numbers<[1], [0], [0], [1], [0, 0, 1, 1], [], []>} : vector<2x10xf32>, vector<10x32xf32>, vector<2x32xf32> -> vector<2x32xf32>
      %c1_189 = arith.constant 1 : index
      %c0_190 = arith.constant 0 : index
      %c0_191 = arith.constant 0 : index
      %180 = vector.load %arg18[%c1_189, %c0_190, %c0_191] : memref<4x8x2xf32, #tpu.memory_space<vmem>>, vector<1x8x2xf32>
      %181 = vector.shape_cast %180 : vector<1x8x2xf32> to vector<8x2xf32>
      %cst_192 = arith.constant dense<0.000000e+00> : vector<8x32xf32>
      %182 = tpu.matmul %181, %179, %cst_192 {dimension_numbers = #tpu.dot_dimension_numbers<[1], [0], [0], [1], [0, 0, 1, 1], [], []>} : vector<8x2xf32>, vector<2x32xf32>, vector<8x32xf32> -> vector<8x32xf32>
      %183 = arith.addf %176, %182 : vector<8x32xf32>
      %c2_193 = arith.constant 2 : index
      %c0_194 = arith.constant 0 : index
      %c0_195 = arith.constant 0 : index
      %184 = vector.load %arg21[%c2_193, %c0_194, %c0_195] : memref<4x10x32xf32, #tpu.memory_space<vmem>>, vector<1x10x32xf32>
      %185 = vector.shape_cast %184 : vector<1x10x32xf32> to vector<10x32xf32>
      %cst_196 = arith.constant dense<0.000000e+00> : vector<2x32xf32>
      %186 = tpu.matmul %124, %185, %cst_196 {dimension_numbers = #tpu.dot_dimension_numbers<[1], [0], [0], [1], [0, 0, 1, 1], [], []>} : vector<2x10xf32>, vector<10x32xf32>, vector<2x32xf32> -> vector<2x32xf32>
      %c2_197 = arith.constant 2 : index
      %c0_198 = arith.constant 0 : index
      %c0_199 = arith.constant 0 : index
      %187 = vector.load %arg18[%c2_197, %c0_198, %c0_199] : memref<4x8x2xf32, #tpu.memory_space<vmem>>, vector<1x8x2xf32>
      %188 = vector.shape_cast %187 : vector<1x8x2xf32> to vector<8x2xf32>
      %cst_200 = arith.constant dense<0.000000e+00> : vector<8x32xf32>
      %189 = tpu.matmul %188, %186, %cst_200 {dimension_numbers = #tpu.dot_dimension_numbers<[1], [0], [0], [1], [0, 0, 1, 1], [], []>} : vector<8x2xf32>, vector<2x32xf32>, vector<8x32xf32> -> vector<8x32xf32>
      %190 = arith.addf %183, %189 : vector<8x32xf32>
      %c3_201 = arith.constant 3 : index
      %c0_202 = arith.constant 0 : index
      %c0_203 = arith.constant 0 : index
      %191 = vector.load %arg21[%c3_201, %c0_202, %c0_203] : memref<4x10x32xf32, #tpu.memory_space<vmem>>, vector<1x10x32xf32>
      %192 = vector.shape_cast %191 : vector<1x10x32xf32> to vector<10x32xf32>
      %cst_204 = arith.constant dense<0.000000e+00> : vector<2x32xf32>
      %193 = tpu.matmul %124, %192, %cst_204 {dimension_numbers = #tpu.dot_dimension_numbers<[1], [0], [0], [1], [0, 0, 1, 1], [], []>} : vector<2x10xf32>, vector<10x32xf32>, vector<2x32xf32> -> vector<2x32xf32>
      %c3_205 = arith.constant 3 : index
      %c0_206 = arith.constant 0 : index
      %c0_207 = arith.constant 0 : index
      %194 = vector.load %arg18[%c3_205, %c0_206, %c0_207] : memref<4x8x2xf32, #tpu.memory_space<vmem>>, vector<1x8x2xf32>
      %195 = vector.shape_cast %194 : vector<1x8x2xf32> to vector<8x2xf32>
      %cst_208 = arith.constant dense<0.000000e+00> : vector<8x32xf32>
      %196 = tpu.matmul %195, %193, %cst_208 {dimension_numbers = #tpu.dot_dimension_numbers<[1], [0], [0], [1], [0, 0, 1, 1], [], []>} : vector<8x2xf32>, vector<2x32xf32>, vector<8x32xf32> -> vector<8x32xf32>
      %197 = arith.addf %190, %196 : vector<8x32xf32>
      %198 = vector.shape_cast %126 : vector<16x32xf32> to vector<2x8x32xf32>
      %c0_209 = arith.constant 0 : index
      %c0_210 = arith.constant 0 : index
      %199 = vector.load %arg5[%c0_209, %c0_210] : memref<1x64xf32, #tpu.memory_space<vmem>>, vector<1x64xf32>
      %c0_211 = arith.constant 0 : index
      %c1_212 = arith.constant 1 : index
      %c4_213 = arith.constant 4 : index
      %200 = vector.load %arg27[%c0_211, %c1_212, %c4_213] : memref<2x10x40xf32, #tpu.memory_space<vmem>>, vector<2x8x32xf32>
      tpu.vector_store %arg27[%c0_211, %c1_212, %c4_213], %198 {strides = array<i32>} : memref<2x10x40xf32, #tpu.memory_space<vmem>>, vector<2x8x32xf32>,
      %cst_214 = arith.constant 0.000000e+00 : f32
      %201 = vector.broadcast %cst_214 : f32 to vector<16x64xf32>
      %c0_215 = arith.constant 0 : index
      %c0_216 = arith.constant 0 : index
      %c0_217 = arith.constant 0 : index
      %202 = vector.load %arg27[%c0_215, %c0_216, %c0_217] : memref<2x10x40xf32, #tpu.memory_space<vmem>>, vector<2x8x32xf32>
      %203 = vector.shape_cast %202 : vector<2x8x32xf32> to vector<16x32xf32>
      %c0_218 = arith.constant 0 : index
      %c0_219 = arith.constant 0 : index
      %c0_220 = arith.constant 0 : index
      %204 = vector.load %arg4[%c0_218, %c0_219, %c0_220] : memref<9x32x64xf32, #tpu.memory_space<vmem>>, vector<1x32x64xf32>
      %205 = vector.shape_cast %204 : vector<1x32x64xf32> to vector<32x64xf32>
      %cst_221 = arith.constant dense<0.000000e+00> : vector<16x64xf32>
      %206 = tpu.matmul %203, %205, %cst_221 {dimension_numbers = #tpu.dot_dimension_numbers<[1], [0], [0], [1], [0, 0, 1, 1], [], []>} : vector<16x32xf32>, vector<32x64xf32>, vector<16x64xf32> -> vector<16x64xf32>
      %207 = arith.addf %201, %206 : vector<16x64xf32>
      %c0_222 = arith.constant 0 : index
      %c0_223 = arith.constant 0 : index
      %c4_224 = arith.constant 4 : index
      %208 = vector.load %arg27[%c0_222, %c0_223, %c4_224] : memref<2x10x40xf32, #tpu.memory_space<vmem>>, vector<2x8x32xf32>
      %209 = vector.shape_cast %208 : vector<2x8x32xf32> to vector<16x32xf32>
      %c1_225 = arith.constant 1 : index
      %c0_226 = arith.constant 0 : index
      %c0_227 = arith.constant 0 : index
      %210 = vector.load %arg4[%c1_225, %c0_226, %c0_227] : memref<9x32x64xf32, #tpu.memory_space<vmem>>, vector<1x32x64xf32>
      %211 = vector.shape_cast %210 : vector<1x32x64xf32> to vector<32x64xf32>
      %cst_228 = arith.constant dense<0.000000e+00> : vector<16x64xf32>
      %212 = tpu.matmul %209, %211, %cst_228 {dimension_numbers = #tpu.dot_dimension_numbers<[1], [0], [0], [1], [0, 0, 1, 1], [], []>} : vector<16x32xf32>, vector<32x64xf32>, vector<16x64xf32> -> vector<16x64xf32>
      %213 = arith.addf %207, %212 : vector<16x64xf32>
      %c0_229 = arith.constant 0 : index
      %c0_230 = arith.constant 0 : index
      %c8_231 = arith.constant 8 : index
      %214 = vector.load %arg27[%c0_229, %c0_230, %c8_231] : memref<2x10x40xf32, #tpu.memory_space<vmem>>, vector<2x8x32xf32>
      %215 = vector.shape_cast %214 : vector<2x8x32xf32> to vector<16x32xf32>
      %c2_232 = arith.constant 2 : index
      %c0_233 = arith.constant 0 : index
      %c0_234 = arith.constant 0 : index
      %216 = vector.load %arg4[%c2_232, %c0_233, %c0_234] : memref<9x32x64xf32, #tpu.memory_space<vmem>>, vector<1x32x64xf32>
      %217 = vector.shape_cast %216 : vector<1x32x64xf32> to vector<32x64xf32>
      %cst_235 = arith.constant dense<0.000000e+00> : vector<16x64xf32>
      %218 = tpu.matmul %215, %217, %cst_235 {dimension_numbers = #tpu.dot_dimension_numbers<[1], [0], [0], [1], [0, 0, 1, 1], [], []>} : vector<16x32xf32>, vector<32x64xf32>, vector<16x64xf32> -> vector<16x64xf32>
      %219 = arith.addf %213, %218 : vector<16x64xf32>
      %c0_236 = arith.constant 0 : index
      %c1_237 = arith.constant 1 : index
      %c0_238 = arith.constant 0 : index
      %220 = vector.load %arg27[%c0_236, %c1_237, %c0_238] : memref<2x10x40xf32, #tpu.memory_space<vmem>>, vector<2x8x32xf32>
      %221 = vector.shape_cast %220 : vector<2x8x32xf32> to vector<16x32xf32>
      %c3_239 = arith.constant 3 : index
      %c0_240 = arith.constant 0 : index
      %c0_241 = arith.constant 0 : index
      %222 = vector.load %arg4[%c3_239, %c0_240, %c0_241] : memref<9x32x64xf32, #tpu.memory_space<vmem>>, vector<1x32x64xf32>
      %223 = vector.shape_cast %222 : vector<1x32x64xf32> to vector<32x64xf32>
      %cst_242 = arith.constant dense<0.000000e+00> : vector<16x64xf32>
      %224 = tpu.matmul %221, %223, %cst_242 {dimension_numbers = #tpu.dot_dimension_numbers<[1], [0], [0], [1], [0, 0, 1, 1], [], []>} : vector<16x32xf32>, vector<32x64xf32>, vector<16x64xf32> -> vector<16x64xf32>
      %225 = arith.addf %219, %224 : vector<16x64xf32>
      %c0_243 = arith.constant 0 : index
      %c1_244 = arith.constant 1 : index
      %c4_245 = arith.constant 4 : index
      %226 = vector.load %arg27[%c0_243, %c1_244, %c4_245] : memref<2x10x40xf32, #tpu.memory_space<vmem>>, vector<2x8x32xf32>
      %227 = vector.shape_cast %226 : vector<2x8x32xf32> to vector<16x32xf32>
      %c4_246 = arith.constant 4 : index
      %c0_247 = arith.constant 0 : index
      %c0_248 = arith.constant 0 : index
      %228 = vector.load %arg4[%c4_246, %c0_247, %c0_248] : memref<9x32x64xf32, #tpu.memory_space<vmem>>, vector<1x32x64xf32>
      %229 = vector.shape_cast %228 : vector<1x32x64xf32> to vector<32x64xf32>
      %cst_249 = arith.constant dense<0.000000e+00> : vector<16x64xf32>
      %230 = tpu.matmul %227, %229, %cst_249 {dimension_numbers = #tpu.dot_dimension_numbers<[1], [0], [0], [1], [0, 0, 1, 1], [], []>} : vector<16x32xf32>, vector<32x64xf32>, vector<16x64xf32> -> vector<16x64xf32>
      %231 = arith.addf %225, %230 : vector<16x64xf32>
      %c0_250 = arith.constant 0 : index
      %c1_251 = arith.constant 1 : index
      %c8_252 = arith.constant 8 : index
      %232 = vector.load %arg27[%c0_250, %c1_251, %c8_252] : memref<2x10x40xf32, #tpu.memory_space<vmem>>, vector<2x8x32xf32>
      %233 = vector.shape_cast %232 : vector<2x8x32xf32> to vector<16x32xf32>
      %c5_253 = arith.constant 5 : index
      %c0_254 = arith.constant 0 : index
      %c0_255 = arith.constant 0 : index
      %234 = vector.load %arg4[%c5_253, %c0_254, %c0_255] : memref<9x32x64xf32, #tpu.memory_space<vmem>>, vector<1x32x64xf32>
      %235 = vector.shape_cast %234 : vector<1x32x64xf32> to vector<32x64xf32>
      %cst_256 = arith.constant dense<0.000000e+00> : vector<16x64xf32>
      %236 = tpu.matmul %233, %235, %cst_256 {dimension_numbers = #tpu.dot_dimension_numbers<[1], [0], [0], [1], [0, 0, 1, 1], [], []>} : vector<16x32xf32>, vector<32x64xf32>, vector<16x64xf32> -> vector<16x64xf32>
      %237 = arith.addf %231, %236 : vector<16x64xf32>
      %c0_257 = arith.constant 0 : index
      %c2_258 = arith.constant 2 : index
      %c0_259 = arith.constant 0 : index
      %238 = vector.load %arg27[%c0_257, %c2_258, %c0_259] : memref<2x10x40xf32, #tpu.memory_space<vmem>>, vector<2x8x32xf32>
      %239 = vector.shape_cast %238 : vector<2x8x32xf32> to vector<16x32xf32>
      %c6_260 = arith.constant 6 : index
      %c0_261 = arith.constant 0 : index
      %c0_262 = arith.constant 0 : index
      %240 = vector.load %arg4[%c6_260, %c0_261, %c0_262] : memref<9x32x64xf32, #tpu.memory_space<vmem>>, vector<1x32x64xf32>
      %241 = vector.shape_cast %240 : vector<1x32x64xf32> to vector<32x64xf32>
      %cst_263 = arith.constant dense<0.000000e+00> : vector<16x64xf32>
      %242 = tpu.matmul %239, %241, %cst_263 {dimension_numbers = #tpu.dot_dimension_numbers<[1], [0], [0], [1], [0, 0, 1, 1], [], []>} : vector<16x32xf32>, vector<32x64xf32>, vector<16x64xf32> -> vector<16x64xf32>
      %243 = arith.addf %237, %242 : vector<16x64xf32>
      %c0_264 = arith.constant 0 : index
      %c2_265 = arith.constant 2 : index
      %c4_266 = arith.constant 4 : index
      %244 = vector.load %arg27[%c0_264, %c2_265, %c4_266] : memref<2x10x40xf32, #tpu.memory_space<vmem>>, vector<2x8x32xf32>
      %245 = vector.shape_cast %244 : vector<2x8x32xf32> to vector<16x32xf32>
      %c7_267 = arith.constant 7 : index
      %c0_268 = arith.constant 0 : index
      %c0_269 = arith.constant 0 : index
      %246 = vector.load %arg4[%c7_267, %c0_268, %c0_269] : memref<9x32x64xf32, #tpu.memory_space<vmem>>, vector<1x32x64xf32>
      %247 = vector.shape_cast %246 : vector<1x32x64xf32> to vector<32x64xf32>
      %cst_270 = arith.constant dense<0.000000e+00> : vector<16x64xf32>
      %248 = tpu.matmul %245, %247, %cst_270 {dimension_numbers = #tpu.dot_dimension_numbers<[1], [0], [0], [1], [0, 0, 1, 1], [], []>} : vector<16x32xf32>, vector<32x64xf32>, vector<16x64xf32> -> vector<16x64xf32>
      %249 = arith.addf %243, %248 : vector<16x64xf32>
      %c0_271 = arith.constant 0 : index
      %c2_272 = arith.constant 2 : index
      %c8_273 = arith.constant 8 : index
      %250 = vector.load %arg27[%c0_271, %c2_272, %c8_273] : memref<2x10x40xf32, #tpu.memory_space<vmem>>, vector<2x8x32xf32>
      %251 = vector.shape_cast %250 : vector<2x8x32xf32> to vector<16x32xf32>
      %c8_274 = arith.constant 8 : index
      %c0_275 = arith.constant 0 : index
      %c0_276 = arith.constant 0 : index
      %252 = vector.load %arg4[%c8_274, %c0_275, %c0_276] : memref<9x32x64xf32, #tpu.memory_space<vmem>>, vector<1x32x64xf32>
      %253 = vector.shape_cast %252 : vector<1x32x64xf32> to vector<32x64xf32>
      %cst_277 = arith.constant dense<0.000000e+00> : vector<16x64xf32>
      %254 = tpu.matmul %251, %253, %cst_277 {dimension_numbers = #tpu.dot_dimension_numbers<[1], [0], [0], [1], [0, 0, 1, 1], [], []>} : vector<16x32xf32>, vector<32x64xf32>, vector<16x64xf32> -> vector<16x64xf32>
      %255 = arith.addf %249, %254 : vector<16x64xf32>
      %256 = vector.broadcast %199 : vector<1x64xf32> to vector<16x64xf32>
      %257 = arith.addf %255, %256 : vector<16x64xf32>
      %c0_278 = arith.constant 0 : index
      %c0_279 = arith.constant 0 : index
      %c0_280 = arith.constant 0 : index
      %258 = vector.load %arg9[%c0_278, %c0_279, %c0_280] : memref<2x8x16xf32, #tpu.memory_space<vmem>>, vector<1x8x16xf32>
      %259 = vector.shape_cast %258 : vector<1x8x16xf32> to vector<8x16xf32>
      %cst_281 = arith.constant dense<0.000000e+00> : vector<8x64xf32>
      %260 = tpu.matmul %259, %257, %cst_281 {dimension_numbers = #tpu.dot_dimension_numbers<[1], [0], [0], [1], [0, 0, 1, 1], [], []>} : vector<8x16xf32>, vector<16x64xf32>, vector<8x64xf32> -> vector<8x64xf32>
      %c1_282 = arith.constant 1 : index
      %c0_283 = arith.constant 0 : index
      %c0_284 = arith.constant 0 : index
      %261 = vector.load %arg9[%c1_282, %c0_283, %c0_284] : memref<2x8x16xf32, #tpu.memory_space<vmem>>, vector<1x8x16xf32>
      %262 = vector.shape_cast %261 : vector<1x8x16xf32> to vector<8x16xf32>
      %cst_285 = arith.constant dense<0.000000e+00> : vector<8x64xf32>
      %263 = tpu.matmul %262, %257, %cst_285 {dimension_numbers = #tpu.dot_dimension_numbers<[1], [0], [0], [1], [0, 0, 1, 1], [], []>} : vector<8x16xf32>, vector<16x64xf32>, vector<8x64xf32> -> vector<8x64xf32>
      %c0_286 = arith.constant 0 : index
      %c0_287 = arith.constant 0 : index
      %c0_288 = arith.constant 0 : index
      %264 = vector.load %arg10[%c0_286, %c0_287, %c0_288] : memref<2x64x32xf32, #tpu.memory_space<vmem>>, vector<1x64x32xf32>
      %265 = vector.shape_cast %264 : vector<1x64x32xf32> to vector<64x32xf32>
      %cst_289 = arith.constant dense<0.000000e+00> : vector<8x32xf32>
      %266 = tpu.matmul %260, %265, %cst_289 {dimension_numbers = #tpu.dot_dimension_numbers<[1], [0], [0], [1], [0, 0, 1, 1], [], []>} : vector<8x64xf32>, vector<64x32xf32>, vector<8x32xf32> -> vector<8x32xf32>
      %c1_290 = arith.constant 1 : index
      %c0_291 = arith.constant 0 : index
      %c0_292 = arith.constant 0 : index
      %267 = vector.load %arg10[%c1_290, %c0_291, %c0_292] : memref<2x64x32xf32, #tpu.memory_space<vmem>>, vector<1x64x32xf32>
      %268 = vector.shape_cast %267 : vector<1x64x32xf32> to vector<64x32xf32>
      %cst_293 = arith.constant dense<0.000000e+00> : vector<8x32xf32>
      %269 = tpu.matmul %260, %268, %cst_293 {dimension_numbers = #tpu.dot_dimension_numbers<[1], [0], [0], [1], [0, 0, 1, 1], [], []>} : vector<8x64xf32>, vector<64x32xf32>, vector<8x32xf32> -> vector<8x32xf32>
      %c0_294 = arith.constant 0 : index
      %c0_295 = arith.constant 0 : index
      %c0_296 = arith.constant 0 : index
      %270 = vector.load %arg10[%c0_294, %c0_295, %c0_296] : memref<2x64x32xf32, #tpu.memory_space<vmem>>, vector<1x64x32xf32>
      %271 = vector.shape_cast %270 : vector<1x64x32xf32> to vector<64x32xf32>
      %cst_297 = arith.constant dense<0.000000e+00> : vector<8x32xf32>
      %272 = tpu.matmul %263, %271, %cst_297 {dimension_numbers = #tpu.dot_dimension_numbers<[1], [0], [0], [1], [0, 0, 1, 1], [], []>} : vector<8x64xf32>, vector<64x32xf32>, vector<8x32xf32> -> vector<8x32xf32>
      %c1_298 = arith.constant 1 : index
      %c0_299 = arith.constant 0 : index
      %c0_300 = arith.constant 0 : index
      %273 = vector.load %arg10[%c1_298, %c0_299, %c0_300] : memref<2x64x32xf32, #tpu.memory_space<vmem>>, vector<1x64x32xf32>
      %274 = vector.shape_cast %273 : vector<1x64x32xf32> to vector<64x32xf32>
      %cst_301 = arith.constant dense<0.000000e+00> : vector<8x32xf32>
      %275 = tpu.matmul %263, %274, %cst_301 {dimension_numbers = #tpu.dot_dimension_numbers<[1], [0], [0], [1], [0, 0, 1, 1], [], []>} : vector<8x64xf32>, vector<64x32xf32>, vector<8x32xf32> -> vector<8x32xf32>
      %276 = arith.maximumf %266, %269 : vector<8x32xf32>
      %277 = arith.maximumf %272, %275 : vector<8x32xf32>
      %278 = arith.maximumf %276, %277 : vector<8x32xf32>
      %279 = arith.cmpf oeq, %266, %278 : vector<8x32xf32>
      %cst_302 = arith.constant dense<true> : vector<8x32xi1>
      %280 = arith.xori %279, %cst_302 : vector<8x32xi1>
      %281 = arith.cmpf oeq, %269, %278 : vector<8x32xf32>
      %282 = arith.andi %280, %281 : vector<8x32xi1>
      %283 = arith.ori %279, %282 : vector<8x32xi1>
      %cst_303 = arith.constant dense<true> : vector<8x32xi1>
      %284 = arith.xori %283, %cst_303 : vector<8x32xi1>
      %285 = arith.cmpf oeq, %272, %278 : vector<8x32xf32>
      %286 = arith.andi %284, %285 : vector<8x32xi1>
      %287 = arith.ori %283, %286 : vector<8x32xi1>
      %cst_304 = arith.constant dense<true> : vector<8x32xi1>
      %288 = arith.xori %287, %cst_304 : vector<8x32xi1>
      %c0_i32_305 = arith.constant 0 : i32
      %289 = vector.broadcast %c0_i32_305 : i32 to vector<8x32xi32>
      %c0_306 = arith.constant 0 : index
      %c0_307 = arith.constant 0 : index
      %c0_308 = arith.constant 0 : index
      %290 = vector.load %arg15[%c0_306, %c0_307, %c0_308] : memref<4x8x32xi32, #tpu.memory_space<vmem>>, vector<1x8x32xi32>
      %291 = vector.shape_cast %290 : vector<1x8x32xi32> to vector<8x32xi32>
      %292 = arith.select %279, %291, %289 : vector<8x32xi1>, vector<8x32xi32>
      %293 = arith.addi %289, %292 : vector<8x32xi32>
      %c1_309 = arith.constant 1 : index
      %c0_310 = arith.constant 0 : index
      %c0_311 = arith.constant 0 : index
      %294 = vector.load %arg15[%c1_309, %c0_310, %c0_311] : memref<4x8x32xi32, #tpu.memory_space<vmem>>, vector<1x8x32xi32>
      %295 = vector.shape_cast %294 : vector<1x8x32xi32> to vector<8x32xi32>
      %296 = arith.select %282, %295, %289 : vector<8x32xi1>, vector<8x32xi32>
      %297 = arith.addi %293, %296 : vector<8x32xi32>
      %c2_312 = arith.constant 2 : index
      %c0_313 = arith.constant 0 : index
      %c0_314 = arith.constant 0 : index
      %298 = vector.load %arg15[%c2_312, %c0_313, %c0_314] : memref<4x8x32xi32, #tpu.memory_space<vmem>>, vector<1x8x32xi32>
      %299 = vector.shape_cast %298 : vector<1x8x32xi32> to vector<8x32xi32>
      %300 = arith.select %286, %299, %289 : vector<8x32xi1>, vector<8x32xi32>
      %301 = arith.addi %297, %300 : vector<8x32xi32>
      %c3_315 = arith.constant 3 : index
      %c0_316 = arith.constant 0 : index
      %c0_317 = arith.constant 0 : index
      %302 = vector.load %arg15[%c3_315, %c0_316, %c0_317] : memref<4x8x32xi32, #tpu.memory_space<vmem>>, vector<1x8x32xi32>
      %303 = vector.shape_cast %302 : vector<1x8x32xi32> to vector<8x32xi32>
      %304 = arith.select %288, %303, %289 : vector<8x32xi1>, vector<8x32xi32>
      %305 = arith.addi %301, %304 : vector<8x32xi32>
      %cst_318 = arith.constant 0.000000e+00 : f32
      %306 = vector.broadcast %cst_318 : f32 to vector<8x32xf32>
      %307 = arith.subf %306, %125 : vector<8x32xf32>
      %308 = arith.addf %278, %197 : vector<8x32xf32>
      %cst_319 = arith.constant 0.000000e+00 : f32
      %cst_320 = arith.constant 1.000000e+00 : f32
      %309 = vector.broadcast %cst_319 : f32 to vector<8x32xf32>
      %310 = arith.maximumf %309, %308 : vector<8x32xf32>
      %311 = vector.broadcast %cst_320 : f32 to vector<8x32xf32>
      %312 = arith.minimumf %311, %310 : vector<8x32xf32>
      %313 = arith.addf %307, %312 : vector<8x32xf32>
      %cst_321 = arith.constant 2.000000e-01 : f32
      %314 = vector.broadcast %cst_321 : f32 to vector<8x32xf32>
      %315 = arith.mulf %314, %313 : vector<8x32xf32>
      %316 = arith.addf %125, %315 : vector<8x32xf32>
      %cst_322 = arith.constant 0.000000e+00 : f32
      %317 = vector.broadcast %cst_322 : f32 to vector<16x64xf32>
      %cst_323 = arith.constant 0.000000e+00 : f32
      %318 = vector.broadcast %cst_323 : f32 to vector<8x32xf32>
      %319 = arith.select %279, %125, %318 : vector<8x32xi1>, vector<8x32xf32>
      %c0_324 = arith.constant 0 : index
      %c0_325 = arith.constant 0 : index
      %c0_326 = arith.constant 0 : index
      %320 = vector.load %arg11[%c0_324, %c0_325, %c0_326] : memref<2x16x8xf32, #tpu.memory_space<vmem>>, vector<1x16x8xf32>
      %321 = vector.shape_cast %320 : vector<1x16x8xf32> to vector<16x8xf32>
      %cst_327 = arith.constant dense<0.000000e+00> : vector<16x32xf32>
      %322 = tpu.matmul %321, %319, %cst_327 {dimension_numbers = #tpu.dot_dimension_numbers<[1], [0], [0], [1], [0, 0, 1, 1], [], []>} : vector<16x8xf32>, vector<8x32xf32>, vector<16x32xf32> -> vector<16x32xf32>
      %c0_328 = arith.constant 0 : index
      %c0_329 = arith.constant 0 : index
      %c0_330 = arith.constant 0 : index
      %323 = vector.load %arg12[%c0_328, %c0_329, %c0_330] : memref<2x32x64xf32, #tpu.memory_space<vmem>>, vector<1x32x64xf32>
      %324 = vector.shape_cast %323 : vector<1x32x64xf32> to vector<32x64xf32>
      %cst_331 = arith.constant dense<0.000000e+00> : vector<16x64xf32>
      %325 = tpu.matmul %322, %324, %cst_331 {dimension_numbers = #tpu.dot_dimension_numbers<[1], [0], [0], [1], [0, 0, 1, 1], [], []>} : vector<16x32xf32>, vector<32x64xf32>, vector<16x64xf32> -> vector<16x64xf32>
      %326 = arith.addf %317, %325 : vector<16x64xf32>
      %cst_332 = arith.constant 0.000000e+00 : f32
      %327 = vector.broadcast %cst_332 : f32 to vector<8x32xf32>
      %328 = arith.select %282, %125, %327 : vector<8x32xi1>, vector<8x32xf32>
      %c0_333 = arith.constant 0 : index
      %c0_334 = arith.constant 0 : index
      %c0_335 = arith.constant 0 : index
      %329 = vector.load %arg11[%c0_333, %c0_334, %c0_335] : memref<2x16x8xf32, #tpu.memory_space<vmem>>, vector<1x16x8xf32>
      %330 = vector.shape_cast %329 : vector<1x16x8xf32> to vector<16x8xf32>
      %cst_336 = arith.constant dense<0.000000e+00> : vector<16x32xf32>
      %331 = tpu.matmul %330, %328, %cst_336 {dimension_numbers = #tpu.dot_dimension_numbers<[1], [0], [0], [1], [0, 0, 1, 1], [], []>} : vector<16x8xf32>, vector<8x32xf32>, vector<16x32xf32> -> vector<16x32xf32>
      %c1_337 = arith.constant 1 : index
      %c0_338 = arith.constant 0 : index
      %c0_339 = arith.constant 0 : index
      %332 = vector.load %arg12[%c1_337, %c0_338, %c0_339] : memref<2x32x64xf32, #tpu.memory_space<vmem>>, vector<1x32x64xf32>
      %333 = vector.shape_cast %332 : vector<1x32x64xf32> to vector<32x64xf32>
      %cst_340 = arith.constant dense<0.000000e+00> : vector<16x64xf32>
      %334 = tpu.matmul %331, %333, %cst_340 {dimension_numbers = #tpu.dot_dimension_numbers<[1], [0], [0], [1], [0, 0, 1, 1], [], []>} : vector<16x32xf32>, vector<32x64xf32>, vector<16x64xf32> -> vector<16x64xf32>
      %335 = arith.addf %326, %334 : vector<16x64xf32>
      %cst_341 = arith.constant 0.000000e+00 : f32
      %336 = vector.broadcast %cst_341 : f32 to vector<8x32xf32>
      %337 = arith.select %286, %125, %336 : vector<8x32xi1>, vector<8x32xf32>
      %c1_342 = arith.constant 1 : index
      %c0_343 = arith.constant 0 : index
      %c0_344 = arith.constant 0 : index
      %338 = vector.load %arg11[%c1_342, %c0_343, %c0_344] : memref<2x16x8xf32, #tpu.memory_space<vmem>>, vector<1x16x8xf32>
      %339 = vector.shape_cast %338 : vector<1x16x8xf32> to vector<16x8xf32>
      %cst_345 = arith.constant dense<0.000000e+00> : vector<16x32xf32>
      %340 = tpu.matmul %339, %337, %cst_345 {dimension_numbers = #tpu.dot_dimension_numbers<[1], [0], [0], [1], [0, 0, 1, 1], [], []>} : vector<16x8xf32>, vector<8x32xf32>, vector<16x32xf32> -> vector<16x32xf32>
      %c0_346 = arith.constant 0 : index
      %c0_347 = arith.constant 0 : index
      %c0_348 = arith.constant 0 : index
      %341 = vector.load %arg12[%c0_346, %c0_347, %c0_348] : memref<2x32x64xf32, #tpu.memory_space<vmem>>, vector<1x32x64xf32>
      %342 = vector.shape_cast %341 : vector<1x32x64xf32> to vector<32x64xf32>
      %cst_349 = arith.constant dense<0.000000e+00> : vector<16x64xf32>
      %343 = tpu.matmul %340, %342, %cst_349 {dimension_numbers = #tpu.dot_dimension_numbers<[1], [0], [0], [1], [0, 0, 1, 1], [], []>} : vector<16x32xf32>, vector<32x64xf32>, vector<16x64xf32> -> vector<16x64xf32>
      %344 = arith.addf %335, %343 : vector<16x64xf32>
      %cst_350 = arith.constant 0.000000e+00 : f32
      %345 = vector.broadcast %cst_350 : f32 to vector<8x32xf32>
      %346 = arith.select %288, %125, %345 : vector<8x32xi1>, vector<8x32xf32>
      %c1_351 = arith.constant 1 : index
      %c0_352 = arith.constant 0 : index
      %c0_353 = arith.constant 0 : index
      %347 = vector.load %arg11[%c1_351, %c0_352, %c0_353] : memref<2x16x8xf32, #tpu.memory_space<vmem>>, vector<1x16x8xf32>
      %348 = vector.shape_cast %347 : vector<1x16x8xf32> to vector<16x8xf32>
      %cst_354 = arith.constant dense<0.000000e+00> : vector<16x32xf32>
      %349 = tpu.matmul %348, %346, %cst_354 {dimension_numbers = #tpu.dot_dimension_numbers<[1], [0], [0], [1], [0, 0, 1, 1], [], []>} : vector<16x8xf32>, vector<8x32xf32>, vector<16x32xf32> -> vector<16x32xf32>
      %c1_355 = arith.constant 1 : index
      %c0_356 = arith.constant 0 : index
      %c0_357 = arith.constant 0 : index
      %350 = vector.load %arg12[%c1_355, %c0_356, %c0_357] : memref<2x32x64xf32, #tpu.memory_space<vmem>>, vector<1x32x64xf32>
      %351 = vector.shape_cast %350 : vector<1x32x64xf32> to vector<32x64xf32>
      %cst_358 = arith.constant dense<0.000000e+00> : vector<16x64xf32>
      %352 = tpu.matmul %349, %351, %cst_358 {dimension_numbers = #tpu.dot_dimension_numbers<[1], [0], [0], [1], [0, 0, 1, 1], [], []>} : vector<16x32xf32>, vector<32x64xf32>, vector<16x64xf32> -> vector<16x64xf32>
      %353 = arith.addf %344, %352 : vector<16x64xf32>
      %354 = vector.shape_cast %353 : vector<16x64xf32> to vector<2x8x64xf32>
      %c0_359 = arith.constant 0 : index
      %c1_360 = arith.constant 1 : index
      %c8_361 = arith.constant 8 : index
      %355 = vector.load %arg28[%c0_359, %c1_360, %c8_361] : memref<2x10x80xf32, #tpu.memory_space<vmem>>, vector<2x8x64xf32>
      tpu.vector_store %arg28[%c0_359, %c1_360, %c8_361], %354 {strides = array<i32>} : memref<2x10x80xf32, #tpu.memory_space<vmem>>, vector<2x8x64xf32>,
      %cst_362 = arith.constant 0.000000e+00 : f32
      %356 = vector.broadcast %cst_362 : f32 to vector<16x32xf32>
      %c0_363 = arith.constant 0 : index
      %c0_364 = arith.constant 0 : index
      %c0_365 = arith.constant 0 : index
      %357 = vector.load %arg28[%c0_363, %c0_364, %c0_365] : memref<2x10x80xf32, #tpu.memory_space<vmem>>, vector<2x8x64xf32>
      %358 = vector.shape_cast %357 : vector<2x8x64xf32> to vector<16x64xf32>
      %c0_366 = arith.constant 0 : index
      %c0_367 = arith.constant 0 : index
      %c0_368 = arith.constant 0 : index
      %359 = vector.load %arg6[%c0_366, %c0_367, %c0_368] : memref<9x64x32xf32, #tpu.memory_space<vmem>>, vector<1x64x32xf32>
      %360 = vector.shape_cast %359 : vector<1x64x32xf32> to vector<64x32xf32>
      %cst_369 = arith.constant dense<0.000000e+00> : vector<16x32xf32>
      %361 = tpu.matmul %358, %360, %cst_369 {dimension_numbers = #tpu.dot_dimension_numbers<[1], [0], [0], [1], [0, 0, 1, 1], [], []>} : vector<16x64xf32>, vector<64x32xf32>, vector<16x32xf32> -> vector<16x32xf32>
      %362 = arith.addf %356, %361 : vector<16x32xf32>
      %c0_370 = arith.constant 0 : index
      %c0_371 = arith.constant 0 : index
      %c8_372 = arith.constant 8 : index
      %363 = vector.load %arg28[%c0_370, %c0_371, %c8_372] : memref<2x10x80xf32, #tpu.memory_space<vmem>>, vector<2x8x64xf32>
      %364 = vector.shape_cast %363 : vector<2x8x64xf32> to vector<16x64xf32>
      %c1_373 = arith.constant 1 : index
      %c0_374 = arith.constant 0 : index
      %c0_375 = arith.constant 0 : index
      %365 = vector.load %arg6[%c1_373, %c0_374, %c0_375] : memref<9x64x32xf32, #tpu.memory_space<vmem>>, vector<1x64x32xf32>
      %366 = vector.shape_cast %365 : vector<1x64x32xf32> to vector<64x32xf32>
      %cst_376 = arith.constant dense<0.000000e+00> : vector<16x32xf32>
      %367 = tpu.matmul %364, %366, %cst_376 {dimension_numbers = #tpu.dot_dimension_numbers<[1], [0], [0], [1], [0, 0, 1, 1], [], []>} : vector<16x64xf32>, vector<64x32xf32>, vector<16x32xf32> -> vector<16x32xf32>
      %368 = arith.addf %362, %367 : vector<16x32xf32>
      %c0_377 = arith.constant 0 : index
      %c0_378 = arith.constant 0 : index
      %c16 = arith.constant 16 : index
      %369 = vector.load %arg28[%c0_377, %c0_378, %c16] : memref<2x10x80xf32, #tpu.memory_space<vmem>>, vector<2x8x64xf32>
      %370 = vector.shape_cast %369 : vector<2x8x64xf32> to vector<16x64xf32>
      %c2_379 = arith.constant 2 : index
      %c0_380 = arith.constant 0 : index
      %c0_381 = arith.constant 0 : index
      %371 = vector.load %arg6[%c2_379, %c0_380, %c0_381] : memref<9x64x32xf32, #tpu.memory_space<vmem>>, vector<1x64x32xf32>
      %372 = vector.shape_cast %371 : vector<1x64x32xf32> to vector<64x32xf32>
      %cst_382 = arith.constant dense<0.000000e+00> : vector<16x32xf32>
      %373 = tpu.matmul %370, %372, %cst_382 {dimension_numbers = #tpu.dot_dimension_numbers<[1], [0], [0], [1], [0, 0, 1, 1], [], []>} : vector<16x64xf32>, vector<64x32xf32>, vector<16x32xf32> -> vector<16x32xf32>
      %374 = arith.addf %368, %373 : vector<16x32xf32>
      %c0_383 = arith.constant 0 : index
      %c1_384 = arith.constant 1 : index
      %c0_385 = arith.constant 0 : index
      %375 = vector.load %arg28[%c0_383, %c1_384, %c0_385] : memref<2x10x80xf32, #tpu.memory_space<vmem>>, vector<2x8x64xf32>
      %376 = vector.shape_cast %375 : vector<2x8x64xf32> to vector<16x64xf32>
      %c3_386 = arith.constant 3 : index
      %c0_387 = arith.constant 0 : index
      %c0_388 = arith.constant 0 : index
      %377 = vector.load %arg6[%c3_386, %c0_387, %c0_388] : memref<9x64x32xf32, #tpu.memory_space<vmem>>, vector<1x64x32xf32>
      %378 = vector.shape_cast %377 : vector<1x64x32xf32> to vector<64x32xf32>
      %cst_389 = arith.constant dense<0.000000e+00> : vector<16x32xf32>
      %379 = tpu.matmul %376, %378, %cst_389 {dimension_numbers = #tpu.dot_dimension_numbers<[1], [0], [0], [1], [0, 0, 1, 1], [], []>} : vector<16x64xf32>, vector<64x32xf32>, vector<16x32xf32> -> vector<16x32xf32>
      %380 = arith.addf %374, %379 : vector<16x32xf32>
      %c0_390 = arith.constant 0 : index
      %c1_391 = arith.constant 1 : index
      %c8_392 = arith.constant 8 : index
      %381 = vector.load %arg28[%c0_390, %c1_391, %c8_392] : memref<2x10x80xf32, #tpu.memory_space<vmem>>, vector<2x8x64xf32>
      %382 = vector.shape_cast %381 : vector<2x8x64xf32> to vector<16x64xf32>
      %c4_393 = arith.constant 4 : index
      %c0_394 = arith.constant 0 : index
      %c0_395 = arith.constant 0 : index
      %383 = vector.load %arg6[%c4_393, %c0_394, %c0_395] : memref<9x64x32xf32, #tpu.memory_space<vmem>>, vector<1x64x32xf32>
      %384 = vector.shape_cast %383 : vector<1x64x32xf32> to vector<64x32xf32>
      %cst_396 = arith.constant dense<0.000000e+00> : vector<16x32xf32>
      %385 = tpu.matmul %382, %384, %cst_396 {dimension_numbers = #tpu.dot_dimension_numbers<[1], [0], [0], [1], [0, 0, 1, 1], [], []>} : vector<16x64xf32>, vector<64x32xf32>, vector<16x32xf32> -> vector<16x32xf32>
      %386 = arith.addf %380, %385 : vector<16x32xf32>
      %c0_397 = arith.constant 0 : index
      %c1_398 = arith.constant 1 : index
      %c16_399 = arith.constant 16 : index
      %387 = vector.load %arg28[%c0_397, %c1_398, %c16_399] : memref<2x10x80xf32, #tpu.memory_space<vmem>>, vector<2x8x64xf32>
      %388 = vector.shape_cast %387 : vector<2x8x64xf32> to vector<16x64xf32>
      %c5_400 = arith.constant 5 : index
      %c0_401 = arith.constant 0 : index
      %c0_402 = arith.constant 0 : index
      %389 = vector.load %arg6[%c5_400, %c0_401, %c0_402] : memref<9x64x32xf32, #tpu.memory_space<vmem>>, vector<1x64x32xf32>
      %390 = vector.shape_cast %389 : vector<1x64x32xf32> to vector<64x32xf32>
      %cst_403 = arith.constant dense<0.000000e+00> : vector<16x32xf32>
      %391 = tpu.matmul %388, %390, %cst_403 {dimension_numbers = #tpu.dot_dimension_numbers<[1], [0], [0], [1], [0, 0, 1, 1], [], []>} : vector<16x64xf32>, vector<64x32xf32>, vector<16x32xf32> -> vector<16x32xf32>
      %392 = arith.addf %386, %391 : vector<16x32xf32>
      %c0_404 = arith.constant 0 : index
      %c2_405 = arith.constant 2 : index
      %c0_406 = arith.constant 0 : index
      %393 = vector.load %arg28[%c0_404, %c2_405, %c0_406] : memref<2x10x80xf32, #tpu.memory_space<vmem>>, vector<2x8x64xf32>
      %394 = vector.shape_cast %393 : vector<2x8x64xf32> to vector<16x64xf32>
      %c6_407 = arith.constant 6 : index
      %c0_408 = arith.constant 0 : index
      %c0_409 = arith.constant 0 : index
      %395 = vector.load %arg6[%c6_407, %c0_408, %c0_409] : memref<9x64x32xf32, #tpu.memory_space<vmem>>, vector<1x64x32xf32>
      %396 = vector.shape_cast %395 : vector<1x64x32xf32> to vector<64x32xf32>
      %cst_410 = arith.constant dense<0.000000e+00> : vector<16x32xf32>
      %397 = tpu.matmul %394, %396, %cst_410 {dimension_numbers = #tpu.dot_dimension_numbers<[1], [0], [0], [1], [0, 0, 1, 1], [], []>} : vector<16x64xf32>, vector<64x32xf32>, vector<16x32xf32> -> vector<16x32xf32>
      %398 = arith.addf %392, %397 : vector<16x32xf32>
      %c0_411 = arith.constant 0 : index
      %c2_412 = arith.constant 2 : index
      %c8_413 = arith.constant 8 : index
      %399 = vector.load %arg28[%c0_411, %c2_412, %c8_413] : memref<2x10x80xf32, #tpu.memory_space<vmem>>, vector<2x8x64xf32>
      %400 = vector.shape_cast %399 : vector<2x8x64xf32> to vector<16x64xf32>
      %c7_414 = arith.constant 7 : index
      %c0_415 = arith.constant 0 : index
      %c0_416 = arith.constant 0 : index
      %401 = vector.load %arg6[%c7_414, %c0_415, %c0_416] : memref<9x64x32xf32, #tpu.memory_space<vmem>>, vector<1x64x32xf32>
      %402 = vector.shape_cast %401 : vector<1x64x32xf32> to vector<64x32xf32>
      %cst_417 = arith.constant dense<0.000000e+00> : vector<16x32xf32>
      %403 = tpu.matmul %400, %402, %cst_417 {dimension_numbers = #tpu.dot_dimension_numbers<[1], [0], [0], [1], [0, 0, 1, 1], [], []>} : vector<16x64xf32>, vector<64x32xf32>, vector<16x32xf32> -> vector<16x32xf32>
      %404 = arith.addf %398, %403 : vector<16x32xf32>
      %c0_418 = arith.constant 0 : index
      %c2_419 = arith.constant 2 : index
      %c16_420 = arith.constant 16 : index
      %405 = vector.load %arg28[%c0_418, %c2_419, %c16_420] : memref<2x10x80xf32, #tpu.memory_space<vmem>>, vector<2x8x64xf32>
      %406 = vector.shape_cast %405 : vector<2x8x64xf32> to vector<16x64xf32>
      %c8_421 = arith.constant 8 : index
      %c0_422 = arith.constant 0 : index
      %c0_423 = arith.constant 0 : index
      %407 = vector.load %arg6[%c8_421, %c0_422, %c0_423] : memref<9x64x32xf32, #tpu.memory_space<vmem>>, vector<1x64x32xf32>
      %408 = vector.shape_cast %407 : vector<1x64x32xf32> to vector<64x32xf32>
      %cst_424 = arith.constant dense<0.000000e+00> : vector<16x32xf32>
      %409 = tpu.matmul %406, %408, %cst_424 {dimension_numbers = #tpu.dot_dimension_numbers<[1], [0], [0], [1], [0, 0, 1, 1], [], []>} : vector<16x64xf32>, vector<64x32xf32>, vector<16x32xf32> -> vector<16x32xf32>
      %410 = arith.addf %404, %409 : vector<16x32xf32>
      %cst_425 = arith.constant 0.000000e+00 : f32
      %411 = vector.broadcast %cst_425 : f32 to vector<16x32xf32>
      %412 = arith.subf %411, %126 : vector<16x32xf32>
      %413 = arith.addf %86, %410 : vector<16x32xf32>
      %cst_426 = arith.constant 0.000000e+00 : f32
      %cst_427 = arith.constant 1.000000e+00 : f32
      %414 = vector.broadcast %cst_426 : f32 to vector<16x32xf32>
      %415 = arith.maximumf %414, %413 : vector<16x32xf32>
      %416 = vector.broadcast %cst_427 : f32 to vector<16x32xf32>
      %417 = arith.minimumf %416, %415 : vector<16x32xf32>
      %418 = arith.addf %412, %417 : vector<16x32xf32>
      %cst_428 = arith.constant 2.000000e-01 : f32
      %419 = vector.broadcast %cst_428 : f32 to vector<16x32xf32>
      %420 = arith.mulf %419, %418 : vector<16x32xf32>
      %421 = arith.addf %126, %420 : vector<16x32xf32>
      %c0_429 = arith.constant 0 : index
      %c0_430 = arith.constant 0 : index
      %422 = vector.load %arg22[%c0_429, %c0_430] : memref<2x10xf32, #tpu.memory_space<vmem>>, vector<2x10xf32>
      tpu.vector_store %arg22[%c0_429, %c0_430], %168 {strides = array<i32>} : memref<2x10xf32, #tpu.memory_space<vmem>>, vector<2x10xf32>,
      %c0_431 = arith.constant 0 : index
      %c0_432 = arith.constant 0 : index
      %423 = vector.load %arg23[%c0_431, %c0_432] : memref<8x32xf32, #tpu.memory_space<vmem>>, vector<8x32xf32>
      tpu.vector_store %arg23[%c0_431, %c0_432], %316 {strides = array<i32>} : memref<8x32xf32, #tpu.memory_space<vmem>>, vector<8x32xf32>,
      %c0_433 = arith.constant 0 : index
      %c0_434 = arith.constant 0 : index
      %424 = vector.load %arg24[%c0_433, %c0_434] : memref<16x32xf32, #tpu.memory_space<vmem>>, vector<16x32xf32>
      tpu.vector_store %arg24[%c0_433, %c0_434], %421 {strides = array<i32>} : memref<16x32xf32, #tpu.memory_space<vmem>>, vector<16x32xf32>,
      %c0_435 = arith.constant 0 : index
      %c0_436 = arith.constant 0 : index
      %425 = vector.load %arg25[%c0_435, %c0_436] : memref<8x32xi32, #tpu.memory_space<vmem>>, vector<8x32xi32>
      tpu.vector_store %arg25[%c0_435, %c0_436], %305 {strides = array<i32>} : memref<8x32xi32, #tpu.memory_space<vmem>>, vector<8x32xi32>,
    }
    return
  }
}

</mosaic_0001>

<bundles_post_ra>
// kernel: tpu_custom_call.1
= control target key start
LH: loop header
LB: loop body
LE: loop exit
PB: predicated region body
PF: predicated region fallthrough
CT: control target
= control target key end

     0   :  { %s9314_s0 = inlined_call_operand.vmem [shape: f32[2,10], index: 0, kind: input, shape index: {}]   ;;  %s9315_s1 = inlined_call_operand.vmem [shape: f32[8,32], index: 1, kind: input, shape index: {}]   ;;  %s9316_s2 = inlined_call_operand.vmem [shape: f32[16,32], index: 2, kind: input, shape index: {}]   ;;  %s9317_s3 = inlined_call_operand.vmem [shape: f32[2,16,16], index: 3, kind: input, shape index: {}]   ;;  %s9318_s4 = inlined_call_operand.vmem [shape: f32[9,32,64], index: 4, kind: input, shape index: {}]   ;;  %s9319_s5 = inlined_call_operand.vmem [shape: f32[1,64], index: 5, kind: input, shape index: {}]   ;;  %s9320_s6 = inlined_call_operand.vmem [shape: f32[9,64,32], index: 6, kind: input, shape index: {}]   ;;  %s9321_s7 = inlined_call_operand.vmem [shape: f32[9,16,64], index: 7, kind: input, shape index: {}]   ;;  %s9322_s8 = inlined_call_operand.vmem [shape: f32[1,64], index: 8, kind: input, shape index: {}]   ;;  %s9323_s9 = inlined_call_operand.vmem [shape: f32[2,8,16], index: 9, kind: input, shape index: {}]   ;;  %s9324_s10 = inlined_call_operand.vmem [shape: f32[2,64,32], index: 10, kind: input, shape index: {}]   ;;  %s9325_s11 = inlined_call_operand.vmem [shape: f32[2,16,8], index: 11, kind: input, shape index: {}]   ;;  %s9326_s12 = inlined_call_operand.vmem [shape: f32[2,32,64], index: 12, kind: input, shape index: {}]   ;;  %s9327_s13 = inlined_call_operand.vmem [shape: f32[2,16,32], index: 13, kind: input, shape index: {}]   ;;  %s9328_s14 = inlined_call_operand.vmem [shape: f32[2,64,32], index: 14, kind: input, shape index: {}]   ;;  %s9329_s15 = inlined_call_operand.vmem [shape: s32[4,8,32], index: 15, kind: input, shape index: {}]   ;;  %s9330_s16 = inlined_call_operand.vmem [shape: s32[4,16,32], index: 16, kind: input, shape index: {}]   ;;  %s9331_s17 = inlined_call_operand.vmem [shape: f32[4,2,8], index: 17, kind: input, shape index: {}]   ;;  %s9332_s18 = inlined_call_operand.vmem [shape: f32[4,8,2], index: 18, kind: input, shape index: {}]   ;;  %s9333_s19 = inlined_call_operand.vmem [shape: f32[4,32,10], index: 19, kind: input, shape index: {}]   ;;  %s9334_s20 = inlined_call_operand.vmem [shape: f32[1,10], index: 20, kind: input, shape index: {}]   ;;  %s9335_s21 = inlined_call_operand.vmem [shape: f32[4,10,32], index: 21, kind: input, shape index: {}]   ;;  %s9336_s22 = inlined_call_operand.hbm [shape: f32[2,10], index: 22, kind: output, shape index: {0}]   ;;  %s9337_s23 = inlined_call_operand.hbm [shape: f32[8,32], index: 23, kind: output, shape index: {1}]   ;;  %s9338_s24 = inlined_call_operand.hbm [shape: f32[16,32], index: 24, kind: output, shape index: {2}]   ;;  %s9339_s25 = inlined_call_operand.hbm [shape: s32[8,32], index: 25, kind: output, shape index: {3}]   ;;  %s9340_s26 = inlined_call_operand.hbm [shape: s32[16,32], index: 26, kind: output, shape index: {4}]  }
   0x1   :  { %9349 = sst [smem:[#allocation16_spill]] %s9314_s0 }
   0x2   :  { %9350 = sst [smem:[#allocation17_spill]] %s9315_s1 }
   0x3   :  { %9351 = sst [smem:[#allocation18_spill]] %s9316_s2 }
   0x4   :  { %9352 = sst [smem:[#allocation19_spill]] %s9317_s3 }
   0x5   :  { %9353 = sst [smem:[#allocation20_spill]] %s9318_s4 }
   0x6   :  { %9354 = sst [smem:[#allocation21_spill]] %s9319_s5 }
   0x7   :  { %9355 = sst [smem:[#allocation22_spill]] %s9320_s6 }
   0x8   :  { %9356 = sst [smem:[#allocation23_spill]] %s9321_s7 }
   0x9   :  { %9357 = sst [smem:[#allocation24_spill]] %s9322_s8 }
   0xa   :  { %9358 = sst [smem:[#allocation25_spill]] %s9323_s9 }
   0xb   :  { %9359 = sst [smem:[#allocation26_spill]] %s9324_s10 }
   0xc   :  { %32 = vsyncpa [#allocation6], 0 }
   0xd   :  { %33 = vsyncpa [#allocation8], 0  ;;  %s9360_s7 = sld [smem:[#allocation19_spill]]  ;;  %vm79_vm0 = vcmask 326656   ;;  %s7934_s4 = smov 1   ;;  %vm81_vm1 = vcmask 320512  }
   0xe   :  { %vm85_vm2 = vcmask 654336   ;;  %vm87_vm3 = vcmask 648192   ;;  %v7935_v4 = vmov 0.0   ;;  %vm91_vm4 = vcmask 146432  }
   0xf   :  { %80 = vst.msk [vmem:[#allocation2] sm:$0xff] %vm79_vm0, %v7935_v4  ;;  %83 = vst.msk [vmem:[#allocation2 + $0x10] sm:$0xff] %vm79_vm0, %v7935_v4  ;;  %vm94_vm5 = vcmask 140288  }
  0x10   :  { %82 = vst.msk [vmem:[#allocation2 + $0x8] sm:$0x3] %vm81_vm1, %v7935_v4  ;;  %84 = vst.msk [vmem:[#allocation2 + $0x18] sm:$0x3] %vm81_vm1, %v7935_v4 }
  0x11   :  { %86 = vst.msk [vmem:[#allocation3] sm:$0xff] %vm85_vm2, %v7935_v4  ;;  %89 = vst.msk [vmem:[#allocation3 + $0x10] sm:$0xff] %vm85_vm2, %v7935_v4 }
  0x12   :  { %88 = vst.msk [vmem:[#allocation3 + $0x8] sm:$0x3] %vm87_vm3, %v7935_v4  ;;  %90 = vst.msk [vmem:[#allocation3 + $0x18] sm:$0x3] %vm87_vm3, %v7935_v4 }
  0x13   :  { %v101_v0 = vld [vmem:[%s9360_s7 + $0x10] sm:$0xff]  ;;  %v99_v1 = vld [vmem:[%s9360_s7] sm:$0xff]  ;;  %v102_v2 = vld [vmem:[%s9360_s7 + $0x18] sm:$0xff] }
  0x14   :  { %112 = vrot.lane.b32.xlu1 %v101_v0, %s7934_s4  ;;  %108 = vrot.lane.b32.xlu0 %v99_v1, %s7934_s4  ;;  %v100_v3 = vld [vmem:[%s9360_s7 + $0x8] sm:$0xff] }
  0x15   :  { %34 = vsyncpa [#allocation11], 0  ;;  %96 = vst.msk [vmem:[#allocation4 + $0x18] sm:$0xff] %vm91_vm4, %v7935_v4  ;;  %s9361_s10 = sld [smem:[#allocation23_spill]]  ;;  %vm120_vm6 = vcmask 138248   ;;  %s7936_s8 = smov 127  }
  0x16   :  { %97 = vst.msk [vmem:[#allocation4 + $0x20] sm:$0xff] %vm91_vm4, %v7935_v4  ;;  %92 = vst.msk [vmem:[#allocation4] sm:$0xff] %vm91_vm4, %v7935_v4  ;;  %vm146_vm7 = vcmask 130048   ;;  %vm1101_vm8 = vcmask 261120   ;;  %s9362_s30 = sld [smem:[#allocation17_spill]]  ;;  %s9363_s6 = sld [smem:[#allocation18_spill]] }
  0x17   :  { %93 = vst.msk [vmem:[#allocation4 + $0x8] sm:$0xff] %vm91_vm4, %v7935_v4  ;;  %vm9348_vm9 = vcmask 523264   ;;  %s9365_s2 = sld [smem:[#allocation16_spill]]  ;;  %vm1651_vm10 = vcmask 74752   ;;  %vm7939_vm14 = vmmov 1  }
  0x18   :  { %98 = vst.msk [vmem:[#allocation4 + $0x28] sm:$0x3] %vm94_vm5, %v7935_v4  ;;  %95 = vst.msk [vmem:[#allocation4 + $0x10] sm:$0x3] %vm94_vm5, %v7935_v4  ;;  %114 = vrot.lane.b32.xlu1 %v102_v2, %s7934_s4  ;;  %110 = vrot.lane.b32.xlu0 %v100_v3, %s7934_s4  ;;  %s7937_s4 = smov 126  }
  0x1b   :  { %v5838_v5 = vld [vmem:[%s9361_s10 + $0x10] sm:$0xff]  ;;  %v5839_v6 = vld [vmem:[%s9361_s10 + $0x18] sm:$0xff]  ;;  %v129_v10 = vld [vmem:[%s9361_s10] sm:$0xff] }
  0x1c   :  { %v7243_v7 = vpack.c.bf16 %v5839_v6, %v5838_v5  ;;  %v130_v11 = vld [vmem:[%s9361_s10 + $0x8] sm:$0xff]  ;;  %v5848_v28 = vld [vmem:[%s9361_s10 + $0x20] sm:$0xff]  ;;  %v5854_v34 = vld [vmem:[%s9361_s10 + $0x30] sm:$0xff] }
  0x1d   :  { %v7247_v12 = vpack.c.bf16 %v130_v11, %v129_v10  ;;  %v5849_v29 = vld [vmem:[%s9361_s10 + $0x28] sm:$0xff]  ;;  %v5855_v35 = vld [vmem:[%s9361_s10 + $0x38] sm:$0xff]  ;;  %v5860_v38 = vld [vmem:[%s9361_s10 + $0x40] sm:$0xff] }
  0x1e   :  { %7244 = vmatprep.subr.bf16.mxu0 %v7243_v7  ;;  %v7251_v30 = vpack.c.bf16 %v5849_v29, %v5848_v28  ;;  %v7255_v36 = vpack.c.bf16 %v5855_v35, %v5854_v34  ;;  %v5861_v39 = vld [vmem:[%s9361_s10 + $0x48] sm:$0xff]  ;;  %v5866_v44 = vld [vmem:[%s9361_s10 + $0x50] sm:$0xff]  ;;  %v5867_v45 = vld [vmem:[%s9361_s10 + $0x58] sm:$0xff] }
  0x1f   :  { %7246 = vmatpush3.bf16.msra.mxu0 %v7243_v7  ;;  %v7259_v41 = vpack.c.bf16 %v5861_v39, %v5860_v38  ;;  %v7263_v47 = vpack.c.bf16 %v5867_v45, %v5866_v44  ;;  %v5872_v49 = vld [vmem:[%s9361_s10 + $0x60] sm:$0xff]  ;;  %v5873_v50 = vld [vmem:[%s9361_s10 + $0x68] sm:$0xff]  ;;  %v5878_v55 = vld [vmem:[%s9361_s10 + $0x70] sm:$0xff] }
  0x20   :  { %7248 = vmatprep.subr.bf16.mxu0 %v7247_v12  ;;  %v7267_v52 = vpack.c.bf16 %v5873_v50, %v5872_v49  ;;  %v5879_v56 = vld [vmem:[%s9361_s10 + $0x78] sm:$0xff]  ;;  %v5884_v61 = vld [vmem:[%s9361_s10 + $0x80] sm:$0xff]  ;;  %v5885_v62 = vld [vmem:[%s9361_s10 + $0x88] sm:$0xff] }
  0x21   :  { %v7271_v58 = vpack.c.bf16 %v5879_v56, %v5878_v55  ;;  %v7275_v0 = vpack.c.bf16 %v5885_v62, %v5884_v61  ;;  %v1655_v10 = vld [vmem:[%s9363_s6] sm:$0xff]  ;;  %v1656_v11 = vld [vmem:[%s9363_s6 + $0x8] sm:$0xff]  ;;  %v1269_v28 = vld [vmem:[%s9328_s14 + $0x10] sm:$0xff] }
  0x22   :  { %1657 = vst.msk [vmem:[#allocation9] sm:$0xff] %vm1101_vm8, %v1655_v10  ;;  %1658 = vst.msk [vmem:[#allocation9 + $0x8] sm:$0xff] %vm1101_vm8, %v1656_v11  ;;  %v1270_v29 = vld [vmem:[%s9328_s14 + $0x18] sm:$0xff]  ;;  %v1272_v34 = vld [vmem:[%s9328_s14 + $0x28] sm:$0xff] }
  0x23   :  { %v5899_v39 = vld [vmem:[%s9328_s14 + $0x40] sm:$0xff]  ;;  %v5904_v50 = vld [vmem:[%s9328_s14 + $0x68] sm:$0xff] }
  0x24   :  { %v5903_v49 = vld [vmem:[%s9328_s14 + $0x60] sm:$0xff]  ;;  %v5916_v10 = vld [vmem:[%s9330_s16 + $0x28] sm:$0xff] }
  0x25   :  { %v1650_v55 = vld [vmem:[%s9365_s2] sm:$0x3]  ;;  %s8391_s2 = smov 0  }
  0x26   :  { %1652 = vst.msk [vmem:[#allocation5] sm:$0x3] %vm1651_vm10, %v1650_v55 }
  0x86   :  { %v113_v8 = vpop.permute.xlu1 %112  ;;  %v109_v9 = vpop.permute.xlu0 %108 }
  0x87   :  { %123 = vst.msk [vmem:[#allocation4 + $0x19] sm:$0xff] %vm120_vm6, %v113_v8  ;;  %121 = vst.msk [vmem:[#allocation4 + $0x1] sm:$0xff] %vm120_vm6, %v109_v9  ;;  %v1099_v8 = vld [vmem:[%s9327_s13] sm:$0xff] }
  0x88   :  { %v1653_v9 = vld [vmem:[%s9362_s30] sm:$0xff] }
  0x89   :  { %1654 = vst.msk [vmem:[#allocation7] sm:$0xff] %vm1101_vm8, %v1653_v9 }
  0x8a   :  { %v115_v13 = vpop.permute.xlu1 %114  ;;  %v111_v14 = vpop.permute.xlu0 %110 }
  0x8b   :  { %124 = vst.msk [vmem:[#allocation4 + $0x21] sm:$0xff] %vm120_vm6, %v115_v13  ;;  %122 = vst.msk [vmem:[#allocation4 + $0x9] sm:$0xff] %vm120_vm6, %v111_v14  ;;  %v5893_v13 = vld [vmem:[%s9327_s13 + $0x10] sm:$0xff] }
  0x8c   :  { %6628 = vmatprep.mubr.msk.f32.mxu1 %vm1101_vm8, %v5893_v13 }
  0x8e   :  { %v125_v15 = vld [vmem:[#allocation4] sm:$0xff]  ;;  %v127_v16 = vld [vmem:[#allocation4 + $0x18] sm:$0xff] }
  0x8f   :  { %138 = vrot.lane.b32.xlu0 %v125_v15, %s7936_s8  ;;  %v8119_v19 = vld [vmem:[#allocation4 + $0x1] sm:$0xff]  ;;  %v8125_v21 = vld [vmem:[#allocation4 + $0x19] sm:$0xff] }
  0x92   :  { %v126_v17 = vld [vmem:[#allocation4 + $0x8] sm:$0xff]  ;;  %v128_v18 = vld [vmem:[#allocation4 + $0x20] sm:$0xff] }
  0x93   :  { %140 = vrot.lane.b32.xlu1 %v126_v17, %s7936_s8  ;;  %142 = vrot.lane.b32.xlu0 %v127_v16, %s7936_s8  ;;  %v8123_v20 = vld [vmem:[#allocation4 + $0x9] sm:$0xff]  ;;  %v8131_v22 = vld [vmem:[#allocation4 + $0x21] sm:$0xff] }
  0x94   :  { %v8138_v23 = vld [vmem:[#allocation4 + $0x2] sm:$0xff]  ;;  %v8143_v24 = vld [vmem:[#allocation4 + $0xa] sm:$0xff]  ;;  %v8145_v25 = vld [vmem:[#allocation4 + $0x1a] sm:$0xff] }
  0x95   :  { %v8151_v26 = vld [vmem:[#allocation4 + $0x22] sm:$0xff] }
  0x97   :  { %144 = vrot.lane.b32.xlu1 %v128_v18, %s7936_s8  ;;  %336 = vrot.lane.b32.xlu0 %v125_v15, %s7937_s4 }
  0x9b   :  { %338 = vrot.lane.b32.xlu1 %v126_v17, %s7937_s4  ;;  %340 = vrot.lane.b32.xlu0 %v127_v16, %s7937_s4 }
  0x9f   :  { %342 = vrot.lane.b32.xlu1 %v128_v18, %s7937_s4  ;;  %552 = vrot.lane.b32.xlu0 %v8119_v19, %s7936_s8 }
  0xa3   :  { %554 = vrot.lane.b32.xlu1 %v8123_v20, %s7936_s8  ;;  %556 = vrot.lane.b32.xlu0 %v8125_v21, %s7936_s8 }
  0xa7   :  { %558 = vrot.lane.b32.xlu1 %v8131_v22, %s7936_s8  ;;  %660 = vrot.lane.b32.xlu0 %v8119_v19, %s7937_s4 }
  0xab   :  { %662 = vrot.lane.b32.xlu1 %v8123_v20, %s7937_s4  ;;  %664 = vrot.lane.b32.xlu0 %v8125_v21, %s7937_s4 }
  0xaf   :  { %666 = vrot.lane.b32.xlu1 %v8131_v22, %s7937_s4  ;;  %876 = vrot.lane.b32.xlu0 %v8138_v23, %s7936_s8 }
  0xb3   :  { %878 = vrot.lane.b32.xlu1 %v8143_v24, %s7936_s8  ;;  %880 = vrot.lane.b32.xlu0 %v8145_v25, %s7936_s8 }
  0xb7   :  { %882 = vrot.lane.b32.xlu1 %v8151_v26, %s7936_s8  ;;  %984 = vrot.lane.b32.xlu0 %v8138_v23, %s7937_s4 }
  0xbb   :  { %986 = vrot.lane.b32.xlu1 %v8143_v24, %s7937_s4  ;;  %988 = vrot.lane.b32.xlu0 %v8145_v25, %s7937_s4 }
  0xbf   :  { %990 = vrot.lane.b32.xlu1 %v8151_v26, %s7937_s4  ;;  %s9364_s4 = sld [smem:[#allocation24_spill]] }
  0xc5   :  { %v5890_v14 = vld [vmem:[%s9364_s4] ss:$0 sm:$0xff] }
 0x101   :  { %v139_v27 = vpop.permute.xlu0 %138 }
 0x102   :  { %6523 = vmatprep.mubr.msk.f32.mxu0 %vm146_vm7, %v139_v27 }
 0x105   :  { %v141_v31 = vpop.permute.xlu1 %140  ;;  %v143_v32 = vpop.permute.xlu0 %142 }
 0x106   :  { %6524 = vmatmul.mubr.msk.f32.vlgmr.msra.gmra.mrb[0].mxu0 %vm146_vm7, %v141_v31  ;;  %v5894_v31 = vld [vmem:[%s9327_s13 + $0x18] sm:$0xff] }
 0x107   :  { %6526 = vmatprep.mubr.msk.f32.mxu0 %vm146_vm7, %v143_v32  ;;  %7250 = vmatpush3.bf16.msra.mxu0 %v7247_v12  ;;  %v7938_v12 = vmov 0   ;;  %v7299_v32 = vpack.c.bf16 %v1270_v29, %v1269_v28 }
 0x108   :  { %7252 = vmatprep.subr.bf16.mxu0 %v7251_v30  ;;  %1659 = vst.msk [vmem:[#allocation10] sm:$0xff] %vm1101_vm8, %v7938_v12  ;;  %v5918_v12 = vld [vmem:[%s9330_s16 + $0x38] sm:$0xff] }
 0x109   :  { %v145_v33 = vpop.permute.xlu1 %144  ;;  %v337_v37 = vpop.permute.xlu0 %336 }
 0x10a   :  { %6527 = vmatmul.mubr.msk.f32.gmra.mrb[2].mxu0 %vm146_vm7, %v145_v33  ;;  %v1271_v33 = vld [vmem:[%s9328_s14 + $0x20] sm:$0xff] }
 0x10b   :  { %6533 = vmatprep.mubr.msk.f32.mxu0 %vm146_vm7, %v125_v15  ;;  %v7303_v35 = vpack.c.bf16 %v1272_v34, %v1271_v33 }
 0x10d   :  { %v339_v40 = vpop.permute.xlu1 %338  ;;  %v341_v42 = vpop.permute.xlu0 %340 }
 0x10e   :  { %6534 = vmatmul.mubr.msk.f32.vlgmr.msra.gmra.mrb[0].mxu0 %vm146_vm7, %v126_v17 }
 0x10f   :  { %6536 = vmatprep.mubr.msk.f32.mxu0 %vm146_vm7, %v127_v16  ;;  %7254 = vmatpush3.bf16.msra.mxu0 %v7251_v30  ;;  %v1100_v30 = vld [vmem:[%s9327_s13 + $0x8] sm:$0xff] }
 0x110   :  { %7256 = vmatprep.subr.bf16.mxu0 %v7255_v36 }
 0x111   :  { %v343_v43 = vpop.permute.xlu1 %342  ;;  %v553_v46 = vpop.permute.xlu0 %552 }
 0x112   :  { %6537 = vmatmul.mubr.msk.f32.gmra.mrb[2].mxu0 %vm146_vm7, %v128_v18 }
 0x113   :  { %6543 = vmatprep.mubr.msk.f32.mxu0 %vm146_vm7, %v337_v37  ;;  %v1274_v37 = vld [vmem:[%s9328_s14 + $0x38] sm:$0xff] }
 0x115   :  { %v555_v48 = vpop.permute.xlu1 %554  ;;  %v557_v51 = vpop.permute.xlu0 %556 }
 0x116   :  { %6544 = vmatmul.mubr.msk.f32.vlgmr.msra.gmra.mrb[0].mxu0 %vm146_vm7, %v339_v40  ;;  %v5900_v40 = vld [vmem:[%s9328_s14 + $0x48] sm:$0xff] }
 0x117   :  { %6546 = vmatprep.mubr.msk.f32.mxu0 %vm146_vm7, %v341_v42  ;;  %7258 = vmatpush3.bf16.msra.mxu0 %v7255_v36  ;;  %v1273_v36 = vld [vmem:[%s9328_s14 + $0x30] sm:$0xff] }
 0x118   :  { %7260 = vmatprep.subr.bf16.mxu0 %v7259_v41  ;;  %v7307_v38 = vpack.c.bf16 %v1274_v37, %v1273_v36  ;;  %v5901_v42 = vld [vmem:[%s9328_s14 + $0x50] sm:$0xff] }
 0x119   :  { %v559_v53 = vpop.permute.xlu1 %558  ;;  %v661_v54 = vpop.permute.xlu0 %660 }
 0x11a   :  { %6547 = vmatmul.mubr.msk.f32.gmra.mrb[2].mxu0 %vm146_vm7, %v343_v43  ;;  %v5902_v43 = vld [vmem:[%s9328_s14 + $0x58] sm:$0xff] }
 0x11b   :  { %6553 = vmatprep.mubr.msk.f32.mxu0 %vm146_vm7, %v8119_v19 }
 0x11d   :  { %v663_v57 = vpop.permute.xlu1 %662  ;;  %v665_v59 = vpop.permute.xlu0 %664 }
 0x11e   :  { %6554 = vmatmul.mubr.msk.f32.vlgmr.msra.gmra.mrb[0].mxu0 %vm146_vm7, %v8123_v20 }
 0x11f   :  { %6556 = vmatprep.mubr.msk.f32.mxu0 %vm146_vm7, %v8125_v21  ;;  %7262 = vmatpush3.bf16.msra.mxu0 %v7259_v41  ;;  %v7311_v41 = vpack.c.bf16 %v5900_v40, %v5899_v39 }
 0x120   :  { %7264 = vmatprep.subr.bf16.mxu0 %v7263_v47 }
 0x121   :  { %v667_v60 = vpop.permute.xlu1 %666  ;;  %v877_v63 = vpop.permute.xlu0 %876 }
 0x122   :  { %6557 = vmatmul.mubr.msk.f32.gmra.mrb[2].mxu0 %vm146_vm7, %v8131_v22 }
 0x123   :  { %6563 = vmatprep.mubr.msk.f32.mxu0 %vm146_vm7, %v553_v46 }
 0x125   :  { %v879_v1 = vpop.permute.xlu1 %878  ;;  %v881_v2 = vpop.permute.xlu0 %880 }
 0x126   :  { %6564 = vmatmul.mubr.msk.f32.vlgmr.msra.gmra.mrb[0].mxu0 %vm146_vm7, %v555_v48 }
 0x127   :  { %6566 = vmatprep.mubr.msk.f32.mxu0 %vm146_vm7, %v557_v51  ;;  %7266 = vmatpush3.bf16.msra.mxu0 %v7263_v47  ;;  %v7315_v47 = vpack.c.bf16 %v5902_v43, %v5901_v42  ;;  %v7319_v51 = vpack.c.bf16 %v5904_v50, %v5903_v49 }
 0x128   :  { %7268 = vmatprep.subr.bf16.mxu0 %v7267_v52 }
 0x129   :  { %v883_v3 = vpop.permute.xlu1 %882  ;;  %v985_v4 = vpop.permute.xlu0 %984 }
 0x12a   :  { %6567 = vmatmul.mubr.msk.f32.gmra.mrb[2].mxu0 %vm146_vm7, %v559_v53  ;;  %v5906_v53 = vld [vmem:[%s9328_s14 + $0x78] sm:$0xff] }
 0x12b   :  { %6573 = vmatprep.mubr.msk.f32.mxu0 %vm146_vm7, %v661_v54 }
 0x12d   :  { %v987_v5 = vpop.permute.xlu1 %986  ;;  %v989_v6 = vpop.permute.xlu0 %988 }
 0x12e   :  { %6574 = vmatmul.mubr.msk.f32.vlgmr.msra.gmra.mrb[0].mxu0 %vm146_vm7, %v663_v57 }
 0x12f   :  { %6576 = vmatprep.mubr.msk.f32.mxu0 %vm146_vm7, %v665_v59  ;;  %7270 = vmatpush3.bf16.msra.mxu0 %v7267_v52  ;;  %v5905_v52 = vld [vmem:[%s9328_s14 + $0x70] sm:$0xff] }
 0x130   :  { %7272 = vmatprep.subr.bf16.mxu0 %v7271_v58  ;;  %v7323_v54 = vpack.c.bf16 %v5906_v53, %v5905_v52 }
 0x131   :  { %v991_v7 = vpop.permute.xlu1 %990 }
 0x132   :  { %6577 = vmatmul.mubr.msk.f32.gmra.mrb[2].mxu0 %vm146_vm7, %v667_v60 }
 0x133   :  { %6583 = vmatprep.mubr.msk.f32.mxu0 %vm146_vm7, %v8138_v23  ;;  %v1267_v23 = vld [vmem:[%s9328_s14] sm:$0xff] }
 0x136   :  { %6584 = vmatmul.mubr.msk.f32.vlgmr.msra.gmra.mrb[0].mxu0 %vm146_vm7, %v8143_v24  ;;  %v1268_v24 = vld [vmem:[%s9328_s14 + $0x8] sm:$0xff] }
 0x137   :  { %6586 = vmatprep.mubr.msk.f32.mxu0 %vm146_vm7, %v8145_v25  ;;  %7274 = vmatpush3.bf16.msra.mxu0 %v7271_v58  ;;  %v7295_v27 = vpack.c.bf16 %v1268_v24, %v1267_v23  ;;  %v5917_v23 = vld [vmem:[%s9330_s16 + $0x30] sm:$0xff] }
 0x138   :  { %7276 = vmatprep.subr.bf16.mxu0 %v7275_v0 }
 0x13a   :  { %6587 = vmatmul.mubr.msk.f32.gmra.mrb[2].mxu0 %vm146_vm7, %v8151_v26 }
 0x13b   :  { %6593 = vmatprep.mubr.msk.f32.mxu0 %vm146_vm7, %v877_v63 }
 0x13e   :  { %6594 = vmatmul.mubr.msk.f32.vlgmr.msra.gmra.mrb[0].mxu0 %vm146_vm7, %v879_v1 }
 0x13f   :  { %6596 = vmatprep.mubr.msk.f32.mxu0 %vm146_vm7, %v881_v2  ;;  %7278 = vmatpush3.bf16.msra.mxu0 %v7275_v0 }
 0x142   :  { %6597 = vmatmul.mubr.msk.f32.gmra.mrb[2].mxu0 %vm146_vm7, %v883_v3 }
 0x143   :  { %6603 = vmatprep.mubr.msk.f32.mxu0 %vm146_vm7, %v985_v4 }
 0x146   :  { %6604 = vmatmul.mubr.msk.f32.vlgmr.msra.gmra.mrb[0].mxu0 %vm146_vm7, %v987_v5 }
 0x147   :  { %6606 = vmatprep.mubr.msk.f32.mxu0 %vm146_vm7, %v989_v6  ;;  %v1624_v6 = vld [vmem:[%s9330_s16 + $0x8] sm:$0xff] }
 0x14a   :  { %6607 = vmatmul.mubr.msk.f32.gmra.mrb[2].mxu0 %vm146_vm7, %v991_v7  ;;  %v5914_v7 = vld [vmem:[%s9330_s16 + $0x18] sm:$0xff] }
 0x14b   :  { %6617 = vmatprep.mubr.msk.f32.mxu0 %vm1101_vm8, %v1099_v8 }
 0x219   :  { %v6605_v15 = vpop.f32.mrb[0].mxu0 }
 0x21a   :  { %v1096_v16 = vadd.f32 %v6605_v15, %v5890_v14  ;;  %v1066_v17 = vpop.f32.mrb[1].mxu0  ;;  %v1623_v15 = vld [vmem:[%s9330_s16] sm:$0xff] }
 0x21b   :  { %v1095_v18 = vadd.f32 %v5890_v14, %v1066_v17 }
 0x21d   :  { %v7279_v19 = vpack.c.bf16 %v1096_v16, %v1095_v18  ;;  %v6608_v20 = vpop.f32.mrb[2].mxu0  ;;  %v5913_v16 = vld [vmem:[%s9330_s16 + $0x10] sm:$0xff] }
 0x21e   :  { %v1098_v21 = vadd.f32 %v6608_v20, %v5890_v14  ;;  %v1076_v22 = vpop.f32.mrb[3].mxu0 }
 0x21f   :  { %v1097_v25 = vadd.f32 %v5890_v14, %v1076_v22  ;;  %7280 = vmatprep.subr.bf16.mxu0 %v7279_v19  ;;  %7288 = vmatprep.subr.bf16.mxu1 %v7279_v19 }
 0x220   :  { %7282 = vmatpush3.bf16.msra.mxu0 %v7279_v19  ;;  %7290 = vmatpush3.bf16.msra.mxu1 %v7279_v19 }
 0x221   :  { %v7283_v26 = vpack.c.bf16 %v1098_v21, %v1097_v25  ;;  %v5915_v21 = vld [vmem:[%s9330_s16 + $0x20] sm:$0xff] }
 0x223   :  { %7284 = vmatprep.subr.bf16.mxu0 %v7283_v26  ;;  %7292 = vmatprep.subr.bf16.mxu1 %v7283_v26 }
 0x224   :  { %7286 = vmatpush3.bf16.msra.mxu0 %v7283_v26  ;;  %7294 = vmatpush3.bf16.msra.mxu1 %v7283_v26 }
 0x225   :  { %7296 = vmatprep.subr.bf16.mxu1 %v7295_v27 }
 0x227   :  { %6618 = vmatmul.mubr.msk.f32.vlgmr.msra.gmra.mrb[4].mxu0 %vm1101_vm8, %v1100_v30  ;;  %6629 = vmatmul.mubr.msk.f32.vlgmr.msra.gmra.mrb[0].mxu1 %vm1101_vm8, %v5894_v31 }
 0x228   :  { %7298 = vmatpush3.bf16.msra.mxu1 %v7295_v27 }
 0x229   :  { %7300 = vmatprep.subr.bf16.mxu1 %v7299_v32 }
 0x22c   :  { %7302 = vmatpush3.bf16.msra.mxu1 %v7299_v32 }
 0x22d   :  { %7304 = vmatprep.subr.bf16.mxu1 %v7303_v35 }
 0x230   :  { %7306 = vmatpush3.bf16.msra.mxu1 %v7303_v35 }
 0x231   :  { %7308 = vmatprep.subr.bf16.mxu1 %v7307_v38 }
 0x234   :  { %7310 = vmatpush3.bf16.msra.mxu1 %v7307_v38 }
 0x235   :  { %7312 = vmatprep.subr.bf16.mxu1 %v7311_v41 }
 0x2fa   :  { %v6619_v44 = vpop.f32.mrb[4].mxu0  ;;  %v6630_v45 = vpop.f32.mrb[0].mxu1 }
 0x2fb   :  { %v1174_v46 = vpop.f32.mrb[5].mxu0  ;;  %v1258_v48 = vpop.f32.mrb[1].mxu1 }
 0x2fc   :  { %6647 = vmatprep.mubr.msk.f32.mxu1 %vm9348_vm9, %v1174_v46 }
 0x2fd   :  { %6648 = vmatmul.mubr.msk.f32.vlgmr.msra.gmra.mrb[2].mxu1 %vm9348_vm9, %v6619_v44 }
 0x2fe   :  { %7314 = vmatpush3.bf16.msra.mxu1 %v7311_v41  ;;  %6666 = vmatprep.mubr.msk.f32.mxu1 %vm9348_vm9, %v1174_v46 }
 0x2ff   :  { %7316 = vmatprep.subr.bf16.mxu1 %v7315_v47 }
 0x302   :  { %7318 = vmatpush3.bf16.msra.mxu1 %v7315_v47 }
 0x303   :  { %7320 = vmatprep.subr.bf16.mxu1 %v7319_v51 }
 0x306   :  { %7322 = vmatpush3.bf16.msra.mxu1 %v7319_v51 }
 0x307   :  { %7324 = vmatprep.subr.bf16.mxu1 %v7323_v54 }
 0x30a   :  { %7326 = vmatpush3.bf16.msra.mxu1 %v7323_v54 }
 0x30b   :  { %7328 = vmatprep.subr.bf16.mxu1 %v7295_v27 }
 0x30d   :  { %6667 = vmatmul.mubr.msk.f32.vlgmr.msra.gmra.mrb[4].mxu1 %vm9348_vm9, %v6619_v44 }
 0x30e   :  { %7330 = vmatpush3.bf16.msra.mxu1 %v7295_v27  ;;  %6685 = vmatprep.mubr.msk.f32.mxu1 %vm9348_vm9, %v1258_v48 }
 0x30f   :  { %7332 = vmatprep.subr.bf16.mxu1 %v7299_v32 }
 0x312   :  { %7334 = vmatpush3.bf16.msra.mxu1 %v7299_v32 }
 0x313   :  { %7336 = vmatprep.subr.bf16.mxu1 %v7303_v35 }
 0x316   :  { %7338 = vmatpush3.bf16.msra.mxu1 %v7303_v35 }
 0x317   :  { %7340 = vmatprep.subr.bf16.mxu1 %v7307_v38 }
 0x31a   :  { %7342 = vmatpush3.bf16.msra.mxu1 %v7307_v38 }
 0x31b   :  { %7344 = vmatprep.subr.bf16.mxu1 %v7311_v41 }
 0x31d   :  { %6686 = vmatmul.mubr.msk.f32.vlgmr.msra.gmra.mrb[6].mxu1 %vm9348_vm9, %v6630_v45 }
 0x31e   :  { %7346 = vmatpush3.bf16.msra.mxu1 %v7311_v41  ;;  %6704 = vmatprep.mubr.msk.f32.mxu1 %vm9348_vm9, %v1258_v48 }
 0x31f   :  { %7348 = vmatprep.subr.bf16.mxu1 %v7315_v47 }
 0x322   :  { %7350 = vmatpush3.bf16.msra.mxu1 %v7315_v47 }
 0x323   :  { %7352 = vmatprep.subr.bf16.mxu1 %v7319_v51 }
 0x326   :  { %7354 = vmatpush3.bf16.msra.mxu1 %v7319_v51 }
 0x327   :  { %7356 = vmatprep.subr.bf16.mxu1 %v7323_v54 }
 0x32a   :  { %7358 = vmatpush3.bf16.msra.mxu1 %v7323_v54 }
 0x32d   :  { %6705 = vmatmul.mubr.msk.f32.vlgmr.msra.gmra.mrb[8].mxu1 %vm9348_vm9, %v6630_v45 }
 0x3d0   :  { %v6649_v56 = vpop.f32.mrb[2].mxu1 }
 0x3d1   :  { %v1348_v57 = vpop.f32.mrb[3].mxu1 }
 0x3e0   :  { %v6668_v58 = vpop.f32.mrb[4].mxu1 }
 0x3e1   :  { %v1598_v59 = vmax.f32 %v6649_v56, %v6668_v58  ;;  %v1432_v60 = vpop.f32.mrb[5].mxu1 }
 0x3e2   :  { %v1597_v61 = vmax.f32 %v1348_v57, %v1432_v60 }
 0x3f0   :  { %v6687_v62 = vpop.f32.mrb[6].mxu1 }
 0x3f1   :  { %v1513_v63 = vpop.f32.mrb[7].mxu1 }
 0x400   :  { %v6706_v0 = vpop.f32.mrb[8].mxu1 }
 0x401   :  { %v1600_v1 = vmax.f32 %v6687_v62, %v6706_v0  ;;  %v1588_v2 = vpop.f32.mrb[9].mxu1 }
 0x402   :  { %v1599_v3 = vmax.f32 %v1513_v63, %v1588_v2 }
 0x403   :  { %v8337_v4 = vmax.f32 %v1598_v59, %v1600_v1 }
 0x404   :  { %v8339_v5 = vmax.f32 %v1597_v61, %v1599_v3 }
 0x405   :  { %vm1604_vm11 = vcmp.eq.f32.partialorder %v6649_v56, %v8337_v4  ;;  %vm1608_vm12 = vcmp.eq.f32.partialorder %v6668_v58, %v8337_v4  ;;  %vm1616_vm13 = vcmp.eq.f32.partialorder %v6687_v62, %v8337_v4 }
 0x406   :  { %vm1606_vm15 = vmxor %vm1604_vm11, %vm7939_vm14  ;;  %vm1603_vm0 = vcmp.eq.f32.partialorder %v1348_v57, %v8339_v5  ;;  %vm1607_vm1 = vcmp.eq.f32.partialorder %v1432_v60, %v8339_v5  ;;  %vm1615_vm2 = vcmp.eq.f32.partialorder %v1513_v63, %v8339_v5  ;;  %v1626_v8 = vsel %vm1604_vm11, %v1624_v6, 0 }
 0x407   :  { %vm1610_vm3 = vmand %vm1606_vm15, %vm1608_vm12  ;;  %v1625_v19 = vsel %vm1603_vm0, %v1623_v15, 0 }
 0x408   :  { %vm1612_vm4 = vmor %vm1604_vm11, %vm1610_vm3  ;;  %v1631_v9 = vsel %vm1610_vm3, %v5914_v7, 0 }
 0x409   :  { %vm1614_vm5 = vmxor %vm1612_vm4, %vm7939_vm14  ;;  %v1633_v11 = vadd.s32 %v1631_v9, %v1626_v8 }
 0x40a   :  { %vm1618_vm6 = vmand %vm1614_vm5, %vm1616_vm13 }
 0x40b   :  { %vm1620_vm9 = vmor %vm1612_vm4, %vm1618_vm6  ;;  %v1638_v13 = vsel %vm1618_vm6, %v5916_v10, 0 }
 0x40c   :  { %vm1622_vm12 = vmxor %vm1620_vm9, %vm7939_vm14  ;;  %v1640_v14 = vadd.s32 %v1638_v13, %v1633_v11 }
 0x40d   :  { %v1645_v17 = vsel %vm1622_vm12, %v5918_v12, 0  ;;  %vm1605_vm11 = vmxor %vm1603_vm0, %vm7939_vm14 }
 0x40e   :  { %v1647_v18 = vadd.s32 %v1645_v17, %v1640_v14  ;;  %vm1609_vm13 = vmand %vm1605_vm11, %vm1607_vm1 }
 0x40f   :  { %vm1611_vm9 = vmor %vm1603_vm0, %vm1609_vm13  ;;  %v1630_v20 = vsel %vm1609_vm13, %v5913_v16, 0 }
 0x410   :  { %1649 = vst.msk [vmem:[#allocation12 + $0x8] sm:$0xff] %vm1101_vm8, %v1647_v18  ;;  %vm1613_vm15 = vmxor %vm1611_vm9, %vm7939_vm14  ;;  %v1632_v22 = vadd.s32 %v1630_v20, %v1625_v19 }
 0x411   :  { %vm1617_vm3 = vmand %vm1613_vm15, %vm1615_vm2 }
 0x412   :  { %vm1619_vm1 = vmor %vm1611_vm9, %vm1617_vm3  ;;  %v1637_v24 = vsel %vm1617_vm3, %v5915_v21, 0 }
 0x413   :  { %vm1621_vm0 = vmxor %vm1619_vm1, %vm7939_vm14  ;;  %v1639_v25 = vadd.s32 %v1637_v24, %v1632_v22 }
 0x414   :  { %v1644_v26 = vsel %vm1621_vm0, %v5917_v23, 0 }
 0x415   :  { %v1646_v27 = vadd.s32 %v1644_v26, %v1639_v25 }
 0x417   :  { %1648 = vst.msk [vmem:[#allocation12] sm:$0xff] %vm1101_vm8, %v1646_v27 }
 0x418 LB: > { %v1668_v28 = vld [vmem:[#allocation9] sm:$0xff]  ;;  %v8396_v29 = vld [vmem:[#allocation7] sm:$0xff]  ;;  %v7940_v30 = vmov 0.0   ;;  %vm1679_vm14 = vcmask 64512   ;;  %s7941_s6 = smov 4   ;;  %vm7942_vm2 = vmmov 0   ;;  %s7932_s2 = sphi %s8391_s2, %s1665_s2  }
 0x419   : > { %6707 = vmatprep.subr.mxu1 %v7940_v30  ;;  %6723 = vmatprep.subr.mxu0 %v7940_v30  ;;  %v1678_v31 = vld [vmem:[%s9331_s17] sm:$0x3]  ;;  %v5922_v32 = vld [vmem:[%s9331_s17 + $0x2] sm:$0x3]  ;;  %v5929_v34 = vld [vmem:[%s9331_s17 + $0x4] sm:$0x3] }
 0x41a   : > { %2924 = vrot.lane.b32.xlu0 %v1668_v28, %s7941_s6  ;;  %6708 = vmatpush3.msra.mxu1 %v8396_v29  ;;  %v1669_v33 = vld [vmem:[#allocation9 + $0x8] sm:$0xff]  ;;  %vm2305_vm4 = vcmask 1041408   ;;  %v7943_v37 = vmov 0.0|0.0   ;;  %vm7944_vm5 = vmmov 1   ;;  %v5945_v41 = vld [vmem:[%s9335_s21 + $0x10] sm:$0xff]  ;;  %vm2301_vm12 = vcmask 80896  }
 0x41b   : > { %6709 = vmatprep.mubr.msk.f32.mxu1 %vm7942_vm2, %v7940_v30  ;;  %6724 = vmatpush3.msra.mxu0 %v8396_v29  ;;  %v2299_v35 = vld [vmem:[%s9335_s21] sm:$0xff]  ;;  %v2300_v36 = vld [vmem:[%s9335_s21 + $0x8] sm:$0x3]  ;;  %vm8441_vm6 = vmpackc.low %vm2305_vm4, %vm7944_vm5  ;;  %vm2930_vm11 = vcmask 293920   ;;  %s7945_s8 = smov 120   ;;  %s7946_s4 = smov 124  }
 0x41c   : > { %6725 = vmatprep.mubr.msk.f32.mxu0 %vm7942_vm2, %v7940_v30  ;;  %6710 = vmatmul.mubr.msk.f32.vlgmr.msra.gmra.mrb[0].mxu1 %vm1679_vm14, %v1678_v31  ;;  %v5936_v38 = vld [vmem:[%s9331_s17 + $0x6] sm:$0x3]  ;;  %v7384_v39 = vpack.c.bf16 %v2300_v36, %v2299_v35  ;;  %v5946_v42 = vld [vmem:[%s9335_s21 + $0x18] sm:$0x3]  ;;  %v8456_v43 = vld [vmem:[#allocation5] sm:$0x3] }
 0x41d   : > { %6726 = vmatmul.mubr.msk.f32.vlgmr.msra.gmra.mrb[0].mxu0 %vm1679_vm14, %v5922_v32  ;;  %6739 = vmatprep.subr.mxu0 %v7940_v30  ;;  %v7388_v44 = vpack.c.bf16 %v5946_v42, %v5945_v41  ;;  %v1753_v45 = vld [vmem:[%s9333_s19] sm:$0xff]  ;;  %v1754_v46 = vld [vmem:[%s9333_s19 + $0x8] sm:$0xff]  ;;  %v1755_v47 = vld [vmem:[%s9333_s19 + $0x10] sm:$0xff]  ;;  %vm2458_vm13 = vcmask 15360   ;;  %s9368_s30 = sld [smem:[#allocation20_spill]]  ;;  %s9369_s1 = sld [smem:[#allocation21_spill]] }
 0x41e   : > { %2926 = vrot.lane.b32.xlu0 %v1669_v33, %s7941_s6  ;;  %6740 = vmatpush3.msra.mxu0 %v8396_v29  ;;  %v7360_v48 = vpack.c.bf16 %v1754_v46, %v1753_v45  ;;  %v1756_v49 = vld [vmem:[%s9333_s19 + $0x18] sm:$0xff]  ;;  %v5924_v59 = vld [vmem:[%s9333_s19 + $0x20] sm:$0xff]  ;;  %v5925_v60 = vld [vmem:[%s9333_s19 + $0x28] sm:$0xff]  ;;  %s9370_s7 = sld [smem:[#allocation25_spill]]  ;;  %s9371_s0 = sld [smem:[#allocation26_spill]]  ;;  %vm9372_vm9 = vcmask 523264  }
 0x41f   : > { %6741 = vmatprep.mubr.msk.f32.mxu0 %vm7942_vm2, %v7940_v30  ;;  %6755 = vmatprep.subr.mxu0 %v7940_v30  ;;  %v7363_v50 = vpack.c.bf16 %v1756_v49, %v1755_v47  ;;  %v7366_v61 = vpack.c.bf16 %v5925_v60, %v5924_v59  ;;  %v5926_v62 = vld [vmem:[%s9333_s19 + $0x30] sm:$0xff]  ;;  %v5927_v63 = vld [vmem:[%s9333_s19 + $0x38] sm:$0xff]  ;;  %v5931_v7 = vld [vmem:[%s9333_s19 + $0x40] sm:$0xff]  ;;  %s9380_s13 = sld [smem:[#allocation22_spill]]  ;;  %s7948_s27 = smov 112  }
 0x420   : > { %7359 = vmatprep.subr.bf16.mxu1 %v7943_v37  ;;  %6720 = vmatprep.mubr.msk.f32.mxu1 %vm7942_vm2, %v7940_v30  ;;  %v7369_v6 = vpack.c.bf16 %v5927_v63, %v5926_v62  ;;  %v5932_v8 = vld [vmem:[%s9333_s19 + $0x48] sm:$0xff]  ;;  %v5933_v12 = vld [vmem:[%s9333_s19 + $0x50] sm:$0xff]  ;;  %v5934_v13 = vld [vmem:[%s9333_s19 + $0x58] sm:$0xff]  ;;  %s1665_s2 = sadd.s32 1, %s7932_s2  }
 0x421   : > { %6742 = vmatmul.mubr.msk.f32.vlgmr.msra.gmra.mrb[2].mxu0 %vm1679_vm14, %v5929_v34  ;;  %7361 = vmatpush3.bf16.msra.mxu1 %v7360_v48  ;;  %v7372_v11 = vpack.c.bf16 %v5932_v8, %v5931_v7  ;;  %v7375_v16 = vpack.c.bf16 %v5934_v13, %v5933_v12  ;;  %v5938_v17 = vld [vmem:[%s9333_s19 + $0x60] sm:$0xff]  ;;  %v5939_v18 = vld [vmem:[%s9333_s19 + $0x68] sm:$0xff]  ;;  %v5940_v22 = vld [vmem:[%s9333_s19 + $0x70] sm:$0xff]  ;;  %p1662_p0 = scmp.ge.s32.totalorder %s1665_s2, 4  }
 0x422   : > { %6756 = vmatpush3.msra.mxu0 %v8396_v29  ;;  %6757 = vmatprep.mubr.msk.f32.mxu0 %vm7942_vm2, %v7940_v30  ;;  %v7378_v21 = vpack.c.bf16 %v5939_v18, %v5938_v17  ;;  %v5941_v23 = vld [vmem:[%s9333_s19 + $0x78] sm:$0xff]  ;;  %v5949_v24 = vld [vmem:[%s9332_s18 + $0x8] sm:$0xff]  ;;  %v5954_v26 = vld [vmem:[%s9335_s21 + $0x20] sm:$0xff]  ;;  %s7949_s14 = smov (%p1662_p0), [#allocation7]   ;;  %s7950_s5 = smov (%p1662_p0), [#allocation10]  }
 0x423   : > { %7383 = vmatprep.subr.bf16.mxu0 %v7943_v37  ;;  %7362 = vmatprep.subr.bf16.mxu1 %v7943_v37  ;;  %v5955_v27 = vld [vmem:[%s9335_s21 + $0x28] sm:$0x3]  ;;  %v7381_v31 = vpack.c.bf16 %v5941_v23, %v5940_v22  ;;  %v2379_v32 = vld [vmem:[%s9332_s18] sm:$0xff]  ;;  %v5961_v34 = vld [vmem:[%s9335_s21 + $0x30] sm:$0xff]  ;;  %s5777_s16 = sshll.u32 (%p1662_p0), %s7949_s14, 4  ;;  %s5799_s6 = sshll.u32 (%p1662_p0), %s7950_s5, 4  ;;  %s5778_s16 = int_to_ptr.vmem [resolvable:$true] %s5777_s16  ;;  %s5800_s6 = int_to_ptr.vmem [resolvable:$true] %s5799_s6 }
 0x424   : > { %v7392_v33 = vpack.c.bf16 %v5955_v27, %v5954_v26  ;;  %v5962_v35 = vld [vmem:[%s9335_s21 + $0x38] sm:$0x3]  ;;  %v5968_v36 = vld [vmem:[%s9368_s30 + $0x20] sm:$0xff]  ;;  %v5970_v42 = vld [vmem:[%s9368_s30 + $0x30] sm:$0xff]  ;;  %p7815_p2 = scmp.lt.s32.totalorder (%p1662_p0), %s5778_s16, %s5778_s16 }
 0x425   : > { %6758 = vmatmul.mubr.msk.f32.vlgmr.msra.gmra.mrb[4].mxu0 %vm1679_vm14, %v5936_v38  ;;  %7364 = vmatpush3.bf16.msra.mxu1 %v7363_v50  ;;  %v5969_v38 = vld [vmem:[%s9368_s30 + $0x28] sm:$0xff]  ;;  %v2935_v46 = vld [vmem:[%s9368_s30] sm:$0xff]  ;;  %v2937_v49 = vld [vmem:[%s9368_s30 + $0x10] sm:$0xff] }
 0x426   : > { %7386 = vmatpush3.bf16.msk.msra.mxu0 %vm8441_vm6, %v7384_v39  ;;  %6775 = vmatprep.mubr.msk.f32.mxu0 %vm7942_vm2, %v7940_v30  ;;  %v7396_v39 = vpack.c.bf16 %v5962_v35, %v5961_v34  ;;  %v7399_v41 = vpack.c.bf16 %v5969_v38, %v5968_v36  ;;  %v2936_v47 = vld [vmem:[%s9368_s30 + $0x8] sm:$0xff]  ;;  %v2938_v50 = vld [vmem:[%s9368_s30 + $0x18] sm:$0xff]  ;;  %v5976_v59 = vld [vmem:[%s9368_s30 + $0x40] sm:$0xff] }
 0x427   : > { %7387 = vmatprep.subr.bf16.mxu0 %v7943_v37  ;;  %7365 = vmatprep.subr.bf16.mxu1 %v7943_v37  ;;  %v7407_v40 = vpack.c.bf16 %v2936_v47, %v2935_v46  ;;  %v5977_v60 = vld [vmem:[%s9368_s30 + $0x48] sm:$0xff]  ;;  %v5978_v62 = vld [vmem:[%s9368_s30 + $0x50] sm:$0xff]  ;;  %v5979_v63 = vld [vmem:[%s9368_s30 + $0x58] sm:$0xff] }
 0x428   : > { %v5985_v7 = vld [vmem:[%s9368_s30 + $0x78] sm:$0xff]  ;;  %v5990_v12 = vld [vmem:[%s9368_s30 + $0x90] sm:$0xff]  ;;  %v6001_v22 = vld [vmem:[%s9368_s30 + $0xc8] sm:$0xff] }
 0x429   : > { %6776 = vmatmul.mubr.msk.f32.vlgmr.msra.gmra.mrb[6].mxu0 %vm2301_vm12, %v8456_v43  ;;  %v5991_v13 = vld [vmem:[%s9368_s30 + $0x98] sm:$0xff]  ;;  %v5996_v18 = vld [vmem:[%s9368_s30 + $0xb0] sm:$0xff]  ;;  %v6012_v38 = vld [vmem:[%s9368_s30 + $0x100] sm:$0xff] }
 0x42a   : > { %7390 = vmatpush3.bf16.msk.msra.mxu0 %vm8441_vm6, %v7388_v44  ;;  %6782 = vmatprep.mubr.msk.f32.mxu0 %vm7942_vm2, %v7940_v30  ;;  %v5971_v44 = vld [vmem:[%s9368_s30 + $0x38] sm:$0xff]  ;;  %v6008_v34 = vld [vmem:[%s9368_s30 + $0xf0] sm:$0xff]  ;;  %vm9373_vm15 = vmmov %vm9372_vm9 }
 0x42b   : > { %6785 = vmatprep.subr.mxu0 %v7940_v30  ;;  %v7403_v45 = vpack.c.bf16 %v5971_v44, %v5970_v42  ;;  %v6003_v26 = vld [vmem:[%s9368_s30 + $0xd8] sm:$0xff]  ;;  %v6014_v42 = vld [vmem:[%s9368_s30 + $0x110] sm:$0xff]  ;;  %vm9374_vm3 = vmmov %vm9372_vm9 }
 0x42c   : > { %v6009_v35 = vld [vmem:[%s9368_s30 + $0xf8] sm:$0xff]  ;;  %vm9375_vm1 = vmmov %vm9374_vm3 }
 0x42d   : > { %6783 = vmatmul.mubr.msk.f32.vlgmr.msra.gmra.mrb[8].mxu0 %vm2301_vm12, %v8456_v43  ;;  %v7459_v36 = vpack.c.bf16 %v6009_v35, %v6008_v34  ;;  %v6015_v44 = vld [vmem:[%s9368_s30 + $0x118] sm:$0xff]  ;;  %v6023_v35 = vld [vmem:[%s9371_s0 + $0x40] sm:$0xff] }
 0x42e   : > { %6787 = vmatprep.mubr.msk.f32.mxu0 %vm7942_vm2, %v7940_v30 }
 0x48c   : > { %v2925_v51 = vpop.permute.xlu0 %2924 }
 0x48d   : > { %2931 = vst.msk [vmem:[#allocation2 + $0x1] sm:$0xff] %vm2930_vm11, %v2925_v51  ;;  %v7411_v51 = vpack.c.bf16 %v2938_v50, %v2937_v49  ;;  %v5919_v50 = vld [vmem:[%s9334_s20] ss:$0 sm:$0xff] }
 0x490   : > { %v2927_v52 = vpop.permute.xlu0 %2926 }
 0x491   : > { %2932 = vst.msk [vmem:[#allocation2 + $0x11] sm:$0xff] %vm2930_vm11, %v2927_v52 }
 0x494   : > { %v8484_v53 = vld [vmem:[#allocation2] sm:$0xff] }
 0x495   : > { %3113 = vrot.lane.b32.xlu0 %v8484_v53, %s7945_s8  ;;  %2946 = vrot.lane.b32.xlu1 %v8484_v53, %s7946_s4  ;;  %v8489_v54 = vld [vmem:[#allocation2 + $0x1] sm:$0xff] }
 0x496   : > { %v8501_v57 = vld [vmem:[#allocation2 + $0x2] sm:$0xff] }
 0x498   : > { %v8491_v55 = vld [vmem:[#allocation2 + $0x10] sm:$0xff] }
 0x499   : > { %3293 = vrot.lane.b32.xlu0 %v8489_v54, %s7946_s4  ;;  %2948 = vrot.lane.b32.xlu1 %v8491_v55, %s7946_s4  ;;  %v8499_v56 = vld [vmem:[#allocation2 + $0x11] sm:$0xff] }
 0x49a   : > { %v8509_v58 = vld [vmem:[#allocation2 + $0x12] sm:$0xff] }
 0x49d   : > { %3383 = vrot.lane.b32.xlu0 %v8489_v54, %s7945_s8  ;;  %3115 = vrot.lane.b32.xlu1 %v8491_v55, %s7945_s8 }
 0x4a1   : > { %3563 = vrot.lane.b32.xlu0 %v8501_v57, %s7946_s4  ;;  %3295 = vrot.lane.b32.xlu1 %v8499_v56, %s7946_s4 }
 0x4a5   : > { %3653 = vrot.lane.b32.xlu0 %v8501_v57, %s7945_s8  ;;  %3385 = vrot.lane.b32.xlu1 %v8499_v56, %s7945_s8 }
 0x4a9   : > { %3565 = vrot.lane.b32.xlu1 %v8509_v58, %s7946_s4  ;;  %s7947_s4 = smov 8  }
 0x4ad   : > { %3655 = vrot.lane.b32.xlu1 %v8509_v58, %s7945_s8 }
 0x4ef   : > { %v1749_v0 = vpop.f32.mrb[0].mxu1 }
 0x4f0   : > { %v1902_v1 = vpop.f32.mrb[0].mxu0  ;;  %6721 = vmatmul.mubr.msk.f32.vlgmr.msra.gmra.mrb[2].mxu1 %vm1101_vm8, %v1749_v0  ;;  %v6711_v2 = vpop.f32.mrb[1].mxu1  ;;  %v7419_v0 = vpack.c.bf16 %v5979_v63, %v5978_v62  ;;  %v5958_v62 = vld [vmem:[%s9332_s18 + $0x10] sm:$0xff] }
 0x4f1   : > { %v6727_v3 = vpop.f32.mrb[1].mxu0  ;;  %7367 = vmatpush3.bf16.msra.mxu1 %v7366_v61  ;;  %6736 = vmatprep.mubr.msk.f32.mxu1 %vm7942_vm2, %v7940_v30  ;;  %v7415_v61 = vpack.c.bf16 %v5977_v60, %v5976_v59 }
 0x4f2   : > { %7368 = vmatprep.subr.bf16.mxu1 %v7943_v37 }
 0x4f4   : > { %v2056_v9 = vpop.f32.mrb[2].mxu0 }
 0x4f5   : > { %v6743_v10 = vpop.f32.mrb[3].mxu0  ;;  %7370 = vmatpush3.bf16.msra.mxu1 %v7369_v6  ;;  %v5984_v6 = vld [vmem:[%s9368_s30 + $0x70] sm:$0xff] }
 0x4f6   : > { %7371 = vmatprep.subr.bf16.mxu1 %v7943_v37  ;;  %v7427_v8 = vpack.c.bf16 %v5985_v7, %v5984_v6  ;;  %v5989_v10 = vld [vmem:[%s9368_s30 + $0x88] sm:$0xff] }
 0x4f8   : > { %v2210_v14 = vpop.f32.mrb[4].mxu0  ;;  %6737 = vmatmul.mubr.msk.f32.vlgmr.msra.gmra.mrb[2].mxu1 %vm1101_vm8, %v1902_v1  ;;  %v5982_v1 = vld [vmem:[%s9368_s30 + $0x60] sm:$0xff] }
 0x4f9   : > { %v6759_v15 = vpop.f32.mrb[5].mxu0  ;;  %7373 = vmatpush3.bf16.msra.mxu1 %v7372_v11  ;;  %6752 = vmatprep.mubr.msk.f32.mxu1 %vm7942_vm2, %v7940_v30 }
 0x4fa   : > { %7374 = vmatprep.subr.bf16.mxu1 %v7943_v37  ;;  %v5994_v15 = vld [vmem:[%s9368_s30 + $0xa0] sm:$0xff] }
 0x4fc   : > { %v2375_v19 = vpop.f32.mrb[6].mxu0 }
 0x4fd   : > { %v6777_v20 = vpop.f32.mrb[7].mxu0  ;;  %7376 = vmatpush3.bf16.msra.mxu1 %v7375_v16 }
 0x4fe   : > { %7377 = vmatprep.subr.bf16.mxu1 %v7943_v37 }
 0x500   : > { %v2452_v25 = vpop.f32.mrb[8].mxu0  ;;  %6753 = vmatmul.mubr.msk.f32.vlgmr.msra.gmra.mrb[2].mxu1 %vm1101_vm8, %v2056_v9 }
 0x501   : > { %v6784_v28 = vpop.f32.mrb[9].mxu0  ;;  %6786 = vmatpush3.msk.msra.mxu0 %vm2305_vm4, %v2452_v25  ;;  %7379 = vmatpush3.bf16.msra.mxu1 %v7378_v21  ;;  %v6002_v25 = vld [vmem:[%s9368_s30 + $0xd0] sm:$0xff] }
 0x502   : > { %6788 = vmatmul.mubr.msk.f32.vlgmr.msra.gmra.mrb[10].mxu0 %vm2458_vm13, %v5949_v24  ;;  %6790 = vmatprep.subr.mxu0 %v7940_v30  ;;  %v7451_v27 = vpack.c.bf16 %v6003_v26, %v6002_v25  ;;  %v3902_v25 = vld [vmem:[%s9371_s0 + $0x38] sm:$0xff] }
 0x503   : > { %6791 = vmatpush3.msk.msra.mxu0 %vm2305_vm4, %v2375_v19  ;;  %7380 = vmatprep.subr.bf16.mxu1 %v7943_v37  ;;  %v5997_v19 = vld [vmem:[%s9368_s30 + $0xb8] sm:$0xff] }
 0x504   : > { %6792 = vmatprep.mubr.msk.f32.mxu0 %vm7942_vm2, %v7940_v30  ;;  %7391 = vmatprep.subr.bf16.mxu0 %v7943_v37  ;;  %v7443_v20 = vpack.c.bf16 %v5997_v19, %v5996_v18  ;;  %v3897_v18 = vld [vmem:[%s9371_s0 + $0x10] sm:$0xff] }
 0x505   : > { %7382 = vmatpush3.bf16.msra.mxu1 %v7381_v31  ;;  %6768 = vmatprep.mubr.msk.f32.mxu1 %vm7942_vm2, %v7940_v30  ;;  %v6006_v31 = vld [vmem:[%s9368_s30 + $0xe0] sm:$0xff] }
 0x506   : > { %6793 = vmatmul.mubr.msk.f32.vlgmr.msra.gmra.mrb[12].mxu0 %vm2458_vm13, %v2379_v32  ;;  %6802 = vmatprep.subr.mxu1 %v7940_v30  ;;  %v6007_v32 = vld [vmem:[%s9368_s30 + $0xe8] sm:$0xff] }
 0x507   : > { %7394 = vmatpush3.bf16.msk.msra.mxu0 %vm8441_vm6, %v7392_v33  ;;  %6799 = vmatprep.mubr.msk.f32.mxu0 %vm7942_vm2, %v7940_v30  ;;  %v2947_v48 = vpop.permute.xlu1 %2946  ;;  %v3114_v2 = vpop.permute.xlu0 %3113  ;;  %v7455_v33 = vpack.c.bf16 %v6007_v32, %v6006_v31 }
 0x508   : > { %6769 = vmatmul.mubr.msk.f32.vlgmr.msra.gmra.mrb[2].mxu1 %vm1101_vm8, %v2210_v14  ;;  %7395 = vmatprep.subr.bf16.mxu0 %v7943_v37  ;;  %v7435_v14 = vpack.c.bf16 %v5991_v13, %v5990_v12 }
 0x509   : > { %6804 = vmatprep.mubr.msk.f32.mxu1 %vm7942_vm2, %v7940_v30 }
 0x50a   : > { %6800 = vmatmul.mubr.msk.f32.vlgmr.msra.gmra.mrb[14].mxu0 %vm2301_vm12, %v8456_v43 }
 0x50b   : > { %7398 = vmatpush3.bf16.msk.msra.mxu0 %vm8441_vm6, %v7396_v39  ;;  %6811 = vmatprep.mubr.msk.f32.mxu0 %vm7942_vm2, %v7940_v30  ;;  %v2949_v52 = vpop.permute.xlu1 %2948  ;;  %v3294_v16 = vpop.permute.xlu0 %3293 }
 0x50c   : > { %7400 = vmatprep.subr.bf16.mxu0 %v7399_v41 }
 0x50e   : > { %6812 = vmatmul.mubr.msk.f32.vlgmr.msra.gmra.mrb[16].mxu0 %vm2301_vm12, %v8456_v43 }
 0x50f   : > { %7402 = vmatpush3.bf16.msra.mxu0 %v7399_v41  ;;  %6827 = vmatprep.mubr.msk.f32.mxu0 %vm1101_vm8, %v2947_v48  ;;  %v3116_v9 = vpop.permute.xlu1 %3115  ;;  %v3384_v23 = vpop.permute.xlu0 %3383 }
 0x510   : > { %7404 = vmatprep.subr.bf16.mxu0 %v7403_v45 }
 0x513   : > { %7406 = vmatpush3.bf16.msra.mxu0 %v7403_v45  ;;  %v3296_v21 = vpop.permute.xlu1 %3295  ;;  %v3564_v39 = vpop.permute.xlu0 %3563  ;;  %v7467_v45 = vpack.c.bf16 %v6015_v44, %v6014_v42 }
 0x514   : > { %7408 = vmatprep.subr.bf16.mxu0 %v7407_v40 }
 0x516   : > { %6828 = vmatmul.mubr.msk.f32.vlgmr.msra.gmra.mrb[18].mxu0 %vm1101_vm8, %v2949_v52 }
 0x517   : > { %7410 = vmatpush3.bf16.msra.mxu0 %v7407_v40  ;;  %6838 = vmatprep.mubr.msk.f32.mxu0 %vm1101_vm8, %v8484_v53  ;;  %v5983_v53 = vld [vmem:[%s9368_s30 + $0x68] sm:$0xff]  ;;  %v3386_v28 = vpop.permute.xlu1 %3385  ;;  %v3654_v47 = vpop.permute.xlu0 %3653 }
 0x518   : > { %7412 = vmatprep.subr.bf16.mxu0 %v7411_v51  ;;  %v7423_v3 = vpack.c.bf16 %v5983_v53, %v5982_v1 }
 0x51b   : > { %7414 = vmatpush3.bf16.msra.mxu0 %v7411_v51  ;;  %v3566_v46 = vpop.permute.xlu1 %3565 }
 0x51c   : > { %7416 = vmatprep.subr.bf16.mxu0 %v7415_v61 }
 0x51e   : > { %6839 = vmatmul.mubr.msk.f32.vlgmr.msra.gmra.mrb[18].mxu0 %vm1101_vm8, %v8491_v55  ;;  %v5988_v55 = vld [vmem:[%s9368_s30 + $0x80] sm:$0xff] }
 0x51f   : > { %7418 = vmatpush3.bf16.msra.mxu0 %v7415_v61  ;;  %6849 = vmatprep.mubr.msk.f32.mxu0 %vm1101_vm8, %v3114_v2  ;;  %v7431_v11 = vpack.c.bf16 %v5989_v10, %v5988_v55  ;;  %v6018_v10 = vld [vmem:[%s9369_s1] ss:$0 sm:$0xff]  ;;  %s7810_s1 = scalar_lea.vmem (%p1662_p0), %s5778_s16, 128 }
 0x520   : > { %7420 = vmatprep.subr.bf16.mxu0 %v7419_v0  ;;  %p7811_p1 = scmp.ne.s32.totalorder (%p1662_p0), %s5778_s16, %s7810_s1  ;;  %p7816_p3 = scmp.lt.s32.totalorder (%p1662_p0), %s7810_s1, %s7810_s1 }
 0x522   :  { %p7817_p4 = por (%p1662_p0), %p7816_p3, %p7815_p2 }
 0x523   : > { %7422 = vmatpush3.bf16.msra.mxu0 %v7419_v0  ;;  %v2293_v0 = vsub.f32 0.0, %v8456_v43 }
 0x524   : > { %7424 = vmatprep.subr.bf16.mxu0 %v7423_v3  ;;  %p7818_p5 = pnand (%p1662_p0), %p7817_p4, %p7811_p1 }
 0x526   : > { %6850 = vmatmul.mubr.msk.f32.vlgmr.msra.gmra.mrb[18].mxu0 %vm1101_vm8, %v3116_v9 }
 0x527   : > { %7426 = vmatpush3.bf16.msra.mxu0 %v7423_v3  ;;  %6860 = vmatprep.mubr.msk.f32.mxu0 %vm1101_vm8, %v8489_v54  ;;  %v5995_v54 = vld [vmem:[%s9368_s30 + $0xa8] sm:$0xff]  ;;  %v5965_v3 = vld [vmem:[%s9332_s18 + $0x18] sm:$0xff] }
 0x528   : > { %7428 = vmatprep.subr.bf16.mxu0 %v7427_v8  ;;  %v7439_v17 = vpack.c.bf16 %v5995_v54, %v5994_v15  ;;  %v3746_v54 = vld [vmem:[%s9370_s7] sm:$0xff] }
 0x52b   : > { %7430 = vmatpush3.bf16.msra.mxu0 %v7427_v8 }
 0x52c   : > { %7432 = vmatprep.subr.bf16.mxu0 %v7431_v11 }
 0x52e   : > { %6861 = vmatmul.mubr.msk.f32.vlgmr.msra.gmra.mrb[18].mxu0 %vm1101_vm8, %v8499_v56  ;;  %v6000_v56 = vld [vmem:[%s9368_s30 + $0xc0] sm:$0xff] }
 0x52f   : > { %7434 = vmatpush3.bf16.msra.mxu0 %v7431_v11  ;;  %6871 = vmatprep.mubr.msk.f32.mxu0 %vm1101_vm8, %v3294_v16  ;;  %v7447_v24 = vpack.c.bf16 %v6001_v22, %v6000_v56  ;;  %v3895_v16 = vld [vmem:[%s9371_s0] sm:$0xff]  ;;  %v3900_v22 = vld [vmem:[%s9371_s0 + $0x28] sm:$0xff] }
 0x530   : > { %7436 = vmatprep.subr.bf16.mxu0 %v7435_v14  ;;  %v3899_v56 = vld [vmem:[%s9371_s0 + $0x20] sm:$0xff] }
 0x533   : > { %7438 = vmatpush3.bf16.msra.mxu0 %v7435_v14 }
 0x534   : > { %7440 = vmatprep.subr.bf16.mxu0 %v7439_v17 }
 0x536   : > { %6872 = vmatmul.mubr.msk.f32.vlgmr.msra.gmra.mrb[18].mxu0 %vm1101_vm8, %v3296_v21 }
 0x537   : > { %7442 = vmatpush3.bf16.msra.mxu0 %v7439_v17  ;;  %6882 = vmatprep.mubr.msk.f32.mxu0 %vm1101_vm8, %v3384_v23  ;;  %v3896_v17 = vld [vmem:[%s9371_s0 + $0x8] sm:$0xff]  ;;  %v7484_v23 = vpack.c.bf16 %v3900_v22, %v3899_v56 }
 0x538   : > { %7444 = vmatprep.subr.bf16.mxu0 %v7443_v20  ;;  %v7478_v19 = vpack.c.bf16 %v3896_v17, %v3895_v16  ;;  %v6035_v17 = vld [vmem:[%s9329_s15 + $0x10] sm:$0xff] }
 0x53b   : > { %7446 = vmatpush3.bf16.msra.mxu0 %v7443_v20  ;;  %v3898_v20 = vld [vmem:[%s9371_s0 + $0x18] sm:$0xff] }
 0x53c   : > { %7448 = vmatprep.subr.bf16.mxu0 %v7447_v24  ;;  %v7481_v21 = vpack.c.bf16 %v3898_v20, %v3897_v18  ;;  %v6051_v18 = vld [vmem:[%s9325_s11 + $0x10] sm:$0xff] }
 0x53e   : > { %6883 = vmatmul.mubr.msk.f32.vlgmr.msra.gmra.mrb[18].mxu0 %vm1101_vm8, %v3386_v28 }
 0x53f   : > { %7450 = vmatpush3.bf16.msra.mxu0 %v7447_v24  ;;  %6893 = vmatprep.mubr.msk.f32.mxu0 %vm1101_vm8, %v8501_v57  ;;  %v6013_v57 = vld [vmem:[%s9368_s30 + $0x108] sm:$0xff]  ;;  %v3901_v24 = vld [vmem:[%s9371_s0 + $0x30] sm:$0xff] }
 0x540   : > { %7452 = vmatprep.subr.bf16.mxu0 %v7451_v27  ;;  %v7463_v41 = vpack.c.bf16 %v6013_v57, %v6012_v38  ;;  %v7487_v26 = vpack.c.bf16 %v3902_v25, %v3901_v24  ;;  %v6025_v57 = vld [vmem:[%s9371_s0 + $0x50] sm:$0xff]  ;;  %v6052_v24 = vld [vmem:[%s9325_s11 + $0x18] sm:$0xff] }
 0x543   : > { %7454 = vmatpush3.bf16.msra.mxu0 %v7451_v27 }
 0x544   : > { %7456 = vmatprep.subr.bf16.mxu0 %v7455_v33 }
 0x546   : > { %6894 = vmatmul.mubr.msk.f32.vlgmr.msra.gmra.mrb[18].mxu0 %vm1101_vm8, %v8509_v58  ;;  %v3656_v58 = vpop.permute.xlu1 %3655 }
 0x547   : > { %7458 = vmatpush3.bf16.msra.mxu0 %v7455_v33  ;;  %6904 = vmatprep.mubr.msk.f32.mxu0 %vm1101_vm8, %v3564_v39  ;;  %v6026_v39 = vld [vmem:[%s9371_s0 + $0x58] sm:$0xff] }
 0x548   : > { %7460 = vmatprep.subr.bf16.mxu0 %v7459_v36  ;;  %v7493_v44 = vpack.c.bf16 %v6026_v39, %v6025_v57 }
 0x54b   : > { %7462 = vmatpush3.bf16.msra.mxu0 %v7459_v36  ;;  %v6024_v36 = vld [vmem:[%s9371_s0 + $0x48] sm:$0xff] }
 0x54c   : > { %7464 = vmatprep.subr.bf16.mxu0 %v7463_v41  ;;  %v7490_v38 = vpack.c.bf16 %v6024_v36, %v6023_v35  ;;  %v4318_v35 = vld [vmem:[%s9326_s12 + $0x10] sm:$0xff]  ;;  %v4319_v36 = vld [vmem:[%s9326_s12 + $0x18] sm:$0xff] }
 0x54e   : > { %6905 = vmatmul.mubr.msk.f32.vlgmr.msra.gmra.mrb[18].mxu0 %vm1101_vm8, %v3566_v46  ;;  %v6028_v46 = vld [vmem:[%s9371_s0 + $0x68] sm:$0xff] }
 0x54f   : > { %7466 = vmatpush3.bf16.msra.mxu0 %v7463_v41  ;;  %6915 = vmatprep.mubr.msk.f32.mxu0 %vm1101_vm8, %v3654_v47 }
 0x550   : > { %7468 = vmatprep.subr.bf16.mxu0 %v7467_v45 }
 0x553   : > { %7470 = vmatpush3.bf16.msra.mxu0 %v7467_v45  ;;  %v6027_v45 = vld [vmem:[%s9371_s0 + $0x60] sm:$0xff] }
 0x554   : > { %7477 = vmatprep.subr.bf16.mxu0 %v7943_v37 }
 0x556   : > { %6916 = vmatmul.mubr.msk.f32.vlgmr.msra.gmra.mrb[18].mxu0 %vm1101_vm8, %v3656_v58 }
 0x557   : > { %6948 = vmatprep.mubr.msk.f32.mxu0 %vm7942_vm2, %v7940_v30  ;;  %7479 = vmatpush3.bf16.msra.mxu0 %v7478_v19 }
 0x558   : > { %7480 = vmatprep.subr.bf16.mxu0 %v7943_v37 }
 0x55b   : > { %7482 = vmatpush3.bf16.msra.mxu0 %v7481_v21 }
 0x55c   : > { %7483 = vmatprep.subr.bf16.mxu0 %v7943_v37 }
 0x55f   : > { %7485 = vmatpush3.bf16.msra.mxu0 %v7484_v23 }
 0x560   : > { %7486 = vmatprep.subr.bf16.mxu0 %v7943_v37 }
 0x563   : > { %7488 = vmatpush3.bf16.msra.mxu0 %v7487_v26 }
 0x564   : > { %7489 = vmatprep.subr.bf16.mxu0 %v7943_v37 }
 0x5d5   : > { %v2531_v48 = vpop.f32.mrb[10].mxu0 }
 0x5d6   : > { %v6789_v40 = vpop.f32.mrb[11].mxu0 }
 0x5d7   : > { %v6029_v40 = vld [vmem:[%s9371_s0 + $0x70] sm:$0xff] }
 0x5d9   : > { %v2607_v49 = vpop.f32.mrb[12].mxu0 }
 0x5da   : > { %v2608_v51 = vadd.f32 %v2607_v49, %v2531_v48  ;;  %v6794_v52 = vpop.f32.mrb[13].mxu0  ;;  %v7496_v48 = vpack.c.bf16 %v6028_v46, %v6027_v45  ;;  %v6030_v49 = vld [vmem:[%s9371_s0 + $0x78] sm:$0xff] }
 0x5db   : > { %v2288_v59 = vpop.f32.mrb[2].mxu1 }
 0x5dc   : > { %v7733_v60 = vadd.f32 %v5919_v50, %v2288_v59  ;;  %v6770_v61 = vpop.f32.mrb[3].mxu1  ;;  %v7499_v50 = vpack.c.bf16 %v6030_v49, %v6029_v40  ;;  %v6061_v40 = vld [vmem:[%s9380_s13 + $0x40] sm:$0xff]  ;;  %v6062_v49 = vld [vmem:[%s9380_s13 + $0x48] sm:$0xff] }
 0x5dd   : > { %v2683_v63 = vpop.f32.mrb[14].mxu0 }
 0x5de   : > { %v2294_v1 = vmax.f32 %v7733_v60, 0.0  ;;  %v6801_v53 = vpop.f32.mrb[15].mxu0  ;;  %6803 = vmatpush3.msk.msra.mxu1 %vm2305_vm4, %v2683_v63 }
 0x5df   : > { %6805 = vmatmul.mubr.msk.f32.vlgmr.msra.gmra.mrb[4].mxu1 %vm2458_vm13, %v5958_v62  ;;  %6814 = vmatprep.subr.mxu1 %v7940_v30  ;;  %v6043_v53 = vld [vmem:[%s9326_s12 + $0x20] sm:$0xff] }
 0x5e0   : > { %v2295_v2 = vmin.f32 %v2294_v1, 1.0  ;;  %6816 = vmatprep.mubr.msk.f32.mxu1 %vm7942_vm2, %v7940_v30 }
 0x5e1   : > { %v2838_v6 = vpop.f32.mrb[16].mxu0 }
 0x5e2   : > { %v2296_v7 = vadd.f32 %v2295_v2, %v2293_v0  ;;  %v6813_v8 = vpop.f32.mrb[17].mxu0  ;;  %6815 = vmatpush3.msk.msra.mxu1 %vm2305_vm4, %v2838_v6  ;;  %v6044_v2 = vld [vmem:[%s9326_s12 + $0x28] sm:$0xff] }
 0x5e3   : > { %6817 = vmatmul.mubr.msk.f32.vlgmr.msra.gmra.mrb[6].mxu1 %vm2458_vm13, %v5965_v3  ;;  %7471 = vmatprep.subr.bf16.mxu1 %v7943_v37  ;;  %v8864_v6 = vpack.c.bf16 %v6044_v2, %v6043_v53  ;;  %v6046_v8 = vld [vmem:[%s9326_s12 + $0x38] sm:$0xff] }
 0x5e4   : > { %v2297_v9 = vmul.f32 0.2, %v2296_v7  ;;  %6922 = vmatprep.mubr.msk.f32.mxu1 %vm7942_vm2, %v7940_v30  ;;  %v6045_v7 = vld [vmem:[%s9326_s12 + $0x30] sm:$0xff] }
 0x5e6   : > { %v2298_v55 = vadd.f32 %v2297_v9, %v8456_v43  ;;  %v6020_v43 = vld [vmem:[%s9370_s7 + $0x8] sm:$0xff] }
 0x5e8   : > { %5756 = vst.msk [vmem:[#allocation5] sm:$0x3] %vm1651_vm10, %v2298_v55 }
 0x629   : > { %v6917_v11 = vpop.f32.mrb[18].mxu0 }
 0x62a   : > { %v3745_v12 = vadd.f32 %v6917_v11, %v6018_v10  ;;  %v3727_v13 = vpop.f32.mrb[19].mxu0  ;;  %v6034_v11 = vld [vmem:[%s9329_s15 + $0x8] sm:$0xff] }
 0x62b   : > { %v3744_v14 = vadd.f32 %v6018_v10, %v3727_v13  ;;  %v4211_v10 = vld [vmem:[%s9329_s15] sm:$0xff] }
 0x62d   : > { %v7472_v15 = vpack.c.bf16 %v3745_v12, %v3744_v14  ;;  %v4225_v12 = vsub.f32 0.0, %v8396_v29 }
 0x62f   : > { %7473 = vmatpush3.bf16.msra.mxu1 %v7472_v15 }
 0x630   : > { %7474 = vmatprep.subr.bf16.mxu1 %v7943_v37 }
 0x632   : > { %6923 = vmatmul.mubr.msk.f32.vlgmr.msra.gmra.mrb[8].mxu1 %vm146_vm7, %v3746_v54  ;;  %v8900_v54 = vpack.c.bf16 %v6046_v8, %v6045_v7 }
 0x633   : > { %7476 = vmatpush3.bf16.msra.mxu1 %v7472_v15  ;;  %6929 = vmatprep.mubr.msk.f32.mxu1 %vm7942_vm2, %v7940_v30  ;;  %v4234_v15 = vld [vmem:[%s9325_s11 + $0x8] sm:$0xff] }
 0x636   : > { %6930 = vmatmul.mubr.msk.f32.vlgmr.msra.gmra.mrb[10].mxu1 %vm146_vm7, %v6020_v43 }
 0x6b2   : > { %v2761_v27 = vpop.f32.mrb[4].mxu1 }
 0x6b3   : > { %v2765_v28 = vadd.f32 %v2761_v27, %v2608_v51  ;;  %v6806_v31 = vpop.f32.mrb[5].mxu1  ;;  %v4233_v51 = vld [vmem:[%s9325_s11] sm:$0xff] }
 0x6b4   : > { %7015 = vmatprep.mubr.msk.f32.mxu1 %vm1679_vm14, %v4233_v51 }
 0x6b6   : > { %v2916_v32 = vpop.f32.mrb[6].mxu1 }
 0x6b7   : > { %v8806_v33 = vadd.f32 %v2916_v32, %v2765_v28  ;;  %v6818_v34 = vpop.f32.mrb[7].mxu1 }
 0x6b8   : > { %v4317_v34 = vld [vmem:[%s9326_s12 + $0x8] sm:$0xff] }
 0x705   : > { %v3816_v41 = vpop.f32.mrb[8].mxu1 }
 0x706   : > { %v6924_v42 = vpop.f32.mrb[9].mxu1  ;;  %6949 = vmatmul.mubr.msk.f32.vlgmr.msra.gmra.mrb[20].mxu0 %vm9372_vm9, %v3816_v41 }
 0x707   : > { %7491 = vmatpush3.bf16.msra.mxu0 %v7490_v38  ;;  %6967 = vmatprep.mubr.msk.f32.mxu0 %vm7942_vm2, %v7940_v30  ;;  %v7537_v42 = vpack.c.bf16 %v4319_v36, %v4318_v35  ;;  %v6085_v36 = vld [vmem:[%s9380_s13 + $0xd0] sm:$0xff] }
 0x708   : > { %7492 = vmatprep.subr.bf16.mxu0 %v7943_v37 }
 0x709   : > { %v3891_v47 = vpop.f32.mrb[10].mxu1 }
 0x70a   : > { %v6931_v58 = vpop.f32.mrb[11].mxu1 }
 0x70b   : > { %7494 = vmatpush3.bf16.msra.mxu0 %v7493_v44 }
 0x70c   : > { %7495 = vmatprep.subr.bf16.mxu0 %v7943_v37 }
 0x70f   : > { %7497 = vmatpush3.bf16.msra.mxu0 %v7496_v48 }
 0x710   : > { %7498 = vmatprep.subr.bf16.mxu0 %v7943_v37 }
 0x713   : > { %7500 = vmatpush3.bf16.msra.mxu0 %v7499_v50 }
 0x714   : > { %7501 = vmatprep.subr.bf16.mxu0 %v7943_v37 }
 0x716   : > { %6968 = vmatmul.mubr.msk.f32.vlgmr.msra.gmra.mrb[22].mxu0 %vm9373_vm15, %v3816_v41 }
 0x717   : > { %7503 = vmatpush3.bf16.msra.mxu0 %v7478_v19  ;;  %6986 = vmatprep.mubr.msk.f32.mxu0 %vm7942_vm2, %v7940_v30 }
 0x718   : > { %7504 = vmatprep.subr.bf16.mxu0 %v7943_v37 }
 0x71b   : > { %7506 = vmatpush3.bf16.msra.mxu0 %v7481_v21  ;;  %v6036_v21 = vld [vmem:[%s9329_s15 + $0x18] sm:$0xff] }
 0x71c   : > { %7507 = vmatprep.subr.bf16.mxu0 %v7943_v37 }
 0x71f   : > { %7509 = vmatpush3.bf16.msra.mxu0 %v7484_v23 }
 0x720   : > { %7510 = vmatprep.subr.bf16.mxu0 %v7943_v37 }
 0x723   : > { %7512 = vmatpush3.bf16.msra.mxu0 %v7487_v26 }
 0x724   : > { %7513 = vmatprep.subr.bf16.mxu0 %v7943_v37 }
 0x726   : > { %6987 = vmatmul.mubr.msk.f32.vlgmr.msra.gmra.mrb[24].mxu0 %vm9374_vm3, %v3891_v47 }
 0x727   : > { %7515 = vmatpush3.bf16.msra.mxu0 %v7490_v38  ;;  %7005 = vmatprep.mubr.msk.f32.mxu0 %vm7942_vm2, %v7940_v30 }
 0x728   : > { %7516 = vmatprep.subr.bf16.mxu0 %v7943_v37 }
 0x72b   : > { %7518 = vmatpush3.bf16.msra.mxu0 %v7493_v44 }
 0x72c   : > { %7519 = vmatprep.subr.bf16.mxu0 %v7943_v37 }
 0x72f   : > { %7521 = vmatpush3.bf16.msra.mxu0 %v7496_v48 }
 0x730   : > { %7522 = vmatprep.subr.bf16.mxu0 %v7943_v37 }
 0x733   : > { %7524 = vmatpush3.bf16.msra.mxu0 %v7499_v50  ;;  %v6063_v50 = vld [vmem:[%s9380_s13 + $0x50] sm:$0xff] }
 0x736   : > { %7006 = vmatmul.mubr.msk.f32.vlgmr.msra.gmra.mrb[26].mxu0 %vm9375_vm1, %v3891_v47 }
 0x737   : > { %7010 = vmatprep.mubr.msk.f32.mxu0 %vm1679_vm14, %v4233_v51  ;;  %v7557_v51 = vpack.c.bf16 %v6062_v49, %v6061_v40  ;;  %v6095_v49 = vld [vmem:[%s9380_s13 + $0x110] sm:$0xff] }
 0x7d9   : > { %v3972_v30 = vpop.f32.mrb[20].mxu0 }
 0x7da   : > { %v6950_v52 = vpop.f32.mrb[21].mxu0 }
 0x7e9   : > { %v4051_v59 = vpop.f32.mrb[22].mxu0 }
 0x7ea   : > { %v4198_v60 = vmax.f32 %v3972_v30, %v4051_v59  ;;  %v6969_v61 = vpop.f32.mrb[23].mxu0 }
 0x7f9   : > { %v4124_v62 = vpop.f32.mrb[24].mxu0 }
 0x7fa   : > { %v6988_v63 = vpop.f32.mrb[25].mxu0 }
 0x7fb   : > { %v6068_v63 = vld [vmem:[%s9380_s13 + $0x78] sm:$0xff] }
 0x809   : > { %v4194_v0 = vpop.f32.mrb[26].mxu0 }
 0x80a   : > { %v4199_v37 = vmax.f32 %v4124_v62, %v4194_v0  ;;  %v7007_v1 = vpop.f32.mrb[27].mxu0 }
 0x80b   : > { %v4904_v1 = vld [vmem:[%s9380_s13 + $0x8] sm:$0xff] }
 0x80c   : > { %v4200_v3 = vmax.f32 %v4198_v60, %v4199_v37  ;;  %v6066_v60 = vld [vmem:[%s9380_s13 + $0x68] sm:$0xff]  ;;  %v4903_v37 = vld [vmem:[%s9380_s13] sm:$0xff] }
 0x80d   : > { %v7573_v53 = vpack.c.bf16 %v4904_v1, %v4903_v37  ;;  %v6104_v37 = vld [vmem:[%s9380_s13 + $0x148] sm:$0xff] }
 0x80e   : > { %v4226_v9 = vadd.f32 %v4200_v3, %v8806_v33  ;;  %vm8873_vm0 = vcmp.eq.f32.partialorder %v3972_v30, %v4200_v3  ;;  %vm4203_vm2 = vcmp.eq.f32.partialorder %v4051_v59, %v4200_v3  ;;  %vm4207_vm4 = vcmp.eq.f32.partialorder %v4124_v62, %v4200_v3  ;;  %v4316_v33 = vld [vmem:[%s9326_s12] sm:$0xff]  ;;  %v6064_v30 = vld [vmem:[%s9380_s13 + $0x58] sm:$0xff]  ;;  %v6067_v62 = vld [vmem:[%s9380_s13 + $0x70] sm:$0xff] }
 0x80f   : > { %7008 = vmatprep.subr.msk.mxu0 %vm8873_vm0, %v8396_v29  ;;  %vm4202_vm6 = vmxor %vm8873_vm0, %vm7944_vm5  ;;  %v4212_v43 = vsel %vm8873_vm0, %v4211_v10, 0  ;;  %v7561_v52 = vpack.c.bf16 %v6064_v30, %v6063_v50  ;;  %v6065_v59 = vld [vmem:[%s9380_s13 + $0x60] sm:$0xff]  ;;  %v7569_v0 = vpack.c.bf16 %v6068_v63, %v6067_v62  ;;  %v6096_v50 = vld [vmem:[%s9380_s13 + $0x118] sm:$0xff] }
 0x810   : > { %v4227_v13 = vmax.f32 %v4226_v9, 0.0  ;;  %7009 = vmatpush3.msk.msra.mxu0 %vm8873_vm0, %v8396_v29  ;;  %vm8893_vm12 = vmand %vm4202_vm6, %vm4203_vm2  ;;  %v7565_v61 = vpack.c.bf16 %v6066_v60, %v6065_v59  ;;  %v6097_v30 = vld [vmem:[%s9380_s13 + $0x120] sm:$0xff]  ;;  %v6100_v62 = vld [vmem:[%s9380_s13 + $0x138] sm:$0xff] }
 0x811   : > { %v4215_v16 = vsel %vm8893_vm12, %v6034_v11, 0  ;;  %7013 = vmatprep.subr.msk.mxu1 %vm8893_vm12, %v8396_v29  ;;  %vm4205_vm11 = vmor %vm8873_vm0, %vm8893_vm12  ;;  %7011 = vmatmul.mubr.msk.f32.vlgmr.msra.gmra.mrb[28].mxu0 %vm1679_vm14, %v4234_v15  ;;  %v4905_v11 = vld [vmem:[%s9380_s13 + $0x10] sm:$0xff] }
 0x812   : > { %v4228_v19 = vmin.f32 %v4227_v13, 1.0  ;;  %v4216_v20 = vadd.s32 %v4215_v16, %v4212_v43  ;;  %7014 = vmatpush3.msk.msra.mxu1 %vm8893_vm12, %v8396_v29  ;;  %vm4206_vm13 = vmxor %vm4205_vm11, %vm7944_vm5  ;;  %7526 = vmatprep.subr.bf16.mxu0 %v8864_v6  ;;  %v4908_v43 = vld [vmem:[%s9380_s13 + $0x28] sm:$0xff] }
 0x813   : > { %7016 = vmatmul.mubr.msk.f32.vlgmr.msra.gmra.mrb[12].mxu1 %vm1679_vm14, %v4234_v15  ;;  %vm4208_vm9 = vmand %vm4206_vm13, %vm4207_vm4  ;;  %7528 = vmatpush3.bf16.msra.mxu0 %v8864_v6 }
 0x814   : > { %v4229_v56 = vadd.f32 %v4228_v19, %v4225_v12  ;;  %v4219_v22 = vsel %vm4208_vm9, %v6035_v17, 0  ;;  %v4563_v23 = vsel %vm4208_vm9, %v8396_v29, 0.0  ;;  %7042 = vmatprep.mubr.msk.f32.mxu1 %vm1679_vm14, %v6051_v18  ;;  %vm4209_vm15 = vmor %vm4205_vm11, %vm4208_vm9  ;;  %7530 = vmatprep.subr.bf16.mxu0 %v8900_v54  ;;  %v4906_v12 = vld [vmem:[%s9380_s13 + $0x18] sm:$0xff]  ;;  %v4909_v17 = vld [vmem:[%s9380_s13 + $0x30] sm:$0xff] }
 0x815   : > { %7040 = vmatprep.subr.mxu1 %v4563_v23  ;;  %vm4210_vm3 = vmxor %vm4209_vm15, %vm7944_vm5  ;;  %v4220_v25 = vadd.s32 %v4219_v22, %v4216_v20  ;;  %v7577_v14 = vpack.c.bf16 %v4906_v12, %v4905_v11  ;;  %v6073_v20 = vld [vmem:[%s9380_s13 + $0x80] sm:$0xff]  ;;  %v6075_v22 = vld [vmem:[%s9380_s13 + $0x90] sm:$0xff] }
 0x816   : > { %v4230_v26 = vmul.f32 0.2, %v4229_v56  ;;  %7041 = vmatpush3.msra.mxu1 %v4563_v23  ;;  %v4223_v27 = vsel %vm4210_vm3, %v6036_v21, 0  ;;  %v4731_v28 = vsel %vm4210_vm3, %v8396_v29, 0.0  ;;  %vm9381_vm5 = vmmov %vm9375_vm1  ;;  %v6074_v21 = vld [vmem:[%s9380_s13 + $0x88] sm:$0xff]  ;;  %v6076_v23 = vld [vmem:[%s9380_s13 + $0x98] sm:$0xff] }
 0x817   : > { %v4224_v31 = vadd.s32 %v4223_v27, %v4220_v25  ;;  %7056 = vmatprep.subr.mxu1 %v4731_v28  ;;  %7043 = vmatmul.mubr.msk.f32.vlgmr.msra.gmra.mrb[14].mxu1 %vm1679_vm14, %v6052_v24  ;;  %vm9382_vm0 = vmmov %vm9375_vm1  ;;  %v7589_v56 = vpack.c.bf16 %v6074_v21, %v6073_v20  ;;  %v6077_v25 = vld [vmem:[%s9380_s13 + $0xa0] sm:$0xff]  ;;  %v6109_v12 = vld [vmem:[%s9380_s13 + $0x170] sm:$0xff] }
 0x818   : > { %v4231_v32 = vadd.f32 %v4230_v26, %v8396_v29  ;;  %7057 = vmatpush3.msra.mxu1 %v4731_v28  ;;  %7058 = vmatprep.mubr.msk.f32.mxu1 %vm1679_vm14, %v6051_v18  ;;  %v7533_v29 = vpack.c.bf16 %v4317_v34, %v4316_v33  ;;  %v4910_v18 = vld [vmem:[%s9380_s13 + $0x38] sm:$0xff]  ;;  %v6078_v26 = vld [vmem:[%s9380_s13 + $0xa8] sm:$0xff]  ;;  %vm9383_vm2 = vmmov %vm9382_vm0 }
 0x819   : > { %5760 = vst.msk [vmem:[#allocation10] sm:$0xff] %vm1101_vm8, %v4224_v31  ;;  %7532 = vmatpush3.bf16.msra.mxu0 %v8900_v54  ;;  %7558 = vmatprep.subr.bf16.mxu1 %v7557_v51  ;;  %v7585_v19 = vpack.c.bf16 %v4910_v18, %v4909_v17  ;;  %vm9384_vm4 = vmmov %vm9382_vm0  ;;  %v7597_v28 = vpack.c.bf16 %v6078_v26, %v6077_v25  ;;  %v6079_v31 = vld [vmem:[%s9380_s13 + $0xb0] sm:$0xff]  ;;  %v6083_v34 = vld [vmem:[%s9380_s13 + $0xc0] sm:$0xff] }
 0x81a   : > { %5757 = vst.msk [vmem:[#allocation7] sm:$0xff] %vm1101_vm8, %v4231_v32  ;;  %7534 = vmatprep.subr.bf16.mxu0 %v7533_v29  ;;  %v6080_v32 = vld [vmem:[%s9380_s13 + $0xb8] sm:$0xff]  ;;  %vm9385_vm6 = vmmov %vm9382_vm0  ;;  %v6117_v20 = vld [vmem:[%s9380_s13 + $0x1a0] sm:$0xff] }
 0x81b   : > { %7059 = vmatmul.mubr.msk.f32.vlgmr.msra.gmra.mrb[16].mxu1 %vm1679_vm14, %v6052_v24  ;;  %vm4898_vm14 = vcmask 588864   ;;  %v7593_v24 = vpack.c.bf16 %v6076_v23, %v6075_v22  ;;  %v7601_v33 = vpack.c.bf16 %v6080_v32, %v6079_v31  ;;  %vm9386_vm12 = vmmov %vm9382_vm0  ;;  %v6116_v17 = vld [vmem:[%s9380_s13 + $0x198] sm:$0xff]  ;;  %v6118_v21 = vld [vmem:[%s9380_s13 + $0x1a8] sm:$0xff] }
 0x81c   : > { %7560 = vmatpush3.bf16.msra.mxu1 %v7557_v51  ;;  %v7625_v51 = vpack.c.bf16 %v6096_v50, %v6095_v49  ;;  %vm9387_vm11 = vmmov %vm9382_vm0  ;;  %v6119_v22 = vld [vmem:[%s9380_s13 + $0x1b0] sm:$0xff]  ;;  %v6120_v23 = vld [vmem:[%s9380_s13 + $0x1b8] sm:$0xff] }
 0x81d   : > { %7562 = vmatprep.subr.bf16.mxu1 %v7561_v52  ;;  %vm9388_vm13 = vmmov %vm9382_vm0  ;;  %v6123_v25 = vld [vmem:[%s9380_s13 + $0x1c0] sm:$0xff]  ;;  %v6140_v49 = vld [vmem:[%s9380_s13 + $0x238] sm:$0xff] }
 0x81e   : > { %vm9389_vm9 = vmmov %vm9382_vm0  ;;  %v6127_v32 = vld [vmem:[%s9380_s13 + $0x1e0] sm:$0xff] }
 0x81f   : > { %vm9390_vm15 = vmmov %vm9382_vm0 }
 0x820   : > { %7564 = vmatpush3.bf16.msra.mxu1 %v7561_v52  ;;  %v6098_v52 = vld [vmem:[%s9380_s13 + $0x128] sm:$0xff]  ;;  %vm9391_vm3 = vmmov %vm9382_vm0 }
 0x821   : > { %7566 = vmatprep.subr.bf16.mxu1 %v7565_v61  ;;  %v7629_v60 = vpack.c.bf16 %v6098_v52, %v6097_v30 }
 0x824   : > { %7568 = vmatpush3.bf16.msra.mxu1 %v7565_v61  ;;  %v6099_v61 = vld [vmem:[%s9380_s13 + $0x130] sm:$0xff] }
 0x825   : > { %7570 = vmatprep.subr.bf16.mxu1 %v7569_v0  ;;  %v7633_v63 = vpack.c.bf16 %v6100_v62, %v6099_v61  ;;  %v7808_v61 = vld [vmem:[#allocation9 + $0x8] sm:$0xff] }
 0x826   : > { %v5743_v62 = vsub.f32 0.0, %v7808_v61 }
 0x828   : > { %7572 = vmatpush3.bf16.msra.mxu1 %v7569_v0  ;;  %v6103_v0 = vld [vmem:[%s9380_s13 + $0x140] sm:$0xff] }
 0x829   : > { %7574 = vmatprep.subr.bf16.mxu1 %v7573_v53  ;;  %v7637_v1 = vpack.c.bf16 %v6104_v37, %v6103_v0  ;;  %v7809_v0 = vld [vmem:[#allocation9] sm:$0xff] }
 0x82a   : > { %v5742_v37 = vsub.f32 0.0, %v7809_v0 }
 0x8e4   : > { %v7012_v38 = vpop.f32.mrb[28].mxu0 }
 0x8e5   : > { %v4307_v57 = vpop.f32.mrb[29].mxu0 }
 0x8e6   : > { %v7017_v39 = vpop.f32.mrb[12].mxu1 }
 0x8e7   : > { %v4387_v41 = vpop.f32.mrb[13].mxu1 }
 0x8e8   : > { %7026 = vmatprep.mubr.msk.f32.mxu0 %vm1101_vm8, %v4387_v41  ;;  %v6087_v41 = vld [vmem:[%s9380_s13 + $0xe0] sm:$0xff] }
 0x8e9   : > { %7027 = vmatmul.mubr.msk.f32.vlgmr.msra.gmra.mrb[30].mxu0 %vm1101_vm8, %v7017_v39 }
 0x8ea   : > { %7536 = vmatpush3.bf16.msra.mxu0 %v7533_v29  ;;  %7037 = vmatprep.mubr.msk.f32.mxu0 %vm1101_vm8, %v4307_v57  ;;  %v7044_v44 = vpop.f32.mrb[14].mxu1 }
 0x8eb   : > { %7538 = vmatprep.subr.bf16.mxu0 %v7537_v42  ;;  %v4639_v45 = vpop.f32.mrb[15].mxu1 }
 0x8ee   : > { %7540 = vmatpush3.bf16.msra.mxu0 %v7537_v42  ;;  %v7060_v46 = vpop.f32.mrb[16].mxu1 }
 0x8ef   : > { %7542 = vmatprep.subr.bf16.mxu0 %v7533_v29  ;;  %v4798_v47 = vpop.f32.mrb[17].mxu1 }
 0x8f1   : > { %7038 = vmatmul.mubr.msk.f32.vlgmr.msra.gmra.mrb[30].mxu0 %vm1101_vm8, %v7012_v38  ;;  %v6086_v38 = vld [vmem:[%s9380_s13 + $0xd8] sm:$0xff] }
 0x8f2   : > { %7544 = vmatpush3.bf16.msra.mxu0 %v7533_v29  ;;  %7053 = vmatprep.mubr.msk.f32.mxu0 %vm1101_vm8, %v4639_v45  ;;  %v6084_v29 = vld [vmem:[%s9380_s13 + $0xc8] sm:$0xff]  ;;  %v7609_v57 = vpack.c.bf16 %v6086_v38, %v6085_v36  ;;  %v6089_v45 = vld [vmem:[%s9380_s13 + $0xf0] sm:$0xff]  ;;  %v6130_v36 = vld [vmem:[%s9380_s13 + $0x1f8] sm:$0xff] }
 0x8f3   : > { %7546 = vmatprep.subr.bf16.mxu0 %v7537_v42  ;;  %v7605_v35 = vpack.c.bf16 %v6084_v29, %v6083_v34 }
 0x8f6   : > { %7548 = vmatpush3.bf16.msra.mxu0 %v7537_v42  ;;  %v6088_v42 = vld [vmem:[%s9380_s13 + $0xe8] sm:$0xff] }
 0x8f7   : > { %7550 = vmatprep.subr.bf16.mxu0 %v8864_v6 }
 0x8f9   : > { %7054 = vmatmul.mubr.msk.f32.vlgmr.msra.gmra.mrb[30].mxu0 %vm1101_vm8, %v7044_v44  ;;  %v7613_v44 = vpack.c.bf16 %v6088_v42, %v6087_v41  ;;  %v6135_v41 = vld [vmem:[%s9380_s13 + $0x210] sm:$0xff]  ;;  %v6136_v42 = vld [vmem:[%s9380_s13 + $0x218] sm:$0xff] }
 0x8fa   : > { %7552 = vmatpush3.bf16.msra.mxu0 %v8864_v6  ;;  %7069 = vmatprep.mubr.msk.f32.mxu0 %vm1101_vm8, %v4798_v47 }
 0x8fb   : > { %7554 = vmatprep.subr.bf16.mxu0 %v8900_v54 }
 0x8fe   : > { %7556 = vmatpush3.bf16.msra.mxu0 %v8900_v54  ;;  %v4907_v54 = vld [vmem:[%s9380_s13 + $0x20] sm:$0xff] }
 0x8ff   : > { %v7581_v16 = vpack.c.bf16 %v4908_v43, %v4907_v54  ;;  %v6114_v54 = vld [vmem:[%s9380_s13 + $0x188] sm:$0xff] }
 0x901   : > { %7070 = vmatmul.mubr.msk.f32.vlgmr.msra.gmra.mrb[30].mxu0 %vm1101_vm8, %v7060_v46  ;;  %v6090_v46 = vld [vmem:[%s9380_s13 + $0xf8] sm:$0xff] }
 0x902   : > { %v7617_v47 = vpack.c.bf16 %v6090_v46, %v6089_v45  ;;  %v6137_v46 = vld [vmem:[%s9380_s13 + $0x220] sm:$0xff] }
 0x9d4   : > { %v7071_v58 = vpop.f32.mrb[30].mxu0 }
 0x9d5   : > { %4894 = vrot.lane.b32.xlu1 %v7071_v58, %s7947_s4  ;;  %v4879_v48 = vpop.f32.mrb[31].mxu0  ;;  %v6093_v58 = vld [vmem:[%s9380_s13 + $0x100] sm:$0xff] }
 0x9d6   : > { %4892 = vrot.lane.b32.xlu0 %v4879_v48, %s7947_s4  ;;  %v6094_v48 = vld [vmem:[%s9380_s13 + $0x108] sm:$0xff] }
 0x9d7   : > { %v7621_v40 = vpack.c.bf16 %v6094_v48, %v6093_v58 }
 0xa47   : > { %v4895_v2 = vpop.permute.xlu1 %4894 }
 0xa48   : > { %4900 = vst.msk [vmem:[#allocation3 + $0x11] sm:$0xff] %vm4898_vm14, %v4895_v2  ;;  %v4893_v3 = vpop.permute.xlu0 %4892  ;;  %v6106_v2 = vld [vmem:[%s9380_s13 + $0x158] sm:$0xff] }
 0xa49   : > { %4899 = vst.msk [vmem:[#allocation3 + $0x1] sm:$0xff] %vm4898_vm14, %v4893_v3  ;;  %vm9392_vm14 = vmmov %vm9382_vm0 }
 0xa4f   : > { %v4902_v6 = vld [vmem:[#allocation3 + $0x10] sm:$0xff] }
 0xa50   : > { %4924 = vrot.lane.b32.xlu1 %v4902_v6, %s7945_s8  ;;  %v4901_v7 = vld [vmem:[#allocation3] sm:$0xff]  ;;  %v9012_v8 = vld [vmem:[#allocation3 + $0x11] sm:$0xff] }
 0xa51   : > { %4922 = vrot.lane.b32.xlu0 %v4901_v7, %s7945_s8  ;;  %v9016_v9 = vld [vmem:[#allocation3 + $0x1] sm:$0xff]  ;;  %v9022_v55 = vld [vmem:[#allocation3 + $0x12] sm:$0xff] }
 0xa52   : > { %v9026_v10 = vld [vmem:[#allocation3 + $0x2] sm:$0xff] }
 0xa54   : > { %5095 = vrot.lane.b32.xlu1 %v4902_v6, %s7948_s27 }
 0xa55   : > { %5093 = vrot.lane.b32.xlu0 %v4901_v7, %s7948_s27 }
 0xa58   : > { %5283 = vrot.lane.b32.xlu1 %v9012_v8, %s7945_s8 }
 0xa59   : > { %5281 = vrot.lane.b32.xlu0 %v9016_v9, %s7945_s8 }
 0xa5c   : > { %5377 = vrot.lane.b32.xlu1 %v9012_v8, %s7948_s27 }
 0xa5d   : > { %5375 = vrot.lane.b32.xlu0 %v9016_v9, %s7948_s27 }
 0xa60   : > { %5565 = vrot.lane.b32.xlu1 %v9022_v55, %s7945_s8 }
 0xa61   : > { %5563 = vrot.lane.b32.xlu0 %v9026_v10, %s7945_s8 }
 0xa64   : > { %5659 = vrot.lane.b32.xlu1 %v9022_v55, %s7948_s27 }
 0xa65   : > { %5657 = vrot.lane.b32.xlu0 %v9026_v10, %s7948_s27 }
 0xac2   : > { %v4925_v15 = vpop.permute.xlu1 %4924 }
 0xac3   : > { %v4923_v13 = vpop.permute.xlu0 %4922 }
 0xac4   : > { %7088 = vmatprep.mubr.msk.f32.mxu1 %vm9381_vm5, %v4923_v13  ;;  %v6110_v13 = vld [vmem:[%s9380_s13 + $0x178] sm:$0xff]  ;;  %vm9393_vm5 = vmmov %vm9382_vm0 }
 0xac5   : > { %7089 = vmatmul.mubr.msk.f32.vlgmr.msra.gmra.mrb[18].mxu1 %vm9375_vm1, %v4925_v15  ;;  %v6113_v15 = vld [vmem:[%s9380_s13 + $0x180] sm:$0xff]  ;;  %vm9394_vm1 = vmmov %vm9382_vm0 }
 0xac6   : > { %7576 = vmatpush3.bf16.msra.mxu1 %v7573_v53  ;;  %7107 = vmatprep.mubr.msk.f32.mxu1 %vm9382_vm0, %v4901_v7  ;;  %v5096_v39 = vpop.permute.xlu1 %5095  ;;  %v6105_v53 = vld [vmem:[%s9380_s13 + $0x150] sm:$0xff]  ;;  %v6107_v7 = vld [vmem:[%s9380_s13 + $0x160] sm:$0xff]  ;;  %v7653_v43 = vpack.c.bf16 %v6114_v54, %v6113_v15 }
 0xac7   : > { %7578 = vmatprep.subr.bf16.mxu1 %v7577_v14  ;;  %v5094_v27 = vpop.permute.xlu0 %5093  ;;  %v7641_v3 = vpack.c.bf16 %v6106_v2, %v6105_v53 }
 0xaca   : > { %7580 = vmatpush3.bf16.msra.mxu1 %v7577_v14  ;;  %v7649_v14 = vpack.c.bf16 %v6110_v13, %v6109_v12 }
 0xacb   : > { %7582 = vmatprep.subr.bf16.mxu1 %v7581_v16  ;;  %v5282_v59 = vpop.permute.xlu0 %5281 }
 0xace   : > { %7584 = vmatpush3.bf16.msra.mxu1 %v7581_v16  ;;  %v6115_v16 = vld [vmem:[%s9380_s13 + $0x190] sm:$0xff] }
 0xacf   : > { %7586 = vmatprep.subr.bf16.mxu1 %v7585_v19  ;;  %v7657_v18 = vpack.c.bf16 %v6116_v17, %v6115_v16 }
 0xad2   : > { %7588 = vmatpush3.bf16.msra.mxu1 %v7585_v19 }
 0xad3   : > { %7590 = vmatprep.subr.bf16.mxu1 %v7589_v56 }
 0xad5   : > { %7108 = vmatmul.mubr.msk.f32.vlgmr.msra.gmra.mrb[18].mxu1 %vm9383_vm2, %v4902_v6  ;;  %v5284_v6 = vpop.permute.xlu1 %5283  ;;  %vm9395_vm2 = vmmov %vm9382_vm0 }
 0xad6   : > { %7592 = vmatpush3.bf16.msra.mxu1 %v7589_v56  ;;  %7126 = vmatprep.mubr.msk.f32.mxu1 %vm9384_vm4, %v5094_v27  ;;  %v7661_v56 = vpack.c.bf16 %v6118_v21, %v6117_v20  ;;  %v6125_v27 = vld [vmem:[%s9380_s13 + $0x1d0] sm:$0xff]  ;;  %vm9396_vm4 = vmmov %vm9382_vm0 }
 0xad7   : > { %7594 = vmatprep.subr.bf16.mxu1 %v7593_v24 }
 0xad9   : > { %v5378_v19 = vpop.permute.xlu1 %5377 }
 0xada   : > { %7596 = vmatpush3.bf16.msra.mxu1 %v7593_v24  ;;  %v7665_v24 = vpack.c.bf16 %v6120_v23, %v6119_v22 }
 0xadb   : > { %7598 = vmatprep.subr.bf16.mxu1 %v7597_v28 }
 0xadd   : > { %v5566_v45 = vpop.permute.xlu1 %5565 }
 0xade   : > { %7600 = vmatpush3.bf16.msra.mxu1 %v7597_v28  ;;  %v6126_v28 = vld [vmem:[%s9380_s13 + $0x1d8] sm:$0xff] }
 0xadf   : > { %7602 = vmatprep.subr.bf16.mxu1 %v7601_v33  ;;  %v7673_v31 = vpack.c.bf16 %v6126_v28, %v6125_v27 }
 0xae2   : > { %7604 = vmatpush3.bf16.msra.mxu1 %v7601_v33  ;;  %v6128_v33 = vld [vmem:[%s9380_s13 + $0x1e8] sm:$0xff] }
 0xae3   : > { %7606 = vmatprep.subr.bf16.mxu1 %v7605_v35  ;;  %v7677_v29 = vpack.c.bf16 %v6128_v33, %v6127_v32 }
 0xae5   : > { %7127 = vmatmul.mubr.msk.f32.vlgmr.msra.gmra.mrb[18].mxu1 %vm9385_vm6, %v5096_v39 }
 0xae6   : > { %7608 = vmatpush3.bf16.msra.mxu1 %v7605_v35  ;;  %7145 = vmatprep.mubr.msk.f32.mxu1 %vm9386_vm12, %v9016_v9  ;;  %v5376_v9 = vpop.permute.xlu0 %5375  ;;  %v6129_v35 = vld [vmem:[%s9380_s13 + $0x1f0] sm:$0xff] }
 0xae7   : > { %7610 = vmatprep.subr.bf16.mxu1 %v7609_v57  ;;  %v7681_v38 = vpack.c.bf16 %v6130_v36, %v6129_v35 }
 0xaea   : > { %7612 = vmatpush3.bf16.msra.mxu1 %v7609_v57  ;;  %v5564_v34 = vpop.permute.xlu0 %5563  ;;  %v6134_v57 = vld [vmem:[%s9380_s13 + $0x208] sm:$0xff] }
 0xaeb   : > { %7614 = vmatprep.subr.bf16.mxu1 %v7613_v44 }
 0xaee   : > { %7616 = vmatpush3.bf16.msra.mxu1 %v7613_v44  ;;  %v7689_v44 = vpack.c.bf16 %v6136_v42, %v6135_v41  ;;  %v5658_v58 = vpop.permute.xlu0 %5657 }
 0xaef   : > { %7618 = vmatprep.subr.bf16.mxu1 %v7617_v47 }
 0xaf2   : > { %7620 = vmatpush3.bf16.msra.mxu1 %v7617_v47  ;;  %v6138_v47 = vld [vmem:[%s9380_s13 + $0x228] sm:$0xff] }
 0xaf3   : > { %7622 = vmatprep.subr.bf16.mxu1 %v7621_v40  ;;  %v7693_v48 = vpack.c.bf16 %v6138_v47, %v6137_v46 }
 0xaf5   : > { %7146 = vmatmul.mubr.msk.f32.vlgmr.msra.gmra.mrb[18].mxu1 %vm9387_vm11, %v9012_v8  ;;  %v6108_v8 = vld [vmem:[%s9380_s13 + $0x168] sm:$0xff] }
 0xaf6   : > { %7624 = vmatpush3.bf16.msra.mxu1 %v7621_v40  ;;  %7164 = vmatprep.mubr.msk.f32.mxu1 %vm9388_vm13, %v5282_v59  ;;  %v7645_v11 = vpack.c.bf16 %v6108_v8, %v6107_v7  ;;  %v6139_v40 = vld [vmem:[%s9380_s13 + $0x230] sm:$0xff] }
 0xaf7   : > { %7626 = vmatprep.subr.bf16.mxu1 %v7625_v51  ;;  %v7697_v50 = vpack.c.bf16 %v6140_v49, %v6139_v40 }
 0xafa   : > { %7628 = vmatpush3.bf16.msra.mxu1 %v7625_v51  ;;  %v5660_v51 = vpop.permute.xlu1 %5659 }
 0xafb   : > { %7630 = vmatprep.subr.bf16.mxu1 %v7629_v60 }
 0xafe   : > { %7632 = vmatpush3.bf16.msra.mxu1 %v7629_v60 }
 0xaff   : > { %7634 = vmatprep.subr.bf16.mxu1 %v7633_v63 }
 0xb02   : > { %7636 = vmatpush3.bf16.msra.mxu1 %v7633_v63 }
 0xb03   : > { %7638 = vmatprep.subr.bf16.mxu1 %v7637_v1 }
 0xb05   : > { %7165 = vmatmul.mubr.msk.f32.vlgmr.msra.gmra.mrb[18].mxu1 %vm9389_vm9, %v5284_v6 }
 0xb06   : > { %7640 = vmatpush3.bf16.msra.mxu1 %v7637_v1  ;;  %7183 = vmatprep.mubr.msk.f32.mxu1 %vm9390_vm15, %v5376_v9 }
 0xb07   : > { %7642 = vmatprep.subr.bf16.mxu1 %v7641_v3 }
 0xb0a   : > { %7644 = vmatpush3.bf16.msra.mxu1 %v7641_v3 }
 0xb0b   : > { %7646 = vmatprep.subr.bf16.mxu1 %v7645_v11 }
 0xb0e   : > { %7648 = vmatpush3.bf16.msra.mxu1 %v7645_v11 }
 0xb0f   : > { %7650 = vmatprep.subr.bf16.mxu1 %v7649_v14 }
 0xb12   : > { %7652 = vmatpush3.bf16.msra.mxu1 %v7649_v14 }
 0xb13   : > { %7654 = vmatprep.subr.bf16.mxu1 %v7653_v43 }
 0xb15   : > { %7184 = vmatmul.mubr.msk.f32.vlgmr.msra.gmra.mrb[18].mxu1 %vm9391_vm3, %v5378_v19 }
 0xb16   : > { %7656 = vmatpush3.bf16.msra.mxu1 %v7653_v43  ;;  %7202 = vmatprep.mubr.msk.f32.mxu1 %vm9392_vm14, %v9026_v10  ;;  %v6124_v10 = vld [vmem:[%s9380_s13 + $0x1c8] sm:$0xff] }
 0xb17   : > { %7658 = vmatprep.subr.bf16.mxu1 %v7657_v18  ;;  %v7669_v26 = vpack.c.bf16 %v6124_v10, %v6123_v25 }
 0xb1a   : > { %7660 = vmatpush3.bf16.msra.mxu1 %v7657_v18 }
 0xb1b   : > { %7662 = vmatprep.subr.bf16.mxu1 %v7661_v56 }
 0xb1e   : > { %7664 = vmatpush3.bf16.msra.mxu1 %v7661_v56 }
 0xb1f   : > { %7666 = vmatprep.subr.bf16.mxu1 %v7665_v24 }
 0xb22   : > { %7668 = vmatpush3.bf16.msra.mxu1 %v7665_v24 }
 0xb23   : > { %7670 = vmatprep.subr.bf16.mxu1 %v7669_v26 }
 0xb25   : > { %7203 = vmatmul.mubr.msk.f32.vlgmr.msra.gmra.mrb[18].mxu1 %vm9393_vm5, %v9022_v55  ;;  %v6133_v55 = vld [vmem:[%s9380_s13 + $0x200] sm:$0xff] }
 0xb26   : > { %7672 = vmatpush3.bf16.msra.mxu1 %v7669_v26  ;;  %7221 = vmatprep.mubr.msk.f32.mxu1 %vm9394_vm1, %v5564_v34  ;;  %v7685_v39 = vpack.c.bf16 %v6134_v57, %v6133_v55 }
 0xb27   : > { %7674 = vmatprep.subr.bf16.mxu1 %v7673_v31 }
 0xb2a   : > { %7676 = vmatpush3.bf16.msra.mxu1 %v7673_v31 }
 0xb2b   : > { %7678 = vmatprep.subr.bf16.mxu1 %v7677_v29 }
 0xb2e   : > { %7680 = vmatpush3.bf16.msra.mxu1 %v7677_v29 }
 0xb2f   : > { %7682 = vmatprep.subr.bf16.mxu1 %v7681_v38 }
 0xb32   : > { %7684 = vmatpush3.bf16.msra.mxu1 %v7681_v38 }
 0xb33   : > { %7686 = vmatprep.subr.bf16.mxu1 %v7685_v39 }
 0xb35   : > { %7222 = vmatmul.mubr.msk.f32.vlgmr.msra.gmra.mrb[18].mxu1 %vm9382_vm0, %v5566_v45 }
 0xb36   : > { %7688 = vmatpush3.bf16.msra.mxu1 %v7685_v39  ;;  %7240 = vmatprep.mubr.msk.f32.mxu1 %vm9395_vm2, %v5658_v58 }
 0xb37   : > { %7690 = vmatprep.subr.bf16.mxu1 %v7689_v44 }
 0xb3a   : > { %7692 = vmatpush3.bf16.msra.mxu1 %v7689_v44 }
 0xb3b   : > { %7694 = vmatprep.subr.bf16.mxu1 %v7693_v48 }
 0xb3e   : > { %7696 = vmatpush3.bf16.msra.mxu1 %v7693_v48 }
 0xb3f   : > { %7698 = vmatprep.subr.bf16.mxu1 %v7697_v50 }
 0xb42   : > { %7700 = vmatpush3.bf16.msra.mxu1 %v7697_v50 }
 0xb45   : > { %7241 = vmatmul.mubr.msk.f32.vlgmr.msra.gmra.mrb[18].mxu1 %vm9396_vm4, %v5660_v51 }
 0xc18   : > { %v7242_v30 = vpop.f32.mrb[18].mxu1 }
 0xc19   : > { %v5745_v52 = vadd.f32 %v7242_v30, %v8337_v4  ;;  %v5731_v59 = vpop.f32.mrb[19].mxu1 }
 0xc1a   : > { %v5744_v60 = vadd.f32 %v5731_v59, %v8339_v5 }
 0xc1b   : > { %v5747_v63 = vmax.f32 %v5745_v52, 0.0 }
 0xc1c   : > { %v5746_v1 = vmax.f32 %v5744_v60, 0.0 }
 0xc1d   : > { %v5749_v53 = vmin.f32 %v5747_v63, 1.0 }
 0xc1e   : > { %v5748_v2 = vmin.f32 %v5746_v1, 1.0 }
 0xc1f   : > { %v5751_v3 = vadd.f32 %v5749_v53, %v5743_v62 }
 0xc20   : > { %v5750_v6 = vadd.f32 %v5748_v2, %v5742_v37  ;;  %1664 = sbr.rel (!%p1662_p0) target bundleno = 1048 (0x418), region = 195 }
 0xc21   : > { %v5753_v7 = vmul.f32 0.2, %v5751_v3 }
 0xc22   : > { %v5752_v8 = vmul.f32 0.2, %v5750_v6 }
 0xc23   : > { %v5755_v9 = vadd.f32 %v7808_v61, %v5753_v7 }
 0xc24   : > { %v5754_v11 = vadd.f32 %v7809_v0, %v5752_v8 }
 0xc25   : > { %5759 = vst.msk [vmem:[#allocation9 + $0x8] sm:$0xff] %vm1101_vm8, %v5755_v9 }
 0xc26   : > { %5758 = vst.msk [vmem:[#allocation9] sm:$0xff] %vm1101_vm8, %v5754_v11 }
 0xc27   :  { %7821 = shalt.err (!%p7818_p5)
}
 0xc28   :  { %s7822_s28 = scalar_lea.hbm %s9337_s23, 128 }
 0xc29   :  { %p7823_p6 = scmp.ne.s32.totalorder %s9337_s23, %s7822_s28  ;;  %p7826_p7 = scmp.lt.u32.totalorder %s7822_s28, %s9337_s23 }
 0xc2b   :  { %p7828_p8 = pnand %p7826_p7, %p7823_p6 }
 0xc2d   :  { %7831 = shalt.err (!%p7828_p8)
}
 0xc2e   :  { %5780 = dma.vmem_to_hbm [thread:$0]  %s5778_s16, 128, %s9337_s23, [#allocation8]  }
 0xc2f   :  { %s7832_s18 = scalar_lea.vmem %s5800_s6, 128  ;;  %p7837_p10 = scmp.lt.s32.totalorder %s5800_s6, %s5800_s6 }
 0xc30   :  { %p7833_p9 = scmp.ne.s32.totalorder %s5800_s6, %s7832_s18  ;;  %p7838_p11 = scmp.lt.s32.totalorder %s7832_s18, %s7832_s18 }
 0xc32   :  { %p7839_p12 = por %p7838_p11, %p7837_p10 }
 0xc34   :  { %p7840_p13 = pnand %p7839_p12, %p7833_p9 }
 0xc36   :  { %7843 = shalt.err (!%p7840_p13)
}
 0xc37   :  { %s7844_s21 = scalar_lea.hbm %s9339_s25, 128 }
 0xc38   :  { %p7845_p0 = scmp.ne.s32.totalorder %s9339_s25, %s7844_s21  ;;  %p7848_p1 = scmp.lt.u32.totalorder %s7844_s21, %s9339_s25 }
 0xc3a   :  { %p7850_p2 = pnand %p7848_p1, %p7845_p0 }
 0xc3c   :  { %7853 = shalt.err (!%p7850_p2)
}
 0xc3d   :  { %5802 = dma.vmem_to_hbm [thread:$0]  %s5800_s6, 128, %s9339_s25, [#allocation11]  }
 0xc3e   :  { %s7951_s29 = smov [#allocation5]   ;;  %s7952_s8 = smov [#allocation9]  }
 0xc3f   :  { %s5767_s9 = sshll.u32 %s7951_s29, 4  ;;  %s5786_s14 = sshll.u32 %s7952_s8, 4  ;;  %s5768_s9 = int_to_ptr.vmem [resolvable:$true] %s5767_s9  ;;  %s9271_s14 = int_to_ptr.vmem [resolvable:$true] %s5786_s14 }
 0xc40   :  { %s7854_s16 = scalar_lea.vmem %s5768_s9, 32  ;;  %p7859_p4 = scmp.lt.s32.totalorder %s5768_s9, %s5768_s9 }
 0xc41   :  { %p7855_p3 = scmp.ne.s32.totalorder %s5768_s9, %s7854_s16  ;;  %p7860_p5 = scmp.lt.s32.totalorder %s7854_s16, %s7854_s16 }
 0xc43   :  { %p7861_p6 = por %p7860_p5, %p7859_p4 }
 0xc45   :  { %p7862_p7 = pnand %p7861_p6, %p7855_p3 }
 0xc47   :  { %7865 = shalt.err (!%p7862_p7)
}
 0xc48   :  { %s7866_s27 = scalar_lea.hbm %s9336_s22, 32 }
 0xc49   :  { %p7867_p8 = scmp.ne.s32.totalorder %s9336_s22, %s7866_s27  ;;  %p7870_p9 = scmp.lt.u32.totalorder %s7866_s27, %s9336_s22 }
 0xc4b   :  { %p7872_p10 = pnand %p7870_p9, %p7867_p8 }
 0xc4d   :  { %7875 = shalt.err (!%p7872_p10)
}
 0xc4e   :  { %5770 = dma.vmem_to_hbm [thread:$0]  %s5768_s9, 32, %s9336_s22, [#allocation6]  }
 0xc4f   :  { %s7876_s11 = scalar_lea.vmem %s9271_s14, 256  ;;  %p7881_p12 = scmp.lt.s32.totalorder %s9271_s14, %s9271_s14 }
 0xc50   :  { %p7877_p11 = scmp.ne.s32.totalorder %s9271_s14, %s7876_s11  ;;  %p7882_p13 = scmp.lt.s32.totalorder %s7876_s11, %s7876_s11 }
 0xc52   :  { %p7883_p0 = por %p7882_p13, %p7881_p12 }
 0xc54   :  { %p7884_p1 = pnand %p7883_p0, %p7877_p11 }
 0xc56   :  { %7887 = shalt.err (!%p7884_p1)
}
 0xc57   :  { %s7888_s17 = scalar_lea.hbm %s9338_s24, 256 }
 0xc58   :  { %p7889_p2 = scmp.ne.s32.totalorder %s9338_s24, %s7888_s17  ;;  %p7892_p3 = scmp.lt.u32.totalorder %s7888_s17, %s9338_s24 }
 0xc5a   :  { %p7894_p4 = pnand %p7892_p3, %p7889_p2 }
 0xc5c   :  { %7897 = shalt.err (!%p7894_p4)
}
 0xc5d   :  { %s7953_s22 = smov 128   ;;  %s7954_s30 = smov 8  }
 0xc5e   :  { %5792 = dma.vmem_to_hbm [thread:$0]  %s9271_s14, 256, %s9338_s24, [#allocation8], %s7953_s22, %s7953_s22, %s7954_s30  }
 0xc5f   :  { %s7955_s13 = smov [#allocation12]  }
 0xc60   :  { %s5808_s23 = sshll.u32 %s7955_s13, 4  ;;  %s5809_s23 = int_to_ptr.vmem [resolvable:$true] %s5808_s23 }
 0xc61   :  { %s7898_s10 = scalar_lea.vmem %s5809_s23, 256  ;;  %p7903_p6 = scmp.lt.s32.totalorder %s5809_s23, %s5809_s23 }
 0xc62   :  { %p7899_p5 = scmp.ne.s32.totalorder %s5809_s23, %s7898_s10  ;;  %p7904_p7 = scmp.lt.s32.totalorder %s7898_s10, %s7898_s10 }
 0xc64   :  { %p7905_p8 = por %p7904_p7, %p7903_p6 }
 0xc66   :  { %p7906_p9 = pnand %p7905_p8, %p7899_p5 }
 0xc68   :  { %7909 = shalt.err (!%p7906_p9)
}
 0xc69   :  { %s7910_s8 = scalar_lea.hbm %s9340_s26, 256 }
 0xc6a   :  { %p7911_p10 = scmp.ne.s32.totalorder %s9340_s26, %s7910_s8  ;;  %p7914_p11 = scmp.lt.u32.totalorder %s7910_s8, %s9340_s26 }
 0xc6c   :  { %p7916_p12 = pnand %p7914_p11, %p7911_p10 }
 0xc6e   :  { %7919 = shalt.err (!%p7916_p12)
}
 0xc6f   :  { %5814 = dma.vmem_to_hbm [thread:$0]  %s5809_s23, 256, %s9340_s26, [#allocation11], %s7953_s22, %s7953_s22, %s7954_s30  }
 0xc70   :  { %7924 = dma.done.wait [#allocation6], 32  }
 0xc71   :  { %7925 = vsyncadd [#allocation6], 4294967264 }
 0xc72   :  { %7926 = dma.done.wait [#allocation8], 384  }
 0xc73   :  { %7927 = vsyncadd [#allocation8], 4294966912 }
 0xc74   :  { %7928 = dma.done.wait [#allocation11], 384  }
 0xc75   :  { %7929 = vsyncadd [#allocation11], 4294966912 }
 0xc76   :  { %5830 = vsyncpa [#allocation6], 1 }
 0xc77   :  { %5831 = vsyncpa [#allocation8], 1 }
 0xc78   :  { %5832 = vsyncpa [#allocation11], 1 }

</bundles_post_ra>
